<compile_context>
chip_gen: v7x
topology: tpu7x:2x2x1
jax: 0.10.0
libtpu: 0.0.40
codegen_flags: <defaults>
</compile_context>

<pallas_src>
import functools

import numpy as np
import jax
import jax.numpy as jnp
from jax import lax
from jax.experimental import pallas as pl
from jax.experimental.pallas import tpu as pltpu

TM_MAX = 2048     # max pixel columns (lanes) per grid step; sweepable
ROWS = 152        # packed slab rows per decoder: wa1(16) + wa2(64) + wh(64) + wo(2) + pad


def _elementwise_dtype():
    """bf16 elementwise math only where the VPU/EUP are bf16-native (v6e/v7x)."""
    try:
        kind = jax.devices()[0].device_kind.lower()
    except Exception:
        return jnp.float32
    return jnp.bfloat16 if ("v6" in kind or "v7" in kind) else jnp.float32


# ---------------------------------------------------------------------------
# in-kernel math helpers (channels-first layout: arrays are (C, TM))
# ---------------------------------------------------------------------------
def _gelu(x):
    # NOTE: tanh-approximate GELU used consistently in-kernel and in the backbone
    # (nn.GELU is erf-exact; max abs diff ~1e-3) to guarantee Mosaic lowering.
    return jax.nn.gelu(x, approximate=True)


def _l2_normalize_ax0(x, eps=1e-12):
    # == torch.nn.functional.normalize(..., dim=1) in NCHW
    n = jnp.sqrt(jnp.sum(x * x, axis=0, keepdims=True))
    return x / jnp.maximum(n, eps)


def _thin_k_matmul(w, x):
    """(out, k) @ (k, TM) with k in {2,3}: VPU outer-product accumulation instead of a
    degenerate-K MXU matmul. w may be bf16; x is f32 -> result f32."""
    out = None
    for k in range(int(w.shape[1])):
        t = w[:, k:k + 1] * x[k:k + 1, :]
        out = t if out is None else out + t
    return out


def _decoder(feat, q_pieces, slab, cdt):
    """att_res_mlp_LN_sparse(in_c1=64, in_c2, out_c=2, use_sigmoid=True, activation=gelu).

    # TODO(synk): att_res_mlp_LN_sparse source was not provided; implemented as a sigmoid
    # attention gate over the 64-c features driven by the LayerNormed query, followed by a
    # LayerNorm residual GELU MLP head (spectral_norm omitted for inference).

    feat     : (64, TM) bf16 features (cast at first use, never materialized in f32)
    q_pieces : list of (c_i, TM) f32 query chunks (their channel concat is the query)
    slab     : (ROWS, 128) bf16; cols 0:64 = matrices (LN affines pre-folded),
               col 64 = biases (ba1', ba2, bh', bo).
    cdt      : elementwise compute dtype (bf16 on v6e/v7x, f32 on v5e).
    """
    # ---- query LayerNorm statistics over the virtual concat (single pass, f32) ----
    nq = float(sum(int(p.shape[0]) for p in q_pieces))
    s = sum(jnp.sum(p, axis=0, keepdims=True) for p in q_pieces)
    ss = sum(jnp.sum(p * p, axis=0, keepdims=True) for p in q_pieces)
    mean = s / nq
    var = jnp.maximum(ss / nq - mean * mean, 0.0)
    r = lax.rsqrt(var + 1e-5)

    # ---- attention branch: sigmoid(Wa2 @ gelu(Wa1' @ LNstd(q) + ba1') + ba2) ----
    h = slab[0:16, 64:65].astype(jnp.float32)                       # ba1' (16, 1)
    off = 0
    for p in q_pieces:
        k = int(p.shape[0])
        qn = (p - mean) * r                                         # (k, TM) f32
        h = h + _thin_k_matmul(slab[0:16, off:off + k], qn)
        off += k
    h = _gelu(h)                                                    # (16, TM) f32
    att = jnp.dot(slab[16:80, 0:16], h.astype(jnp.bfloat16),
                  preferred_element_type=jnp.float32)
    att = att + slab[16:80, 64:65].astype(jnp.float32)
    att = jax.nn.sigmoid(att.astype(cdt))                           # (64, TM) cdt

    # ---- gated residual MLP head (key LN affine folded into Wh') ----
    x = feat * att                                                  # (64, TM) cdt
    mx = jnp.sum(x, axis=0, keepdims=True, dtype=jnp.float32) * (1.0 / 64.0)
    mx2 = jnp.sum(x * x, axis=0, keepdims=True, dtype=jnp.float32) * (1.0 / 64.0)
    rx = lax.rsqrt(jnp.maximum(mx2 - mx * mx, 0.0) + 1e-5)
    xn = (x - mx.astype(cdt)) * rx.astype(cdt)                      # (64, TM) cdt
    xh = jnp.dot(slab[80:144, 0:64], xn.astype(jnp.bfloat16),
                 preferred_element_type=jnp.float32)
    xh = xh + slab[80:144, 64:65].astype(jnp.float32)
    xh = _gelu(xh.astype(cdt)) + x                                  # residual, cdt
    out = jnp.dot(slab[144:146, 0:64], xh.astype(jnp.bfloat16),
                  preferred_element_type=jnp.float32)
    return out + slab[144:146, 64:65].astype(jnp.float32)           # (2, TM) f32


# ---------------------------------------------------------------------------
# fused sampler kernel: both GripperGraspSamplers in one pass over the pixels
# ---------------------------------------------------------------------------
def _fused_sampler_kernel(feat_ref, appr_ref, slab_ref, out1_ref, out2_ref, *, cdt):
    feat = feat_ref[...]                                            # (64, TM) bf16
    a = _l2_normalize_ax0(appr_ref[...].astype(jnp.float32))        # (3, TM) f32

    # NOTE: the two samplers' weights cannot be stacked along N (their attention gates
    # differ, so the gated inputs differ); fusion shares the feat load, the approach
    # normalization, and the grid instead.
    beta1 = _l2_normalize_ax0(_decoder(feat, [a], slab_ref[0], cdt))          # (2, TM)
    dw1 = _decoder(feat, [a, beta1], slab_ref[1], cdt)                        # (2, TM)
    beta2 = _l2_normalize_ax0(_decoder(feat, [a], slab_ref[2], cdt))
    dw2 = _decoder(feat, [a, beta2], slab_ref[3], cdt)

    # pose = cat([approach, beta, dist_width]) along channels, one output per sampler.
    out1_ref[0:3, :] = a
    out1_ref[3:5, :] = beta1
    out1_ref[5:7, :] = dw1
    out2_ref[0:3, :] = a
    out2_ref[3:5, :] = beta2
    out2_ref[5:7, :] = dw2


# ---------------------------------------------------------------------------
# weight packing (host side, hoisted out of the forward path; LN affines folded)
# ---------------------------------------------------------------------------
def _pack_decoder(d):
    in_c2 = int(d["wa1"].shape[1])
    # Fold LayerNorm affine into the next linear layer (exact rewrite):
    #   W @ (std(x)*g + b) + bias == (W*diag(g)) @ std(x) + (W@b + bias)
    wa1 = d["wa1"] * d["lnq_g"][None, :]
    ba1 = d["ba1"] + d["wa1"] @ d["lnq_b"]
    wh = d["wh"] * d["lnk_g"][None, :]
    bh = d["bh"] + d["wh"] @ d["lnk_b"]

    s = jnp.zeros((ROWS, 128), jnp.float32)
    s = s.at[0:16, 0:in_c2].set(wa1)            # (16, in_c2)
    s = s.at[16:80, 0:16].set(d["wa2"])         # (64, 16)
    s = s.at[80:144, 0:64].set(wh)              # (64, 64)
    s = s.at[144:146, 0:64].set(d["wo"])        # (2, 64)
    s = s.at[0:16, 64].set(ba1)                 # biases live in lane 64
    s = s.at[16:80, 64].set(d["ba2"])
    s = s.at[80:144, 64].set(bh)
    s = s.at[144:146, 64].set(d["bo"])
    return s


def pack_mh_g(params):
    """Precompute the bf16 (4, ROWS, 128) weight slab once (not per forward)."""
    decs = [params["sampler1"]["beta"], params["sampler1"]["dist_width"],
            params["sampler2"]["beta"], params["sampler2"]["dist_width"]]
    slab = jnp.stack([_pack_decoder(d) for d in decs]).astype(jnp.bfloat16)
    out = dict(params)
    out["slab"] = slab
    return out


# ---------------------------------------------------------------------------
# pallas_call wrapper
# ---------------------------------------------------------------------------
def _pick_tm(hw, batch):
    tm = min(TM_MAX, pl.cdiv(hw, 128) * 128)
    # v7x megacore: keep at least 2 total grid steps so both TensorCores get work.
    while tm > 128 and batch * pl.cdiv(hw, tm) < 2:
        tm = max(128, ((tm // 2 + 127) // 128) * 128)
    return tm


def fused_grasp_samplers(slab, feat, appr):
    """feat: (B, 64, HW) bf16, appr: (B, 3, HW) f32 -> (pose1, pose2), each (B, 7, HW) f32."""
    B, _, HW = feat.shape
    tm = _pick_tm(HW, B)
    tiles = pl.cdiv(HW, tm)
    HWp = tiles * tm
    if HWp != HW:
        feat = jnp.pad(feat, ((0, 0), (0, 0), (0, HWp - HW)))
        appr = jnp.pad(appr, ((0, 0), (0, 0), (0, HWp - HW)))

    npx = B * HWp
    macs_px = 4 * (16 * 5 + 64 * 16 + 64 * 64 + 2 * 64)
    cost = pl.CostEstimate(
        flops=2 * macs_px * npx,
        transcendentals=600 * npx,
        bytes_accessed=npx * (64 * 2 + 3 * 4 + 2 * 7 * 4) + slab.size * 2)

    cdt = _elementwise_dtype()
    kernel = functools.partial(_fused_sampler_kernel, cdt=cdt)

    pose1, pose2 = pl.pallas_call(
        kernel,
        out_shape=(jax.ShapeDtypeStruct((B, 7, HWp), jnp.float32),
                   jax.ShapeDtypeStruct((B, 7, HWp), jnp.float32)),
        grid=(B, tiles),
        in_specs=[
            pl.BlockSpec((pl.Squeezed(), 64, tm), lambda b, i: (b, 0, i)),   # features bf16
            pl.BlockSpec((pl.Squeezed(), 3, tm), lambda b, i: (b, 0, i)),    # approach f32
            pl.BlockSpec((4, ROWS, 128), lambda b, i: (0, 0, 0)),            # weight slab
        ],
        out_specs=[
            pl.BlockSpec((pl.Squeezed(), 7, tm), lambda b, i: (b, 0, i)),
            pl.BlockSpec((pl.Squeezed(), 7, tm), lambda b, i: (b, 0, i)),
        ],
        compiler_params=pltpu.CompilerParams(
            dimension_semantics=("parallel", "parallel")),
        cost_estimate=cost,
    )(feat, appr, slab)

    if HWp != HW:
        pose1 = pose1[:, :, :HW]
        pose2 = pose2[:, :, :HW]
    return pose1, pose2


# ---------------------------------------------------------------------------
# MH_G glue (plain JAX: standardization, backbone stand-in, layout plumbing)
# ---------------------------------------------------------------------------
def standardize_depth(depth):
    # TODO(synk): standardize_depth source not provided; per-image zero-mean/unit-std.
    mean = jnp.mean(depth, axis=(1, 2, 3), keepdims=True)
    std = jnp.std(depth, axis=(1, 2, 3), keepdims=True)
    return (depth - mean) / (std + 1e-5)


def backbone_apply(p, depth):
    # TODO(synk): res_unet(in_c=1, Instance_norm=True, activation=gelu) source was not
    # provided; stand-in = one 3x3 conv (1->64) via lax.conv (no host-side im2col)
    # + InstanceNorm2d(affine=False) + GELU, emitted directly as bf16 (halves the
    # dominant HBM stream feeding the sampler kernel).
    feat = lax.conv_general_dilated(depth, p["w"], window_strides=(1, 1), padding="SAME",
                                    dimension_numbers=("NCHW", "OIHW", "NCHW"))
    feat = feat + p["b"][None, :, None, None]
    mean = jnp.mean(feat, axis=(2, 3), keepdims=True)
    var = jnp.var(feat, axis=(2, 3), keepdims=True)
    feat = (feat - mean) * lax.rsqrt(var + 1e-5)
    return jax.nn.gelu(feat, approximate=True).astype(jnp.bfloat16)    # (B, 64, H, W)


def mh_g_forward(params, depth, approach1, approach2, detach_backbone=False):
    del approach1  # NOTE: reproduces the reference forward exactly — it overwrites
    #                approach1 with approach2, so BOTH samplers consume approach2.
    depth = standardize_depth(depth)
    feat = backbone_apply(params["backbone"], depth)     # (B, 64, H, W) bf16
    if detach_backbone:
        feat = lax.stop_gradient(feat)
    B, _, H, W = feat.shape

    # channels-major per image already: just view as (B, C, H*W) — no transpose.
    feat = feat.reshape(B, 64, H * W)
    appr = approach2.astype(jnp.float32).reshape(B, 3, H * W)

    pose1, pose2 = fused_grasp_samplers(params["slab"], feat, appr)
    return pose1.reshape(B, 7, H, W), pose2.reshape(B, 7, H, W)


# ---------------------------------------------------------------------------
# deterministic parameter init (weights stored PyTorch-Linear style: (out, in))
# ---------------------------------------------------------------------------
def _linear_init(key, fan_in, fan_out):
    bound = 1.0 / np.sqrt(fan_in)
    return jax.random.uniform(key, (fan_out, fan_in), jnp.float32, -bound, bound)


def init_att_res_mlp(key, in_c1, in_c2, out_c, hidden=16):
    k = jax.random.split(key, 4)
    f32 = jnp.float32
    return {
        "lnq_g": jnp.ones((in_c2,), f32), "lnq_b": jnp.zeros((in_c2,), f32),
        "wa1": _linear_init(k[0], in_c2, hidden), "ba1": jnp.zeros((hidden,), f32),
        "wa2": _linear_init(k[1], hidden, in_c1), "ba2": jnp.zeros((in_c1,), f32),
        "lnk_g": jnp.ones((in_c1,), f32), "lnk_b": jnp.zeros((in_c1,), f32),
        "wh": _linear_init(k[2], in_c1, in_c1), "bh": jnp.zeros((in_c1,), f32),
        "wo": _linear_init(k[3], in_c1, out_c), "bo": jnp.zeros((out_c,), f32),
    }


def init_sampler(key):
    kb, kd = jax.random.split(key)
    return {"beta": init_att_res_mlp(kb, 64, 3, 2),
            "dist_width": init_att_res_mlp(kd, 64, 5, 2)}


def init_mh_g(key):
    kb, k1, k2 = jax.random.split(key, 3)
    bound = 1.0 / np.sqrt(9.0)
    return {"backbone": {"w": jax.random.uniform(kb, (64, 1, 3, 3), jnp.float32,
                                                 -bound, bound),
                         "b": jnp.zeros((64,), jnp.float32)},
            "sampler1": init_sampler(k1),
            "sampler2": init_sampler(k2)}


# ---------------------------------------------------------------------------
if __name__ == "__main__":
    key = jax.random.PRNGKey(0)
    kd, ka1, ka2, kp = jax.random.split(key, 4)
    B, H, W = 2, 16, 16
    depth = jax.random.uniform(kd, (B, 1, H, W), jnp.float32, 0.3, 1.5)
    approach1 = jax.random.normal(ka1, (B, 3, H, W), jnp.float32)
    approach2 = jax.random.normal(ka2, (B, 3, H, W), jnp.float32)

    params = pack_mh_g(init_mh_g(kp))    # weight slab packed once, off the forward path

    fwd = jax.jit(mh_g_forward, static_argnames=("detach_backbone",))
    pose1, pose2 = fwd(params, depth, approach1, approach2)
    jax.block_until_ready((pose1, pose2))

    assert pose1.shape == (B, 7, H, W) and pose2.shape == (B, 7, H, W)
    assert bool(jnp.all(jnp.isfinite(pose1))) and bool(jnp.all(jnp.isfinite(pose2)))
    # approach part of the pose must be unit-norm along the channel dim
    napp = jnp.linalg.norm(pose1[:, 0:3], axis=1)
    assert bool(jnp.allclose(napp, 1.0, atol=1e-4))
    # both samplers consume the same (normalized) approach2
    assert bool(jnp.allclose(pose1[:, 0:3], pose2[:, 0:3], atol=1e-5))
    print("KERNEL_OK")
</pallas_src>

<mosaic_0001>
module attributes {stable_mosaic.version = 11 : i64} {
  func.func @_fused_sampler_kernel(%arg0: i32, %arg1: i32, %arg2: memref<1x64x256xbf16, #tpu.memory_space<vmem>>, %arg3: memref<1x3x256xf32, #tpu.memory_space<vmem>>, %arg4: memref<4x152x128xbf16, #tpu.memory_space<vmem>>, %arg5: memref<1x7x256xf32, #tpu.memory_space<vmem>>, %arg6: memref<1x7x256xf32, #tpu.memory_space<vmem>>) attributes {dimension_semantics = [#tpu.dimension_semantics<parallel>, #tpu.dimension_semantics<parallel>], iteration_bounds = array<i64: 2, 1>, scalar_prefetch = 0 : i64, scratch_operands = 0 : i64, tpu.core_type = #tpu.core_type<tc>, window_params = [{transform_indices = @transform_0, window_bounds = array<i64: 1, 64, 256>}, {transform_indices = @transform_1, window_bounds = array<i64: 1, 3, 256>}, {pipeline_mode = #tpu.pipeline_mode<synchronous>, transform_indices = @transform_2, window_bounds = array<i64: 4, 152, 128>}, {transform_indices = @transform_3, window_bounds = array<i64: 1, 7, 256>}, {transform_indices = @transform_4, window_bounds = array<i64: 1, 7, 256>}]} {
    %c0 = arith.constant 0 : index
    %c0_0 = arith.constant 0 : index
    %c0_1 = arith.constant 0 : index
    %0 = vector.load %arg2[%c0, %c0_0, %c0_1] : memref<1x64x256xbf16, #tpu.memory_space<vmem>>, vector<1x64x256xbf16>
    %1 = vector.shape_cast %0 : vector<1x64x256xbf16> to vector<64x256xbf16>
    %c0_2 = arith.constant 0 : index
    %c0_3 = arith.constant 0 : index
    %c0_4 = arith.constant 0 : index
    %2 = vector.load %arg3[%c0_2, %c0_3, %c0_4] : memref<1x3x256xf32, #tpu.memory_space<vmem>>, vector<1x3x256xf32>
    %3 = vector.shape_cast %2 : vector<1x3x256xf32> to vector<3x256xf32>
    %4 = arith.mulf %3, %3 : vector<3x256xf32>
    %cst = arith.constant dense<0.000000e+00> : vector<256xf32>
    %5 = vector.multi_reduction <add>, %4, %cst [0] : vector<3x256xf32> to vector<256xf32>
    %6 = vector.shape_cast %5 : vector<256xf32> to vector<1x256xf32>
    %7 = math.sqrt %6 : vector<1x256xf32>
    %cst_5 = arith.constant 9.99999996E-13 : f32
    %8 = vector.broadcast %cst_5 : f32 to vector<1x256xf32>
    %9 = arith.maximumf %7, %8 : vector<1x256xf32>
    %10 = vector.broadcast %9 : vector<1x256xf32> to vector<3x256xf32>
    %11 = arith.divf %3, %10 : vector<3x256xf32>
    %c0_6 = arith.constant 0 : index
    %c0_7 = arith.constant 0 : index
    %c0_8 = arith.constant 0 : index
    %12 = vector.load %arg4[%c0_6, %c0_7, %c0_8] : memref<4x152x128xbf16, #tpu.memory_space<vmem>>, vector<1x152x128xbf16>
    %13 = vector.shape_cast %12 : vector<1x152x128xbf16> to vector<152x128xbf16>
    %cst_9 = arith.constant dense<0.000000e+00> : vector<256xf32>
    %14 = vector.multi_reduction <add>, %11, %cst_9 [0] : vector<3x256xf32> to vector<256xf32>
    %15 = vector.shape_cast %14 : vector<256xf32> to vector<1x256xf32>
    %cst_10 = arith.constant 0.000000e+00 : f32
    %16 = vector.broadcast %cst_10 : f32 to vector<1x256xf32>
    %17 = arith.addf %16, %15 : vector<1x256xf32>
    %18 = arith.mulf %11, %11 : vector<3x256xf32>
    %cst_11 = arith.constant dense<0.000000e+00> : vector<256xf32>
    %19 = vector.multi_reduction <add>, %18, %cst_11 [0] : vector<3x256xf32> to vector<256xf32>
    %20 = vector.shape_cast %19 : vector<256xf32> to vector<1x256xf32>
    %cst_12 = arith.constant 0.000000e+00 : f32
    %21 = vector.broadcast %cst_12 : f32 to vector<1x256xf32>
    %22 = arith.addf %21, %20 : vector<1x256xf32>
    %cst_13 = arith.constant 3.000000e+00 : f32
    %23 = vector.broadcast %cst_13 : f32 to vector<1x256xf32>
    %24 = arith.divf %17, %23 : vector<1x256xf32>
    %cst_14 = arith.constant 3.000000e+00 : f32
    %25 = vector.broadcast %cst_14 : f32 to vector<1x256xf32>
    %26 = arith.divf %22, %25 : vector<1x256xf32>
    %27 = arith.mulf %24, %24 : vector<1x256xf32>
    %28 = arith.subf %26, %27 : vector<1x256xf32>
    %cst_15 = arith.constant 0.000000e+00 : f32
    %29 = vector.broadcast %cst_15 : f32 to vector<1x256xf32>
    %30 = arith.maximumf %28, %29 : vector<1x256xf32>
    %cst_16 = arith.constant 9.99999974E-6 : f32
    %31 = vector.broadcast %cst_16 : f32 to vector<1x256xf32>
    %32 = arith.addf %30, %31 : vector<1x256xf32>
    %33 = math.rsqrt %32 : vector<1x256xf32>
    %34 = vector.extract_strided_slice %13 {offsets = [0, 64], sizes = [16, 1], strides = [1, 1]} : vector<152x128xbf16> to vector<16x1xbf16>
    %35 = arith.extf %34 : vector<16x1xbf16> to vector<16x1xf32>
    %36 = vector.broadcast %24 : vector<1x256xf32> to vector<3x256xf32>
    %37 = arith.subf %11, %36 : vector<3x256xf32>
    %38 = vector.broadcast %33 : vector<1x256xf32> to vector<3x256xf32>
    %39 = arith.mulf %37, %38 : vector<3x256xf32>
    %40 = vector.extract_strided_slice %13 {offsets = [0, 0], sizes = [16, 3], strides = [1, 1]} : vector<152x128xbf16> to vector<16x3xbf16>
    %41 = vector.extract_strided_slice %40 {offsets = [0, 0], sizes = [16, 1], strides = [1, 1]} : vector<16x3xbf16> to vector<16x1xbf16>
    %42 = vector.extract_strided_slice %39 {offsets = [0, 0], sizes = [1, 256], strides = [1, 1]} : vector<3x256xf32> to vector<1x256xf32>
    %43 = arith.extf %41 : vector<16x1xbf16> to vector<16x1xf32>
    %44 = vector.broadcast %43 : vector<16x1xf32> to vector<16x256xf32>
    %45 = vector.broadcast %42 : vector<1x256xf32> to vector<16x256xf32>
    %46 = arith.mulf %44, %45 : vector<16x256xf32>
    %47 = vector.extract_strided_slice %40 {offsets = [0, 1], sizes = [16, 1], strides = [1, 1]} : vector<16x3xbf16> to vector<16x1xbf16>
    %48 = vector.extract_strided_slice %39 {offsets = [1, 0], sizes = [1, 256], strides = [1, 1]} : vector<3x256xf32> to vector<1x256xf32>
    %49 = arith.extf %47 : vector<16x1xbf16> to vector<16x1xf32>
    %50 = vector.broadcast %49 : vector<16x1xf32> to vector<16x256xf32>
    %51 = vector.broadcast %48 : vector<1x256xf32> to vector<16x256xf32>
    %52 = arith.mulf %50, %51 : vector<16x256xf32>
    %53 = arith.addf %46, %52 : vector<16x256xf32>
    %54 = vector.extract_strided_slice %40 {offsets = [0, 2], sizes = [16, 1], strides = [1, 1]} : vector<16x3xbf16> to vector<16x1xbf16>
    %55 = vector.extract_strided_slice %39 {offsets = [2, 0], sizes = [1, 256], strides = [1, 1]} : vector<3x256xf32> to vector<1x256xf32>
    %56 = arith.extf %54 : vector<16x1xbf16> to vector<16x1xf32>
    %57 = vector.broadcast %56 : vector<16x1xf32> to vector<16x256xf32>
    %58 = vector.broadcast %55 : vector<1x256xf32> to vector<16x256xf32>
    %59 = arith.mulf %57, %58 : vector<16x256xf32>
    %60 = arith.addf %53, %59 : vector<16x256xf32>
    %61 = vector.broadcast %35 : vector<16x1xf32> to vector<16x256xf32>
    %62 = arith.addf %61, %60 : vector<16x256xf32>
    %63 = arith.mulf %62, %62 : vector<16x256xf32>
    %64 = arith.mulf %62, %63 : vector<16x256xf32>
    %cst_17 = arith.constant 4.471500e-02 : f32
    %65 = vector.broadcast %cst_17 : f32 to vector<16x256xf32>
    %66 = arith.mulf %65, %64 : vector<16x256xf32>
    %67 = arith.addf %62, %66 : vector<16x256xf32>
    %cst_18 = arith.constant 0.797884583 : f32
    %68 = vector.broadcast %cst_18 : f32 to vector<16x256xf32>
    %69 = arith.mulf %68, %67 : vector<16x256xf32>
    %70 = math.tanh %69 : vector<16x256xf32>
    %cst_19 = arith.constant 1.000000e+00 : f32
    %71 = vector.broadcast %cst_19 : f32 to vector<16x256xf32>
    %72 = arith.addf %71, %70 : vector<16x256xf32>
    %cst_20 = arith.constant 5.000000e-01 : f32
    %73 = vector.broadcast %cst_20 : f32 to vector<16x256xf32>
    %74 = arith.mulf %73, %72 : vector<16x256xf32>
    %75 = arith.mulf %62, %74 : vector<16x256xf32>
    %76 = vector.extract_strided_slice %13 {offsets = [16, 0], sizes = [64, 16], strides = [1, 1]} : vector<152x128xbf16> to vector<64x16xbf16>
    %77 = arith.truncf %75 : vector<16x256xf32> to vector<16x256xbf16>
    %cst_21 = arith.constant dense<0.000000e+00> : vector<64x256xf32>
    %78 = tpu.matmul %76, %77, %cst_21 {dimension_numbers = #tpu.dot_dimension_numbers<[1], [0], [0], [1], [0, 0, 1, 1], [], []>} : vector<64x16xbf16>, vector<16x256xbf16>, vector<64x256xf32> -> vector<64x256xf32>
    %79 = vector.extract_strided_slice %13 {offsets = [16, 64], sizes = [64, 1], strides = [1, 1]} : vector<152x128xbf16> to vector<64x1xbf16>
    %80 = arith.extf %79 : vector<64x1xbf16> to vector<64x1xf32>
    %81 = vector.broadcast %80 : vector<64x1xf32> to vector<64x256xf32>
    %82 = arith.addf %78, %81 : vector<64x256xf32>
    %83 = arith.negf %82 : vector<64x256xf32>
    %84 = math.exp %83 : vector<64x256xf32>
    %cst_22 = arith.constant 1.000000e+00 : f32
    %85 = vector.broadcast %cst_22 : f32 to vector<64x256xf32>
    %86 = arith.addf %85, %84 : vector<64x256xf32>
    %87 = arith.divf %85, %86 : vector<64x256xf32>
    %88 = arith.extf %1 : vector<64x256xbf16> to vector<64x256xf32>
    %89 = arith.mulf %88, %87 : vector<64x256xf32>
    %cst_23 = arith.constant dense<0.000000e+00> : vector<256xf32>
    %90 = vector.multi_reduction <add>, %89, %cst_23 [0] : vector<64x256xf32> to vector<256xf32>
    %91 = vector.shape_cast %90 : vector<256xf32> to vector<1x256xf32>
    %cst_24 = arith.constant 1.562500e-02 : f32
    %92 = vector.broadcast %cst_24 : f32 to vector<1x256xf32>
    %93 = arith.mulf %91, %92 : vector<1x256xf32>
    %94 = arith.mulf %89, %89 : vector<64x256xf32>
    %cst_25 = arith.constant dense<0.000000e+00> : vector<256xf32>
    %95 = vector.multi_reduction <add>, %94, %cst_25 [0] : vector<64x256xf32> to vector<256xf32>
    %96 = vector.shape_cast %95 : vector<256xf32> to vector<1x256xf32>
    %cst_26 = arith.constant 1.562500e-02 : f32
    %97 = vector.broadcast %cst_26 : f32 to vector<1x256xf32>
    %98 = arith.mulf %96, %97 : vector<1x256xf32>
    %99 = arith.mulf %93, %93 : vector<1x256xf32>
    %100 = arith.subf %98, %99 : vector<1x256xf32>
    %cst_27 = arith.constant 0.000000e+00 : f32
    %101 = vector.broadcast %cst_27 : f32 to vector<1x256xf32>
    %102 = arith.maximumf %100, %101 : vector<1x256xf32>
    %cst_28 = arith.constant 9.99999974E-6 : f32
    %103 = vector.broadcast %cst_28 : f32 to vector<1x256xf32>
    %104 = arith.addf %102, %103 : vector<1x256xf32>
    %105 = math.rsqrt %104 : vector<1x256xf32>
    %106 = vector.broadcast %93 : vector<1x256xf32> to vector<64x256xf32>
    %107 = arith.subf %89, %106 : vector<64x256xf32>
    %108 = vector.broadcast %105 : vector<1x256xf32> to vector<64x256xf32>
    %109 = arith.mulf %107, %108 : vector<64x256xf32>
    %110 = vector.extract_strided_slice %13 {offsets = [80, 0], sizes = [64, 64], strides = [1, 1]} : vector<152x128xbf16> to vector<64x64xbf16>
    %111 = arith.truncf %109 : vector<64x256xf32> to vector<64x256xbf16>
    %cst_29 = arith.constant dense<0.000000e+00> : vector<64x256xf32>
    %112 = tpu.matmul %110, %111, %cst_29 {dimension_numbers = #tpu.dot_dimension_numbers<[1], [0], [0], [1], [0, 0, 1, 1], [], []>} : vector<64x64xbf16>, vector<64x256xbf16>, vector<64x256xf32> -> vector<64x256xf32>
    %113 = vector.extract_strided_slice %13 {offsets = [80, 64], sizes = [64, 1], strides = [1, 1]} : vector<152x128xbf16> to vector<64x1xbf16>
    %114 = arith.extf %113 : vector<64x1xbf16> to vector<64x1xf32>
    %115 = vector.broadcast %114 : vector<64x1xf32> to vector<64x256xf32>
    %116 = arith.addf %112, %115 : vector<64x256xf32>
    %117 = arith.mulf %116, %116 : vector<64x256xf32>
    %118 = arith.mulf %116, %117 : vector<64x256xf32>
    %cst_30 = arith.constant 4.471500e-02 : f32
    %119 = vector.broadcast %cst_30 : f32 to vector<64x256xf32>
    %120 = arith.mulf %119, %118 : vector<64x256xf32>
    %121 = arith.addf %116, %120 : vector<64x256xf32>
    %cst_31 = arith.constant 0.797884583 : f32
    %122 = vector.broadcast %cst_31 : f32 to vector<64x256xf32>
    %123 = arith.mulf %122, %121 : vector<64x256xf32>
    %124 = math.tanh %123 : vector<64x256xf32>
    %cst_32 = arith.constant 1.000000e+00 : f32
    %125 = vector.broadcast %cst_32 : f32 to vector<64x256xf32>
    %126 = arith.addf %125, %124 : vector<64x256xf32>
    %cst_33 = arith.constant 5.000000e-01 : f32
    %127 = vector.broadcast %cst_33 : f32 to vector<64x256xf32>
    %128 = arith.mulf %127, %126 : vector<64x256xf32>
    %129 = arith.mulf %116, %128 : vector<64x256xf32>
    %130 = arith.addf %129, %89 : vector<64x256xf32>
    %131 = vector.extract_strided_slice %13 {offsets = [144, 0], sizes = [2, 64], strides = [1, 1]} : vector<152x128xbf16> to vector<2x64xbf16>
    %132 = arith.truncf %130 : vector<64x256xf32> to vector<64x256xbf16>
    %cst_34 = arith.constant dense<0.000000e+00> : vector<2x256xf32>
    %133 = tpu.matmul %131, %132, %cst_34 {dimension_numbers = #tpu.dot_dimension_numbers<[1], [0], [0], [1], [0, 0, 1, 1], [], []>} : vector<2x64xbf16>, vector<64x256xbf16>, vector<2x256xf32> -> vector<2x256xf32>
    %134 = vector.extract_strided_slice %13 {offsets = [144, 64], sizes = [2, 1], strides = [1, 1]} : vector<152x128xbf16> to vector<2x1xbf16>
    %135 = arith.extf %134 : vector<2x1xbf16> to vector<2x1xf32>
    %136 = vector.broadcast %135 : vector<2x1xf32> to vector<2x256xf32>
    %137 = arith.addf %133, %136 : vector<2x256xf32>
    %138 = arith.mulf %137, %137 : vector<2x256xf32>
    %cst_35 = arith.constant dense<0.000000e+00> : vector<256xf32>
    %139 = vector.multi_reduction <add>, %138, %cst_35 [0] : vector<2x256xf32> to vector<256xf32>
    %140 = vector.shape_cast %139 : vector<256xf32> to vector<1x256xf32>
    %141 = math.sqrt %140 : vector<1x256xf32>
    %cst_36 = arith.constant 9.99999996E-13 : f32
    %142 = vector.broadcast %cst_36 : f32 to vector<1x256xf32>
    %143 = arith.maximumf %141, %142 : vector<1x256xf32>
    %144 = vector.broadcast %143 : vector<1x256xf32> to vector<2x256xf32>
    %145 = arith.divf %137, %144 : vector<2x256xf32>
    %c1 = arith.constant 1 : index
    %c0_37 = arith.constant 0 : index
    %c0_38 = arith.constant 0 : index
    %146 = vector.load %arg4[%c1, %c0_37, %c0_38] : memref<4x152x128xbf16, #tpu.memory_space<vmem>>, vector<1x152x128xbf16>
    %147 = vector.shape_cast %146 : vector<1x152x128xbf16> to vector<152x128xbf16>
    %cst_39 = arith.constant dense<0.000000e+00> : vector<256xf32>
    %148 = vector.multi_reduction <add>, %11, %cst_39 [0] : vector<3x256xf32> to vector<256xf32>
    %149 = vector.shape_cast %148 : vector<256xf32> to vector<1x256xf32>
    %cst_40 = arith.constant 0.000000e+00 : f32
    %150 = vector.broadcast %cst_40 : f32 to vector<1x256xf32>
    %151 = arith.addf %150, %149 : vector<1x256xf32>
    %cst_41 = arith.constant dense<0.000000e+00> : vector<256xf32>
    %152 = vector.multi_reduction <add>, %145, %cst_41 [0] : vector<2x256xf32> to vector<256xf32>
    %153 = vector.shape_cast %152 : vector<256xf32> to vector<1x256xf32>
    %154 = arith.addf %151, %153 : vector<1x256xf32>
    %155 = arith.mulf %11, %11 : vector<3x256xf32>
    %cst_42 = arith.constant dense<0.000000e+00> : vector<256xf32>
    %156 = vector.multi_reduction <add>, %155, %cst_42 [0] : vector<3x256xf32> to vector<256xf32>
    %157 = vector.shape_cast %156 : vector<256xf32> to vector<1x256xf32>
    %cst_43 = arith.constant 0.000000e+00 : f32
    %158 = vector.broadcast %cst_43 : f32 to vector<1x256xf32>
    %159 = arith.addf %158, %157 : vector<1x256xf32>
    %160 = arith.mulf %145, %145 : vector<2x256xf32>
    %cst_44 = arith.constant dense<0.000000e+00> : vector<256xf32>
    %161 = vector.multi_reduction <add>, %160, %cst_44 [0] : vector<2x256xf32> to vector<256xf32>
    %162 = vector.shape_cast %161 : vector<256xf32> to vector<1x256xf32>
    %163 = arith.addf %159, %162 : vector<1x256xf32>
    %cst_45 = arith.constant 5.000000e+00 : f32
    %164 = vector.broadcast %cst_45 : f32 to vector<1x256xf32>
    %165 = arith.divf %154, %164 : vector<1x256xf32>
    %cst_46 = arith.constant 5.000000e+00 : f32
    %166 = vector.broadcast %cst_46 : f32 to vector<1x256xf32>
    %167 = arith.divf %163, %166 : vector<1x256xf32>
    %168 = arith.mulf %165, %165 : vector<1x256xf32>
    %169 = arith.subf %167, %168 : vector<1x256xf32>
    %cst_47 = arith.constant 0.000000e+00 : f32
    %170 = vector.broadcast %cst_47 : f32 to vector<1x256xf32>
    %171 = arith.maximumf %169, %170 : vector<1x256xf32>
    %cst_48 = arith.constant 9.99999974E-6 : f32
    %172 = vector.broadcast %cst_48 : f32 to vector<1x256xf32>
    %173 = arith.addf %171, %172 : vector<1x256xf32>
    %174 = math.rsqrt %173 : vector<1x256xf32>
    %175 = vector.extract_strided_slice %147 {offsets = [0, 64], sizes = [16, 1], strides = [1, 1]} : vector<152x128xbf16> to vector<16x1xbf16>
    %176 = arith.extf %175 : vector<16x1xbf16> to vector<16x1xf32>
    %177 = vector.broadcast %165 : vector<1x256xf32> to vector<3x256xf32>
    %178 = arith.subf %11, %177 : vector<3x256xf32>
    %179 = vector.broadcast %174 : vector<1x256xf32> to vector<3x256xf32>
    %180 = arith.mulf %178, %179 : vector<3x256xf32>
    %181 = vector.extract_strided_slice %147 {offsets = [0, 0], sizes = [16, 3], strides = [1, 1]} : vector<152x128xbf16> to vector<16x3xbf16>
    %182 = vector.extract_strided_slice %181 {offsets = [0, 0], sizes = [16, 1], strides = [1, 1]} : vector<16x3xbf16> to vector<16x1xbf16>
    %183 = vector.extract_strided_slice %180 {offsets = [0, 0], sizes = [1, 256], strides = [1, 1]} : vector<3x256xf32> to vector<1x256xf32>
    %184 = arith.extf %182 : vector<16x1xbf16> to vector<16x1xf32>
    %185 = vector.broadcast %184 : vector<16x1xf32> to vector<16x256xf32>
    %186 = vector.broadcast %183 : vector<1x256xf32> to vector<16x256xf32>
    %187 = arith.mulf %185, %186 : vector<16x256xf32>
    %188 = vector.extract_strided_slice %181 {offsets = [0, 1], sizes = [16, 1], strides = [1, 1]} : vector<16x3xbf16> to vector<16x1xbf16>
    %189 = vector.extract_strided_slice %180 {offsets = [1, 0], sizes = [1, 256], strides = [1, 1]} : vector<3x256xf32> to vector<1x256xf32>
    %190 = arith.extf %188 : vector<16x1xbf16> to vector<16x1xf32>
    %191 = vector.broadcast %190 : vector<16x1xf32> to vector<16x256xf32>
    %192 = vector.broadcast %189 : vector<1x256xf32> to vector<16x256xf32>
    %193 = arith.mulf %191, %192 : vector<16x256xf32>
    %194 = arith.addf %187, %193 : vector<16x256xf32>
    %195 = vector.extract_strided_slice %181 {offsets = [0, 2], sizes = [16, 1], strides = [1, 1]} : vector<16x3xbf16> to vector<16x1xbf16>
    %196 = vector.extract_strided_slice %180 {offsets = [2, 0], sizes = [1, 256], strides = [1, 1]} : vector<3x256xf32> to vector<1x256xf32>
    %197 = arith.extf %195 : vector<16x1xbf16> to vector<16x1xf32>
    %198 = vector.broadcast %197 : vector<16x1xf32> to vector<16x256xf32>
    %199 = vector.broadcast %196 : vector<1x256xf32> to vector<16x256xf32>
    %200 = arith.mulf %198, %199 : vector<16x256xf32>
    %201 = arith.addf %194, %200 : vector<16x256xf32>
    %202 = vector.broadcast %176 : vector<16x1xf32> to vector<16x256xf32>
    %203 = arith.addf %202, %201 : vector<16x256xf32>
    %204 = vector.broadcast %165 : vector<1x256xf32> to vector<2x256xf32>
    %205 = arith.subf %145, %204 : vector<2x256xf32>
    %206 = vector.broadcast %174 : vector<1x256xf32> to vector<2x256xf32>
    %207 = arith.mulf %205, %206 : vector<2x256xf32>
    %208 = vector.extract_strided_slice %147 {offsets = [0, 3], sizes = [16, 2], strides = [1, 1]} : vector<152x128xbf16> to vector<16x2xbf16>
    %209 = vector.extract_strided_slice %208 {offsets = [0, 0], sizes = [16, 1], strides = [1, 1]} : vector<16x2xbf16> to vector<16x1xbf16>
    %210 = vector.extract_strided_slice %207 {offsets = [0, 0], sizes = [1, 256], strides = [1, 1]} : vector<2x256xf32> to vector<1x256xf32>
    %211 = arith.extf %209 : vector<16x1xbf16> to vector<16x1xf32>
    %212 = vector.broadcast %211 : vector<16x1xf32> to vector<16x256xf32>
    %213 = vector.broadcast %210 : vector<1x256xf32> to vector<16x256xf32>
    %214 = arith.mulf %212, %213 : vector<16x256xf32>
    %215 = vector.extract_strided_slice %208 {offsets = [0, 1], sizes = [16, 1], strides = [1, 1]} : vector<16x2xbf16> to vector<16x1xbf16>
    %216 = vector.extract_strided_slice %207 {offsets = [1, 0], sizes = [1, 256], strides = [1, 1]} : vector<2x256xf32> to vector<1x256xf32>
    %217 = arith.extf %215 : vector<16x1xbf16> to vector<16x1xf32>
    %218 = vector.broadcast %217 : vector<16x1xf32> to vector<16x256xf32>
    %219 = vector.broadcast %216 : vector<1x256xf32> to vector<16x256xf32>
    %220 = arith.mulf %218, %219 : vector<16x256xf32>
    %221 = arith.addf %214, %220 : vector<16x256xf32>
    %222 = arith.addf %203, %221 : vector<16x256xf32>
    %223 = arith.mulf %222, %222 : vector<16x256xf32>
    %224 = arith.mulf %222, %223 : vector<16x256xf32>
    %cst_49 = arith.constant 4.471500e-02 : f32
    %225 = vector.broadcast %cst_49 : f32 to vector<16x256xf32>
    %226 = arith.mulf %225, %224 : vector<16x256xf32>
    %227 = arith.addf %222, %226 : vector<16x256xf32>
    %cst_50 = arith.constant 0.797884583 : f32
    %228 = vector.broadcast %cst_50 : f32 to vector<16x256xf32>
    %229 = arith.mulf %228, %227 : vector<16x256xf32>
    %230 = math.tanh %229 : vector<16x256xf32>
    %cst_51 = arith.constant 1.000000e+00 : f32
    %231 = vector.broadcast %cst_51 : f32 to vector<16x256xf32>
    %232 = arith.addf %231, %230 : vector<16x256xf32>
    %cst_52 = arith.constant 5.000000e-01 : f32
    %233 = vector.broadcast %cst_52 : f32 to vector<16x256xf32>
    %234 = arith.mulf %233, %232 : vector<16x256xf32>
    %235 = arith.mulf %222, %234 : vector<16x256xf32>
    %236 = vector.extract_strided_slice %147 {offsets = [16, 0], sizes = [64, 16], strides = [1, 1]} : vector<152x128xbf16> to vector<64x16xbf16>
    %237 = arith.truncf %235 : vector<16x256xf32> to vector<16x256xbf16>
    %cst_53 = arith.constant dense<0.000000e+00> : vector<64x256xf32>
    %238 = tpu.matmul %236, %237, %cst_53 {dimension_numbers = #tpu.dot_dimension_numbers<[1], [0], [0], [1], [0, 0, 1, 1], [], []>} : vector<64x16xbf16>, vector<16x256xbf16>, vector<64x256xf32> -> vector<64x256xf32>
    %239 = vector.extract_strided_slice %147 {offsets = [16, 64], sizes = [64, 1], strides = [1, 1]} : vector<152x128xbf16> to vector<64x1xbf16>
    %240 = arith.extf %239 : vector<64x1xbf16> to vector<64x1xf32>
    %241 = vector.broadcast %240 : vector<64x1xf32> to vector<64x256xf32>
    %242 = arith.addf %238, %241 : vector<64x256xf32>
    %243 = arith.negf %242 : vector<64x256xf32>
    %244 = math.exp %243 : vector<64x256xf32>
    %cst_54 = arith.constant 1.000000e+00 : f32
    %245 = vector.broadcast %cst_54 : f32 to vector<64x256xf32>
    %246 = arith.addf %245, %244 : vector<64x256xf32>
    %247 = arith.divf %245, %246 : vector<64x256xf32>
    %248 = arith.extf %1 : vector<64x256xbf16> to vector<64x256xf32>
    %249 = arith.mulf %248, %247 : vector<64x256xf32>
    %cst_55 = arith.constant dense<0.000000e+00> : vector<256xf32>
    %250 = vector.multi_reduction <add>, %249, %cst_55 [0] : vector<64x256xf32> to vector<256xf32>
    %251 = vector.shape_cast %250 : vector<256xf32> to vector<1x256xf32>
    %cst_56 = arith.constant 1.562500e-02 : f32
    %252 = vector.broadcast %cst_56 : f32 to vector<1x256xf32>
    %253 = arith.mulf %251, %252 : vector<1x256xf32>
    %254 = arith.mulf %249, %249 : vector<64x256xf32>
    %cst_57 = arith.constant dense<0.000000e+00> : vector<256xf32>
    %255 = vector.multi_reduction <add>, %254, %cst_57 [0] : vector<64x256xf32> to vector<256xf32>
    %256 = vector.shape_cast %255 : vector<256xf32> to vector<1x256xf32>
    %cst_58 = arith.constant 1.562500e-02 : f32
    %257 = vector.broadcast %cst_58 : f32 to vector<1x256xf32>
    %258 = arith.mulf %256, %257 : vector<1x256xf32>
    %259 = arith.mulf %253, %253 : vector<1x256xf32>
    %260 = arith.subf %258, %259 : vector<1x256xf32>
    %cst_59 = arith.constant 0.000000e+00 : f32
    %261 = vector.broadcast %cst_59 : f32 to vector<1x256xf32>
    %262 = arith.maximumf %260, %261 : vector<1x256xf32>
    %cst_60 = arith.constant 9.99999974E-6 : f32
    %263 = vector.broadcast %cst_60 : f32 to vector<1x256xf32>
    %264 = arith.addf %262, %263 : vector<1x256xf32>
    %265 = math.rsqrt %264 : vector<1x256xf32>
    %266 = vector.broadcast %253 : vector<1x256xf32> to vector<64x256xf32>
    %267 = arith.subf %249, %266 : vector<64x256xf32>
    %268 = vector.broadcast %265 : vector<1x256xf32> to vector<64x256xf32>
    %269 = arith.mulf %267, %268 : vector<64x256xf32>
    %270 = vector.extract_strided_slice %147 {offsets = [80, 0], sizes = [64, 64], strides = [1, 1]} : vector<152x128xbf16> to vector<64x64xbf16>
    %271 = arith.truncf %269 : vector<64x256xf32> to vector<64x256xbf16>
    %cst_61 = arith.constant dense<0.000000e+00> : vector<64x256xf32>
    %272 = tpu.matmul %270, %271, %cst_61 {dimension_numbers = #tpu.dot_dimension_numbers<[1], [0], [0], [1], [0, 0, 1, 1], [], []>} : vector<64x64xbf16>, vector<64x256xbf16>, vector<64x256xf32> -> vector<64x256xf32>
    %273 = vector.extract_strided_slice %147 {offsets = [80, 64], sizes = [64, 1], strides = [1, 1]} : vector<152x128xbf16> to vector<64x1xbf16>
    %274 = arith.extf %273 : vector<64x1xbf16> to vector<64x1xf32>
    %275 = vector.broadcast %274 : vector<64x1xf32> to vector<64x256xf32>
    %276 = arith.addf %272, %275 : vector<64x256xf32>
    %277 = arith.mulf %276, %276 : vector<64x256xf32>
    %278 = arith.mulf %276, %277 : vector<64x256xf32>
    %cst_62 = arith.constant 4.471500e-02 : f32
    %279 = vector.broadcast %cst_62 : f32 to vector<64x256xf32>
    %280 = arith.mulf %279, %278 : vector<64x256xf32>
    %281 = arith.addf %276, %280 : vector<64x256xf32>
    %cst_63 = arith.constant 0.797884583 : f32
    %282 = vector.broadcast %cst_63 : f32 to vector<64x256xf32>
    %283 = arith.mulf %282, %281 : vector<64x256xf32>
    %284 = math.tanh %283 : vector<64x256xf32>
    %cst_64 = arith.constant 1.000000e+00 : f32
    %285 = vector.broadcast %cst_64 : f32 to vector<64x256xf32>
    %286 = arith.addf %285, %284 : vector<64x256xf32>
    %cst_65 = arith.constant 5.000000e-01 : f32
    %287 = vector.broadcast %cst_65 : f32 to vector<64x256xf32>
    %288 = arith.mulf %287, %286 : vector<64x256xf32>
    %289 = arith.mulf %276, %288 : vector<64x256xf32>
    %290 = arith.addf %289, %249 : vector<64x256xf32>
    %291 = vector.extract_strided_slice %147 {offsets = [144, 0], sizes = [2, 64], strides = [1, 1]} : vector<152x128xbf16> to vector<2x64xbf16>
    %292 = arith.truncf %290 : vector<64x256xf32> to vector<64x256xbf16>
    %cst_66 = arith.constant dense<0.000000e+00> : vector<2x256xf32>
    %293 = tpu.matmul %291, %292, %cst_66 {dimension_numbers = #tpu.dot_dimension_numbers<[1], [0], [0], [1], [0, 0, 1, 1], [], []>} : vector<2x64xbf16>, vector<64x256xbf16>, vector<2x256xf32> -> vector<2x256xf32>
    %294 = vector.extract_strided_slice %147 {offsets = [144, 64], sizes = [2, 1], strides = [1, 1]} : vector<152x128xbf16> to vector<2x1xbf16>
    %295 = arith.extf %294 : vector<2x1xbf16> to vector<2x1xf32>
    %296 = vector.broadcast %295 : vector<2x1xf32> to vector<2x256xf32>
    %297 = arith.addf %293, %296 : vector<2x256xf32>
    %c2 = arith.constant 2 : index
    %c0_67 = arith.constant 0 : index
    %c0_68 = arith.constant 0 : index
    %298 = vector.load %arg4[%c2, %c0_67, %c0_68] : memref<4x152x128xbf16, #tpu.memory_space<vmem>>, vector<1x152x128xbf16>
    %299 = vector.shape_cast %298 : vector<1x152x128xbf16> to vector<152x128xbf16>
    %cst_69 = arith.constant dense<0.000000e+00> : vector<256xf32>
    %300 = vector.multi_reduction <add>, %11, %cst_69 [0] : vector<3x256xf32> to vector<256xf32>
    %301 = vector.shape_cast %300 : vector<256xf32> to vector<1x256xf32>
    %cst_70 = arith.constant 0.000000e+00 : f32
    %302 = vector.broadcast %cst_70 : f32 to vector<1x256xf32>
    %303 = arith.addf %302, %301 : vector<1x256xf32>
    %304 = arith.mulf %11, %11 : vector<3x256xf32>
    %cst_71 = arith.constant dense<0.000000e+00> : vector<256xf32>
    %305 = vector.multi_reduction <add>, %304, %cst_71 [0] : vector<3x256xf32> to vector<256xf32>
    %306 = vector.shape_cast %305 : vector<256xf32> to vector<1x256xf32>
    %cst_72 = arith.constant 0.000000e+00 : f32
    %307 = vector.broadcast %cst_72 : f32 to vector<1x256xf32>
    %308 = arith.addf %307, %306 : vector<1x256xf32>
    %cst_73 = arith.constant 3.000000e+00 : f32
    %309 = vector.broadcast %cst_73 : f32 to vector<1x256xf32>
    %310 = arith.divf %303, %309 : vector<1x256xf32>
    %cst_74 = arith.constant 3.000000e+00 : f32
    %311 = vector.broadcast %cst_74 : f32 to vector<1x256xf32>
    %312 = arith.divf %308, %311 : vector<1x256xf32>
    %313 = arith.mulf %310, %310 : vector<1x256xf32>
    %314 = arith.subf %312, %313 : vector<1x256xf32>
    %cst_75 = arith.constant 0.000000e+00 : f32
    %315 = vector.broadcast %cst_75 : f32 to vector<1x256xf32>
    %316 = arith.maximumf %314, %315 : vector<1x256xf32>
    %cst_76 = arith.constant 9.99999974E-6 : f32
    %317 = vector.broadcast %cst_76 : f32 to vector<1x256xf32>
    %318 = arith.addf %316, %317 : vector<1x256xf32>
    %319 = math.rsqrt %318 : vector<1x256xf32>
    %320 = vector.extract_strided_slice %299 {offsets = [0, 64], sizes = [16, 1], strides = [1, 1]} : vector<152x128xbf16> to vector<16x1xbf16>
    %321 = arith.extf %320 : vector<16x1xbf16> to vector<16x1xf32>
    %322 = vector.broadcast %310 : vector<1x256xf32> to vector<3x256xf32>
    %323 = arith.subf %11, %322 : vector<3x256xf32>
    %324 = vector.broadcast %319 : vector<1x256xf32> to vector<3x256xf32>
    %325 = arith.mulf %323, %324 : vector<3x256xf32>
    %326 = vector.extract_strided_slice %299 {offsets = [0, 0], sizes = [16, 3], strides = [1, 1]} : vector<152x128xbf16> to vector<16x3xbf16>
    %327 = vector.extract_strided_slice %326 {offsets = [0, 0], sizes = [16, 1], strides = [1, 1]} : vector<16x3xbf16> to vector<16x1xbf16>
    %328 = vector.extract_strided_slice %325 {offsets = [0, 0], sizes = [1, 256], strides = [1, 1]} : vector<3x256xf32> to vector<1x256xf32>
    %329 = arith.extf %327 : vector<16x1xbf16> to vector<16x1xf32>
    %330 = vector.broadcast %329 : vector<16x1xf32> to vector<16x256xf32>
    %331 = vector.broadcast %328 : vector<1x256xf32> to vector<16x256xf32>
    %332 = arith.mulf %330, %331 : vector<16x256xf32>
    %333 = vector.extract_strided_slice %326 {offsets = [0, 1], sizes = [16, 1], strides = [1, 1]} : vector<16x3xbf16> to vector<16x1xbf16>
    %334 = vector.extract_strided_slice %325 {offsets = [1, 0], sizes = [1, 256], strides = [1, 1]} : vector<3x256xf32> to vector<1x256xf32>
    %335 = arith.extf %333 : vector<16x1xbf16> to vector<16x1xf32>
    %336 = vector.broadcast %335 : vector<16x1xf32> to vector<16x256xf32>
    %337 = vector.broadcast %334 : vector<1x256xf32> to vector<16x256xf32>
    %338 = arith.mulf %336, %337 : vector<16x256xf32>
    %339 = arith.addf %332, %338 : vector<16x256xf32>
    %340 = vector.extract_strided_slice %326 {offsets = [0, 2], sizes = [16, 1], strides = [1, 1]} : vector<16x3xbf16> to vector<16x1xbf16>
    %341 = vector.extract_strided_slice %325 {offsets = [2, 0], sizes = [1, 256], strides = [1, 1]} : vector<3x256xf32> to vector<1x256xf32>
    %342 = arith.extf %340 : vector<16x1xbf16> to vector<16x1xf32>
    %343 = vector.broadcast %342 : vector<16x1xf32> to vector<16x256xf32>
    %344 = vector.broadcast %341 : vector<1x256xf32> to vector<16x256xf32>
    %345 = arith.mulf %343, %344 : vector<16x256xf32>
    %346 = arith.addf %339, %345 : vector<16x256xf32>
    %347 = vector.broadcast %321 : vector<16x1xf32> to vector<16x256xf32>
    %348 = arith.addf %347, %346 : vector<16x256xf32>
    %349 = arith.mulf %348, %348 : vector<16x256xf32>
    %350 = arith.mulf %348, %349 : vector<16x256xf32>
    %cst_77 = arith.constant 4.471500e-02 : f32
    %351 = vector.broadcast %cst_77 : f32 to vector<16x256xf32>
    %352 = arith.mulf %351, %350 : vector<16x256xf32>
    %353 = arith.addf %348, %352 : vector<16x256xf32>
    %cst_78 = arith.constant 0.797884583 : f32
    %354 = vector.broadcast %cst_78 : f32 to vector<16x256xf32>
    %355 = arith.mulf %354, %353 : vector<16x256xf32>
    %356 = math.tanh %355 : vector<16x256xf32>
    %cst_79 = arith.constant 1.000000e+00 : f32
    %357 = vector.broadcast %cst_79 : f32 to vector<16x256xf32>
    %358 = arith.addf %357, %356 : vector<16x256xf32>
    %cst_80 = arith.constant 5.000000e-01 : f32
    %359 = vector.broadcast %cst_80 : f32 to vector<16x256xf32>
    %360 = arith.mulf %359, %358 : vector<16x256xf32>
    %361 = arith.mulf %348, %360 : vector<16x256xf32>
    %362 = vector.extract_strided_slice %299 {offsets = [16, 0], sizes = [64, 16], strides = [1, 1]} : vector<152x128xbf16> to vector<64x16xbf16>
    %363 = arith.truncf %361 : vector<16x256xf32> to vector<16x256xbf16>
    %cst_81 = arith.constant dense<0.000000e+00> : vector<64x256xf32>
    %364 = tpu.matmul %362, %363, %cst_81 {dimension_numbers = #tpu.dot_dimension_numbers<[1], [0], [0], [1], [0, 0, 1, 1], [], []>} : vector<64x16xbf16>, vector<16x256xbf16>, vector<64x256xf32> -> vector<64x256xf32>
    %365 = vector.extract_strided_slice %299 {offsets = [16, 64], sizes = [64, 1], strides = [1, 1]} : vector<152x128xbf16> to vector<64x1xbf16>
    %366 = arith.extf %365 : vector<64x1xbf16> to vector<64x1xf32>
    %367 = vector.broadcast %366 : vector<64x1xf32> to vector<64x256xf32>
    %368 = arith.addf %364, %367 : vector<64x256xf32>
    %369 = arith.negf %368 : vector<64x256xf32>
    %370 = math.exp %369 : vector<64x256xf32>
    %cst_82 = arith.constant 1.000000e+00 : f32
    %371 = vector.broadcast %cst_82 : f32 to vector<64x256xf32>
    %372 = arith.addf %371, %370 : vector<64x256xf32>
    %373 = arith.divf %371, %372 : vector<64x256xf32>
    %374 = arith.extf %1 : vector<64x256xbf16> to vector<64x256xf32>
    %375 = arith.mulf %374, %373 : vector<64x256xf32>
    %cst_83 = arith.constant dense<0.000000e+00> : vector<256xf32>
    %376 = vector.multi_reduction <add>, %375, %cst_83 [0] : vector<64x256xf32> to vector<256xf32>
    %377 = vector.shape_cast %376 : vector<256xf32> to vector<1x256xf32>
    %cst_84 = arith.constant 1.562500e-02 : f32
    %378 = vector.broadcast %cst_84 : f32 to vector<1x256xf32>
    %379 = arith.mulf %377, %378 : vector<1x256xf32>
    %380 = arith.mulf %375, %375 : vector<64x256xf32>
    %cst_85 = arith.constant dense<0.000000e+00> : vector<256xf32>
    %381 = vector.multi_reduction <add>, %380, %cst_85 [0] : vector<64x256xf32> to vector<256xf32>
    %382 = vector.shape_cast %381 : vector<256xf32> to vector<1x256xf32>
    %cst_86 = arith.constant 1.562500e-02 : f32
    %383 = vector.broadcast %cst_86 : f32 to vector<1x256xf32>
    %384 = arith.mulf %382, %383 : vector<1x256xf32>
    %385 = arith.mulf %379, %379 : vector<1x256xf32>
    %386 = arith.subf %384, %385 : vector<1x256xf32>
    %cst_87 = arith.constant 0.000000e+00 : f32
    %387 = vector.broadcast %cst_87 : f32 to vector<1x256xf32>
    %388 = arith.maximumf %386, %387 : vector<1x256xf32>
    %cst_88 = arith.constant 9.99999974E-6 : f32
    %389 = vector.broadcast %cst_88 : f32 to vector<1x256xf32>
    %390 = arith.addf %388, %389 : vector<1x256xf32>
    %391 = math.rsqrt %390 : vector<1x256xf32>
    %392 = vector.broadcast %379 : vector<1x256xf32> to vector<64x256xf32>
    %393 = arith.subf %375, %392 : vector<64x256xf32>
    %394 = vector.broadcast %391 : vector<1x256xf32> to vector<64x256xf32>
    %395 = arith.mulf %393, %394 : vector<64x256xf32>
    %396 = vector.extract_strided_slice %299 {offsets = [80, 0], sizes = [64, 64], strides = [1, 1]} : vector<152x128xbf16> to vector<64x64xbf16>
    %397 = arith.truncf %395 : vector<64x256xf32> to vector<64x256xbf16>
    %cst_89 = arith.constant dense<0.000000e+00> : vector<64x256xf32>
    %398 = tpu.matmul %396, %397, %cst_89 {dimension_numbers = #tpu.dot_dimension_numbers<[1], [0], [0], [1], [0, 0, 1, 1], [], []>} : vector<64x64xbf16>, vector<64x256xbf16>, vector<64x256xf32> -> vector<64x256xf32>
    %399 = vector.extract_strided_slice %299 {offsets = [80, 64], sizes = [64, 1], strides = [1, 1]} : vector<152x128xbf16> to vector<64x1xbf16>
    %400 = arith.extf %399 : vector<64x1xbf16> to vector<64x1xf32>
    %401 = vector.broadcast %400 : vector<64x1xf32> to vector<64x256xf32>
    %402 = arith.addf %398, %401 : vector<64x256xf32>
    %403 = arith.mulf %402, %402 : vector<64x256xf32>
    %404 = arith.mulf %402, %403 : vector<64x256xf32>
    %cst_90 = arith.constant 4.471500e-02 : f32
    %405 = vector.broadcast %cst_90 : f32 to vector<64x256xf32>
    %406 = arith.mulf %405, %404 : vector<64x256xf32>
    %407 = arith.addf %402, %406 : vector<64x256xf32>
    %cst_91 = arith.constant 0.797884583 : f32
    %408 = vector.broadcast %cst_91 : f32 to vector<64x256xf32>
    %409 = arith.mulf %408, %407 : vector<64x256xf32>
    %410 = math.tanh %409 : vector<64x256xf32>
    %cst_92 = arith.constant 1.000000e+00 : f32
    %411 = vector.broadcast %cst_92 : f32 to vector<64x256xf32>
    %412 = arith.addf %411, %410 : vector<64x256xf32>
    %cst_93 = arith.constant 5.000000e-01 : f32
    %413 = vector.broadcast %cst_93 : f32 to vector<64x256xf32>
    %414 = arith.mulf %413, %412 : vector<64x256xf32>
    %415 = arith.mulf %402, %414 : vector<64x256xf32>
    %416 = arith.addf %415, %375 : vector<64x256xf32>
    %417 = vector.extract_strided_slice %299 {offsets = [144, 0], sizes = [2, 64], strides = [1, 1]} : vector<152x128xbf16> to vector<2x64xbf16>
    %418 = arith.truncf %416 : vector<64x256xf32> to vector<64x256xbf16>
    %cst_94 = arith.constant dense<0.000000e+00> : vector<2x256xf32>
    %419 = tpu.matmul %417, %418, %cst_94 {dimension_numbers = #tpu.dot_dimension_numbers<[1], [0], [0], [1], [0, 0, 1, 1], [], []>} : vector<2x64xbf16>, vector<64x256xbf16>, vector<2x256xf32> -> vector<2x256xf32>
    %420 = vector.extract_strided_slice %299 {offsets = [144, 64], sizes = [2, 1], strides = [1, 1]} : vector<152x128xbf16> to vector<2x1xbf16>
    %421 = arith.extf %420 : vector<2x1xbf16> to vector<2x1xf32>
    %422 = vector.broadcast %421 : vector<2x1xf32> to vector<2x256xf32>
    %423 = arith.addf %419, %422 : vector<2x256xf32>
    %424 = arith.mulf %423, %423 : vector<2x256xf32>
    %cst_95 = arith.constant dense<0.000000e+00> : vector<256xf32>
    %425 = vector.multi_reduction <add>, %424, %cst_95 [0] : vector<2x256xf32> to vector<256xf32>
    %426 = vector.shape_cast %425 : vector<256xf32> to vector<1x256xf32>
    %427 = math.sqrt %426 : vector<1x256xf32>
    %cst_96 = arith.constant 9.99999996E-13 : f32
    %428 = vector.broadcast %cst_96 : f32 to vector<1x256xf32>
    %429 = arith.maximumf %427, %428 : vector<1x256xf32>
    %430 = vector.broadcast %429 : vector<1x256xf32> to vector<2x256xf32>
    %431 = arith.divf %423, %430 : vector<2x256xf32>
    %c3 = arith.constant 3 : index
    %c0_97 = arith.constant 0 : index
    %c0_98 = arith.constant 0 : index
    %432 = vector.load %arg4[%c3, %c0_97, %c0_98] : memref<4x152x128xbf16, #tpu.memory_space<vmem>>, vector<1x152x128xbf16>
    %433 = vector.shape_cast %432 : vector<1x152x128xbf16> to vector<152x128xbf16>
    %cst_99 = arith.constant dense<0.000000e+00> : vector<256xf32>
    %434 = vector.multi_reduction <add>, %11, %cst_99 [0] : vector<3x256xf32> to vector<256xf32>
    %435 = vector.shape_cast %434 : vector<256xf32> to vector<1x256xf32>
    %cst_100 = arith.constant 0.000000e+00 : f32
    %436 = vector.broadcast %cst_100 : f32 to vector<1x256xf32>
    %437 = arith.addf %436, %435 : vector<1x256xf32>
    %cst_101 = arith.constant dense<0.000000e+00> : vector<256xf32>
    %438 = vector.multi_reduction <add>, %431, %cst_101 [0] : vector<2x256xf32> to vector<256xf32>
    %439 = vector.shape_cast %438 : vector<256xf32> to vector<1x256xf32>
    %440 = arith.addf %437, %439 : vector<1x256xf32>
    %441 = arith.mulf %11, %11 : vector<3x256xf32>
    %cst_102 = arith.constant dense<0.000000e+00> : vector<256xf32>
    %442 = vector.multi_reduction <add>, %441, %cst_102 [0] : vector<3x256xf32> to vector<256xf32>
    %443 = vector.shape_cast %442 : vector<256xf32> to vector<1x256xf32>
    %cst_103 = arith.constant 0.000000e+00 : f32
    %444 = vector.broadcast %cst_103 : f32 to vector<1x256xf32>
    %445 = arith.addf %444, %443 : vector<1x256xf32>
    %446 = arith.mulf %431, %431 : vector<2x256xf32>
    %cst_104 = arith.constant dense<0.000000e+00> : vector<256xf32>
    %447 = vector.multi_reduction <add>, %446, %cst_104 [0] : vector<2x256xf32> to vector<256xf32>
    %448 = vector.shape_cast %447 : vector<256xf32> to vector<1x256xf32>
    %449 = arith.addf %445, %448 : vector<1x256xf32>
    %cst_105 = arith.constant 5.000000e+00 : f32
    %450 = vector.broadcast %cst_105 : f32 to vector<1x256xf32>
    %451 = arith.divf %440, %450 : vector<1x256xf32>
    %cst_106 = arith.constant 5.000000e+00 : f32
    %452 = vector.broadcast %cst_106 : f32 to vector<1x256xf32>
    %453 = arith.divf %449, %452 : vector<1x256xf32>
    %454 = arith.mulf %451, %451 : vector<1x256xf32>
    %455 = arith.subf %453, %454 : vector<1x256xf32>
    %cst_107 = arith.constant 0.000000e+00 : f32
    %456 = vector.broadcast %cst_107 : f32 to vector<1x256xf32>
    %457 = arith.maximumf %455, %456 : vector<1x256xf32>
    %cst_108 = arith.constant 9.99999974E-6 : f32
    %458 = vector.broadcast %cst_108 : f32 to vector<1x256xf32>
    %459 = arith.addf %457, %458 : vector<1x256xf32>
    %460 = math.rsqrt %459 : vector<1x256xf32>
    %461 = vector.extract_strided_slice %433 {offsets = [0, 64], sizes = [16, 1], strides = [1, 1]} : vector<152x128xbf16> to vector<16x1xbf16>
    %462 = arith.extf %461 : vector<16x1xbf16> to vector<16x1xf32>
    %463 = vector.broadcast %451 : vector<1x256xf32> to vector<3x256xf32>
    %464 = arith.subf %11, %463 : vector<3x256xf32>
    %465 = vector.broadcast %460 : vector<1x256xf32> to vector<3x256xf32>
    %466 = arith.mulf %464, %465 : vector<3x256xf32>
    %467 = vector.extract_strided_slice %433 {offsets = [0, 0], sizes = [16, 3], strides = [1, 1]} : vector<152x128xbf16> to vector<16x3xbf16>
    %468 = vector.extract_strided_slice %467 {offsets = [0, 0], sizes = [16, 1], strides = [1, 1]} : vector<16x3xbf16> to vector<16x1xbf16>
    %469 = vector.extract_strided_slice %466 {offsets = [0, 0], sizes = [1, 256], strides = [1, 1]} : vector<3x256xf32> to vector<1x256xf32>
    %470 = arith.extf %468 : vector<16x1xbf16> to vector<16x1xf32>
    %471 = vector.broadcast %470 : vector<16x1xf32> to vector<16x256xf32>
    %472 = vector.broadcast %469 : vector<1x256xf32> to vector<16x256xf32>
    %473 = arith.mulf %471, %472 : vector<16x256xf32>
    %474 = vector.extract_strided_slice %467 {offsets = [0, 1], sizes = [16, 1], strides = [1, 1]} : vector<16x3xbf16> to vector<16x1xbf16>
    %475 = vector.extract_strided_slice %466 {offsets = [1, 0], sizes = [1, 256], strides = [1, 1]} : vector<3x256xf32> to vector<1x256xf32>
    %476 = arith.extf %474 : vector<16x1xbf16> to vector<16x1xf32>
    %477 = vector.broadcast %476 : vector<16x1xf32> to vector<16x256xf32>
    %478 = vector.broadcast %475 : vector<1x256xf32> to vector<16x256xf32>
    %479 = arith.mulf %477, %478 : vector<16x256xf32>
    %480 = arith.addf %473, %479 : vector<16x256xf32>
    %481 = vector.extract_strided_slice %467 {offsets = [0, 2], sizes = [16, 1], strides = [1, 1]} : vector<16x3xbf16> to vector<16x1xbf16>
    %482 = vector.extract_strided_slice %466 {offsets = [2, 0], sizes = [1, 256], strides = [1, 1]} : vector<3x256xf32> to vector<1x256xf32>
    %483 = arith.extf %481 : vector<16x1xbf16> to vector<16x1xf32>
    %484 = vector.broadcast %483 : vector<16x1xf32> to vector<16x256xf32>
    %485 = vector.broadcast %482 : vector<1x256xf32> to vector<16x256xf32>
    %486 = arith.mulf %484, %485 : vector<16x256xf32>
    %487 = arith.addf %480, %486 : vector<16x256xf32>
    %488 = vector.broadcast %462 : vector<16x1xf32> to vector<16x256xf32>
    %489 = arith.addf %488, %487 : vector<16x256xf32>
    %490 = vector.broadcast %451 : vector<1x256xf32> to vector<2x256xf32>
    %491 = arith.subf %431, %490 : vector<2x256xf32>
    %492 = vector.broadcast %460 : vector<1x256xf32> to vector<2x256xf32>
    %493 = arith.mulf %491, %492 : vector<2x256xf32>
    %494 = vector.extract_strided_slice %433 {offsets = [0, 3], sizes = [16, 2], strides = [1, 1]} : vector<152x128xbf16> to vector<16x2xbf16>
    %495 = vector.extract_strided_slice %494 {offsets = [0, 0], sizes = [16, 1], strides = [1, 1]} : vector<16x2xbf16> to vector<16x1xbf16>
    %496 = vector.extract_strided_slice %493 {offsets = [0, 0], sizes = [1, 256], strides = [1, 1]} : vector<2x256xf32> to vector<1x256xf32>
    %497 = arith.extf %495 : vector<16x1xbf16> to vector<16x1xf32>
    %498 = vector.broadcast %497 : vector<16x1xf32> to vector<16x256xf32>
    %499 = vector.broadcast %496 : vector<1x256xf32> to vector<16x256xf32>
    %500 = arith.mulf %498, %499 : vector<16x256xf32>
    %501 = vector.extract_strided_slice %494 {offsets = [0, 1], sizes = [16, 1], strides = [1, 1]} : vector<16x2xbf16> to vector<16x1xbf16>
    %502 = vector.extract_strided_slice %493 {offsets = [1, 0], sizes = [1, 256], strides = [1, 1]} : vector<2x256xf32> to vector<1x256xf32>
    %503 = arith.extf %501 : vector<16x1xbf16> to vector<16x1xf32>
    %504 = vector.broadcast %503 : vector<16x1xf32> to vector<16x256xf32>
    %505 = vector.broadcast %502 : vector<1x256xf32> to vector<16x256xf32>
    %506 = arith.mulf %504, %505 : vector<16x256xf32>
    %507 = arith.addf %500, %506 : vector<16x256xf32>
    %508 = arith.addf %489, %507 : vector<16x256xf32>
    %509 = arith.mulf %508, %508 : vector<16x256xf32>
    %510 = arith.mulf %508, %509 : vector<16x256xf32>
    %cst_109 = arith.constant 4.471500e-02 : f32
    %511 = vector.broadcast %cst_109 : f32 to vector<16x256xf32>
    %512 = arith.mulf %511, %510 : vector<16x256xf32>
    %513 = arith.addf %508, %512 : vector<16x256xf32>
    %cst_110 = arith.constant 0.797884583 : f32
    %514 = vector.broadcast %cst_110 : f32 to vector<16x256xf32>
    %515 = arith.mulf %514, %513 : vector<16x256xf32>
    %516 = math.tanh %515 : vector<16x256xf32>
    %cst_111 = arith.constant 1.000000e+00 : f32
    %517 = vector.broadcast %cst_111 : f32 to vector<16x256xf32>
    %518 = arith.addf %517, %516 : vector<16x256xf32>
    %cst_112 = arith.constant 5.000000e-01 : f32
    %519 = vector.broadcast %cst_112 : f32 to vector<16x256xf32>
    %520 = arith.mulf %519, %518 : vector<16x256xf32>
    %521 = arith.mulf %508, %520 : vector<16x256xf32>
    %522 = vector.extract_strided_slice %433 {offsets = [16, 0], sizes = [64, 16], strides = [1, 1]} : vector<152x128xbf16> to vector<64x16xbf16>
    %523 = arith.truncf %521 : vector<16x256xf32> to vector<16x256xbf16>
    %cst_113 = arith.constant dense<0.000000e+00> : vector<64x256xf32>
    %524 = tpu.matmul %522, %523, %cst_113 {dimension_numbers = #tpu.dot_dimension_numbers<[1], [0], [0], [1], [0, 0, 1, 1], [], []>} : vector<64x16xbf16>, vector<16x256xbf16>, vector<64x256xf32> -> vector<64x256xf32>
    %525 = vector.extract_strided_slice %433 {offsets = [16, 64], sizes = [64, 1], strides = [1, 1]} : vector<152x128xbf16> to vector<64x1xbf16>
    %526 = arith.extf %525 : vector<64x1xbf16> to vector<64x1xf32>
    %527 = vector.broadcast %526 : vector<64x1xf32> to vector<64x256xf32>
    %528 = arith.addf %524, %527 : vector<64x256xf32>
    %529 = arith.negf %528 : vector<64x256xf32>
    %530 = math.exp %529 : vector<64x256xf32>
    %cst_114 = arith.constant 1.000000e+00 : f32
    %531 = vector.broadcast %cst_114 : f32 to vector<64x256xf32>
    %532 = arith.addf %531, %530 : vector<64x256xf32>
    %533 = arith.divf %531, %532 : vector<64x256xf32>
    %534 = arith.extf %1 : vector<64x256xbf16> to vector<64x256xf32>
    %535 = arith.mulf %534, %533 : vector<64x256xf32>
    %cst_115 = arith.constant dense<0.000000e+00> : vector<256xf32>
    %536 = vector.multi_reduction <add>, %535, %cst_115 [0] : vector<64x256xf32> to vector<256xf32>
    %537 = vector.shape_cast %536 : vector<256xf32> to vector<1x256xf32>
    %cst_116 = arith.constant 1.562500e-02 : f32
    %538 = vector.broadcast %cst_116 : f32 to vector<1x256xf32>
    %539 = arith.mulf %537, %538 : vector<1x256xf32>
    %540 = arith.mulf %535, %535 : vector<64x256xf32>
    %cst_117 = arith.constant dense<0.000000e+00> : vector<256xf32>
    %541 = vector.multi_reduction <add>, %540, %cst_117 [0] : vector<64x256xf32> to vector<256xf32>
    %542 = vector.shape_cast %541 : vector<256xf32> to vector<1x256xf32>
    %cst_118 = arith.constant 1.562500e-02 : f32
    %543 = vector.broadcast %cst_118 : f32 to vector<1x256xf32>
    %544 = arith.mulf %542, %543 : vector<1x256xf32>
    %545 = arith.mulf %539, %539 : vector<1x256xf32>
    %546 = arith.subf %544, %545 : vector<1x256xf32>
    %cst_119 = arith.constant 0.000000e+00 : f32
    %547 = vector.broadcast %cst_119 : f32 to vector<1x256xf32>
    %548 = arith.maximumf %546, %547 : vector<1x256xf32>
    %cst_120 = arith.constant 9.99999974E-6 : f32
    %549 = vector.broadcast %cst_120 : f32 to vector<1x256xf32>
    %550 = arith.addf %548, %549 : vector<1x256xf32>
    %551 = math.rsqrt %550 : vector<1x256xf32>
    %552 = vector.broadcast %539 : vector<1x256xf32> to vector<64x256xf32>
    %553 = arith.subf %535, %552 : vector<64x256xf32>
    %554 = vector.broadcast %551 : vector<1x256xf32> to vector<64x256xf32>
    %555 = arith.mulf %553, %554 : vector<64x256xf32>
    %556 = vector.extract_strided_slice %433 {offsets = [80, 0], sizes = [64, 64], strides = [1, 1]} : vector<152x128xbf16> to vector<64x64xbf16>
    %557 = arith.truncf %555 : vector<64x256xf32> to vector<64x256xbf16>
    %cst_121 = arith.constant dense<0.000000e+00> : vector<64x256xf32>
    %558 = tpu.matmul %556, %557, %cst_121 {dimension_numbers = #tpu.dot_dimension_numbers<[1], [0], [0], [1], [0, 0, 1, 1], [], []>} : vector<64x64xbf16>, vector<64x256xbf16>, vector<64x256xf32> -> vector<64x256xf32>
    %559 = vector.extract_strided_slice %433 {offsets = [80, 64], sizes = [64, 1], strides = [1, 1]} : vector<152x128xbf16> to vector<64x1xbf16>
    %560 = arith.extf %559 : vector<64x1xbf16> to vector<64x1xf32>
    %561 = vector.broadcast %560 : vector<64x1xf32> to vector<64x256xf32>
    %562 = arith.addf %558, %561 : vector<64x256xf32>
    %563 = arith.mulf %562, %562 : vector<64x256xf32>
    %564 = arith.mulf %562, %563 : vector<64x256xf32>
    %cst_122 = arith.constant 4.471500e-02 : f32
    %565 = vector.broadcast %cst_122 : f32 to vector<64x256xf32>
    %566 = arith.mulf %565, %564 : vector<64x256xf32>
    %567 = arith.addf %562, %566 : vector<64x256xf32>
    %cst_123 = arith.constant 0.797884583 : f32
    %568 = vector.broadcast %cst_123 : f32 to vector<64x256xf32>
    %569 = arith.mulf %568, %567 : vector<64x256xf32>
    %570 = math.tanh %569 : vector<64x256xf32>
    %cst_124 = arith.constant 1.000000e+00 : f32
    %571 = vector.broadcast %cst_124 : f32 to vector<64x256xf32>
    %572 = arith.addf %571, %570 : vector<64x256xf32>
    %cst_125 = arith.constant 5.000000e-01 : f32
    %573 = vector.broadcast %cst_125 : f32 to vector<64x256xf32>
    %574 = arith.mulf %573, %572 : vector<64x256xf32>
    %575 = arith.mulf %562, %574 : vector<64x256xf32>
    %576 = arith.addf %575, %535 : vector<64x256xf32>
    %577 = vector.extract_strided_slice %433 {offsets = [144, 0], sizes = [2, 64], strides = [1, 1]} : vector<152x128xbf16> to vector<2x64xbf16>
    %578 = arith.truncf %576 : vector<64x256xf32> to vector<64x256xbf16>
    %cst_126 = arith.constant dense<0.000000e+00> : vector<2x256xf32>
    %579 = tpu.matmul %577, %578, %cst_126 {dimension_numbers = #tpu.dot_dimension_numbers<[1], [0], [0], [1], [0, 0, 1, 1], [], []>} : vector<2x64xbf16>, vector<64x256xbf16>, vector<2x256xf32> -> vector<2x256xf32>
    %580 = vector.extract_strided_slice %433 {offsets = [144, 64], sizes = [2, 1], strides = [1, 1]} : vector<152x128xbf16> to vector<2x1xbf16>
    %581 = arith.extf %580 : vector<2x1xbf16> to vector<2x1xf32>
    %582 = vector.broadcast %581 : vector<2x1xf32> to vector<2x256xf32>
    %583 = arith.addf %579, %582 : vector<2x256xf32>
    %c0_127 = arith.constant 0 : index
    %c0_128 = arith.constant 0 : index
    %c0_129 = arith.constant 0 : index
    %584 = vector.load %arg5[%c0_127, %c0_128, %c0_129] : memref<1x7x256xf32, #tpu.memory_space<vmem>>, vector<1x3x256xf32>
    %585 = vector.shape_cast %584 : vector<1x3x256xf32> to vector<3x256xf32>
    %586 = vector.shape_cast %11 : vector<3x256xf32> to vector<1x3x256xf32>
    tpu.vector_store %arg5[%c0_127, %c0_128, %c0_129], %586 {strides = array<i32>} : memref<1x7x256xf32, #tpu.memory_space<vmem>>, vector<1x3x256xf32>,
    %c0_130 = arith.constant 0 : index
    %c3_131 = arith.constant 3 : index
    %c0_132 = arith.constant 0 : index
    %587 = vector.load %arg5[%c0_130, %c3_131, %c0_132] : memref<1x7x256xf32, #tpu.memory_space<vmem>>, vector<1x2x256xf32>
    %588 = vector.shape_cast %587 : vector<1x2x256xf32> to vector<2x256xf32>
    %589 = vector.shape_cast %145 : vector<2x256xf32> to vector<1x2x256xf32>
    tpu.vector_store %arg5[%c0_130, %c3_131, %c0_132], %589 {strides = array<i32>} : memref<1x7x256xf32, #tpu.memory_space<vmem>>, vector<1x2x256xf32>,
    %c0_133 = arith.constant 0 : index
    %c5 = arith.constant 5 : index
    %c0_134 = arith.constant 0 : index
    %590 = vector.load %arg5[%c0_133, %c5, %c0_134] : memref<1x7x256xf32, #tpu.memory_space<vmem>>, vector<1x2x256xf32>
    %591 = vector.shape_cast %590 : vector<1x2x256xf32> to vector<2x256xf32>
    %592 = vector.shape_cast %297 : vector<2x256xf32> to vector<1x2x256xf32>
    tpu.vector_store %arg5[%c0_133, %c5, %c0_134], %592 {strides = array<i32>} : memref<1x7x256xf32, #tpu.memory_space<vmem>>, vector<1x2x256xf32>,
    %c0_135 = arith.constant 0 : index
    %c0_136 = arith.constant 0 : index
    %c0_137 = arith.constant 0 : index
    %593 = vector.load %arg6[%c0_135, %c0_136, %c0_137] : memref<1x7x256xf32, #tpu.memory_space<vmem>>, vector<1x3x256xf32>
    %594 = vector.shape_cast %593 : vector<1x3x256xf32> to vector<3x256xf32>
    %595 = vector.shape_cast %11 : vector<3x256xf32> to vector<1x3x256xf32>
    tpu.vector_store %arg6[%c0_135, %c0_136, %c0_137], %595 {strides = array<i32>} : memref<1x7x256xf32, #tpu.memory_space<vmem>>, vector<1x3x256xf32>,
    %c0_138 = arith.constant 0 : index
    %c3_139 = arith.constant 3 : index
    %c0_140 = arith.constant 0 : index
    %596 = vector.load %arg6[%c0_138, %c3_139, %c0_140] : memref<1x7x256xf32, #tpu.memory_space<vmem>>, vector<1x2x256xf32>
    %597 = vector.shape_cast %596 : vector<1x2x256xf32> to vector<2x256xf32>
    %598 = vector.shape_cast %431 : vector<2x256xf32> to vector<1x2x256xf32>
    tpu.vector_store %arg6[%c0_138, %c3_139, %c0_140], %598 {strides = array<i32>} : memref<1x7x256xf32, #tpu.memory_space<vmem>>, vector<1x2x256xf32>,
    %c0_141 = arith.constant 0 : index
    %c5_142 = arith.constant 5 : index
    %c0_143 = arith.constant 0 : index
    %599 = vector.load %arg6[%c0_141, %c5_142, %c0_143] : memref<1x7x256xf32, #tpu.memory_space<vmem>>, vector<1x2x256xf32>
    %600 = vector.shape_cast %599 : vector<1x2x256xf32> to vector<2x256xf32>
    %601 = vector.shape_cast %583 : vector<2x256xf32> to vector<1x2x256xf32>
    tpu.vector_store %arg6[%c0_141, %c5_142, %c0_143], %601 {strides = array<i32>} : memref<1x7x256xf32, #tpu.memory_space<vmem>>, vector<1x2x256xf32>,
    return
  }
  func.func @transform_0(%arg0: i32, %arg1: i32) -> (i32, i32, i32) {
    %c0_i32 = arith.constant 0 : i32
    %c0_i32_0 = arith.constant 0 : i32
    return %arg0, %c0_i32, %arg1 : i32, i32, i32
  }
  func.func @transform_1(%arg0: i32, %arg1: i32) -> (i32, i32, i32) {
    %c0_i32 = arith.constant 0 : i32
    %c0_i32_0 = arith.constant 0 : i32
    return %arg0, %c0_i32, %arg1 : i32, i32, i32
  }
  func.func @transform_2(%arg0: i32, %arg1: i32) -> (i32, i32, i32) {
    %c0_i32 = arith.constant 0 : i32
    %c0_i32_0 = arith.constant 0 : i32
    %c0_i32_1 = arith.constant 0 : i32
    %c0_i32_2 = arith.constant 0 : i32
    return %c0_i32, %c0_i32_0, %c0_i32_1 : i32, i32, i32
  }
  func.func @transform_3(%arg0: i32, %arg1: i32) -> (i32, i32, i32) {
    %c0_i32 = arith.constant 0 : i32
    %c0_i32_0 = arith.constant 0 : i32
    return %arg0, %c0_i32, %arg1 : i32, i32, i32
  }
  func.func @transform_4(%arg0: i32, %arg1: i32) -> (i32, i32, i32) {
    %c0_i32 = arith.constant 0 : i32
    %c0_i32_0 = arith.constant 0 : i32
    return %arg0, %c0_i32, %arg1 : i32, i32, i32
  }
}

</mosaic_0001>

<bundles_post_ra>
// kernel: mh_g_forward.1
= control target key start
LH: loop header
LB: loop body
LE: loop exit
PB: predicated region body
PF: predicated region fallthrough
CT: control target
= control target key end

     0   :  { %s5666_s15 = smov 0   ;;  %s5668_s16 = smov 0   ;;  %s7510_s0 = inlined_call_operand.vmem [shape: bf16[2,64,256], index: 0, kind: input, shape index: {}]   ;;  %s7511_s1 = inlined_call_operand.vmem [shape: f32[2,3,256], index: 1, kind: input, shape index: {}]   ;;  %s7512_s2 = inlined_call_operand.vmem [shape: bf16[4,152,128], index: 2, kind: input, shape index: {}]   ;;  %s7513_s3 = inlined_call_operand.vmem [shape: f32[2,7,256], index: 3, kind: output, shape index: {0}]   ;;  %s7514_s4 = inlined_call_operand.vmem [shape: f32[2,7,256], index: 4, kind: output, shape index: {1}]  }
   0x1   :  { %s5670_s17 = smov 0  }
   0x2 LB: > { %s27_s18 = sadd.s32 1, %s5629_s16  ;;  %p4587_p0 = scmp.ge.s32.totalorder %s5633_s17, 1  ;;  %s5633_s17 = sphi %s5670_s17, %s15_s17   ;;  %s5629_s16 = sphi %s5668_s16, %s7746_s16   ;;  %s5625_s15 = sphi %s5666_s15, %s7745_s15  }
   0x3   : > { %p29_p1 = scmp.ge.s32.totalorder %s27_s18, 2  ;;  %p205_p2 = scmp.lt.s32.totalorder %s5633_s17, 3 }
   0x5   : > { %s7748_s18 = smov (%p29_p1, %s27_s18), 0  ;;  %p206_p3 = pnand %p4587_p0, %p205_p2 }
   0x7   : > { %209 = sbr.rel (%p206_p3) target bundleno = 3295 (0xcdf), region = 32 }
   0xe   : > { %v4792_v0 = vld [vmem:[%s7512_s2] sm:$0xff]   ;;  %v7519_v1 = vmov 2   ;;  %v7521_v2 = vmov 0   ;;  %p258_p4 = scmp.lt.s32.totalorder %s5625_s15, 1  ;;  %v5694_v6 = vld [vmem:[%s7512_s2 + $0x8] sm:$0xff]   ;;  %vm311_vm0 = vcmask 1042432  }
   0xf   : > { %4842 = vset.pattern.permute.xlu1 %v7519_v1  ;;  %4830 = vset.pattern.permute.xlu0 %v7521_v2  ;;  %v4793_v3 = vunpack.c.l.bf16 %v4792_v0  ;;  %v4794_v4 = vunpack.c.h.bf16 %v4792_v0  ;;  %v584_v7 = vunpack.c.l.bf16 %v5694_v6  ;;  %v585_v8 = vunpack.c.h.bf16 %v5694_v6  ;;  %v5713_v15 = vld [vmem:[%s7512_s2 + $0x10] sm:$0xff]   ;;  %v5722_v22 = vld [vmem:[%s7512_s2 + $0x18] sm:$0xff]   ;;  %v5728_v28 = vld [vmem:[%s7512_s2 + $0x20] sm:$0xff]  }
  0x10   : > { %697 = vmatprep.mubr.bf16.mxu0 %v7521_v2  ;;  %1101 = vmatprep.mubr.bf16.mxu1 %v7521_v2  ;;  %s7750_s15 = smov (!%p258_p4, %s5625_s15), 1  ;;  %v7517_v11 = vmov 64   ;;  %v7515_v12 = vmov 1   ;;  %v587_v20 = vunpack.c.h.bf16 %v5713_v15  ;;  %v588_v26 = vunpack.c.l.bf16 %v5722_v22  ;;  %v358_v29 = vld [vmem:[%s7512_s2 + $0x28] sm:$0xff]   ;;  %v362_v37 = vld [vmem:[%s7512_s2 + $0x38] sm:$0xff]  }
  0x11   : > { %v4843_v5 = vpack.i.bf16 %v4794_v4, %v4793_v3  ;;  %s4788_s23 = sshll.u32 %s7750_s15, 3  ;;  %v4854_v13 = vpack.i.bf16 %v585_v8, %v584_v7  ;;  %v590_v33 = vunpack.c.l.bf16 %v5728_v28  ;;  %v988_v34 = vunpack.c.l.bf16 %v358_v29  ;;  %v366_v43 = vld [vmem:[%s7512_s2 + $0x48] sm:$0xf]  ;;  %s4787_s21 = sshll.u32 %s7750_s15, 6 }
  0x12   : > { %s275_s26 = scalar_lea.vmem %s7511_s1, %s4788_s23  ;;  %v989_v35 = vunpack.c.h.bf16 %v358_v29  ;;  %v992_v40 = vunpack.c.l.bf16 %v362_v37  ;;  %v993_v41 = vunpack.c.h.bf16 %v362_v37  ;;  %v1310_v45 = vunpack.c.l.bf16 %v366_v43  ;;  %s5851_s24 = scalar_lea.vmem %s7510_s0, %s4787_s21 }
  0x13   : > { %4844 = vperm.xlu1 %4842, %v4843_v5   ;;  %4832 = vperm.xlu0 %4830, %v4843_v5   ;;  %v5704_v9 = vld [vmem:[%s275_s26] sm:$0x77]  ;;  %vm652_vm5 = vcmask 130048   ;;  %vm1056_vm6 = vcmask 523264   ;;  %s4789_s13 = sshll.u32 %s7750_s15, 4  ;;  %vm1362_vm7 = vcmask 1041408  }
  0x14   : > { %v307_v10 = vmul.f32 %v5704_v9, %v5704_v9  ;;  %v4860_v39 = vpack.i.bf16 %v989_v35, %v988_v34  ;;  %v4870_v42 = vpack.i.bf16 %v993_v41, %v992_v40  ;;  %s6192_s20 = scalar_lea.vmem %s7513_s3, %s4789_s13 }
  0x16   : > { %v309_v14 = vcombine.high %v307_v10, %v307_v10  ;;  %v312_v16 = vsel %vm311_vm0, %v307_v10, 0.0 }
  0x17   : > { %4848 = vset.pattern.permute.xlu1 %v7517_v11  ;;  %4836 = vset.pattern.permute.xlu0 %v7515_v12  ;;  %v313_v17 = vrot.slane %v312_v16, 4 }
  0x18   : > { %4850 = vperm.xlu1 %4848, %v4843_v5   ;;  %4838 = vperm.xlu0 %4836, %v4843_v5   ;;  %v319_v18 = vsel %vm311_vm0, %v309_v14, 0.0 }
  0x19   : > { %v320_v19 = vrot.slane %v319_v18, 4  ;;  %v314_v21 = vadd.f32 %v313_v17, %v312_v16 }
  0x1b   : > { %v321_v23 = vadd.f32 %v320_v19, %v319_v18  ;;  %v315_v24 = vrot.slane %v314_v21, 2 }
  0x1c   : > { %4855 = vperm.xlu1 %4848, %v4854_v13   ;;  %4859 = vset.pattern.permute.xlu0 %v7517_v11 }
  0x1d   : > { %v322_v25 = vrot.slane %v321_v23, 2  ;;  %v316_v27 = vadd.f32 %v315_v24, %v314_v21 }
  0x1f   : > { %v323_v30 = vadd.f32 %v322_v25, %v321_v23  ;;  %v317_v31 = vrot.slane %v316_v27, 1 }
  0x20   : > { %609 = vperm.xlu1 %4848, %v587_v20  }
  0x21   : > { %v324_v32 = vrot.slane %v323_v30, 1  ;;  %v318_v36 = vadd.f32 %v317_v31, %v316_v27  ;;  %v5761_v31 = vld [vmem:[%s7512_s2 + $0x30] sm:$0xff]  }
  0x22   : > { %v990_v37 = vunpack.c.l.bf16 %v5761_v31 }
  0x23   : > { %v325_v38 = vadd.f32 %v324_v32, %v323_v30  ;;  %5121 = vrsqrt.f32 %v318_v36  ;;  %vm328_vm1 = vcmp.eq.f32.partialorder %v318_v36, inf  ;;  %v331_v46 = vand.u32 2147483648, %v318_v36 }
  0x24   : > { %614 = vperm.xlu1 %4848, %v588_v26   ;;  %vm330_vm2 = vcmp.eq.f32.partialorder %v318_v36, 0.0  ;;  %v586_v26 = vunpack.c.l.bf16 %v5713_v15  ;;  %v589_v30 = vunpack.c.h.bf16 %v5722_v22 }
  0x25   : > { %5123 = vrsqrt.f32 %v325_v38  ;;  %vm335_vm3 = vcmp.eq.f32.partialorder %v325_v38, inf  ;;  %v338_v49 = vand.u32 2147483648, %v325_v38  ;;  %vm337_vm4 = vcmp.eq.f32.partialorder %v325_v38, 0.0 }
  0x26   : > { %604 = vperm.xlu0 %4859, %v586_v26  }
  0x28   : > { %624 = vperm.xlu1 %4848, %v590_v33  }
  0x2a   : > { %619 = vperm.xlu0 %4859, %v589_v30  }
  0x2c   : > { %4861 = vperm.xlu1 %4848, %v4860_v39   ;;  %v5773_v39 = vld [vmem:[%s7512_s2 + $0x40] sm:$0xff]  }
  0x2d   : > { %v5122_v44 = vpop.eup %5121 }
  0x2e   : > { %v327_v48 = vmul.f32 %v5122_v44, %v318_v36 }
  0x2f   : > { %v5124_v47 = vpop.eup %5123 }
  0x30   : > { %4871 = vperm.xlu1 %4848, %v4870_v42   ;;  %v334_v50 = vmul.f32 %v5124_v47, %v325_v38  ;;  %v329_v51 = vsel %vm328_vm1, %v318_v36, %v327_v48  ;;  %v591_v36 = vunpack.c.h.bf16 %v5728_v28 }
  0x31   : > { %v332_v52 = vsel %vm330_vm2, %v331_v46, %v329_v51  ;;  %v995_v46 = vunpack.c.h.bf16 %v5773_v39 }
  0x32   : > { %v336_v53 = vsel %vm335_vm3, %v325_v38, %v334_v50  ;;  %v340_v55 = vmax.f32 %v332_v52, 1e-12  ;;  %v991_v38 = vunpack.c.h.bf16 %v5761_v31  ;;  %629 = vperm.xlu0 %4859, %v591_v36  }
  0x33   : > { %v339_v54 = vsel %vm337_vm4, %v338_v49, %v336_v53 }
  0x34   : > { %1313 = vperm.xlu1 %4848, %v1310_v45   ;;  %v341_v56 = vmax.f32 %v339_v54, 1e-12  ;;  %v4865_v44 = vpack.i.bf16 %v991_v38, %v990_v37  ;;  %v994_v45 = vunpack.c.l.bf16 %v5773_v39 }
  0x36   : > { %v344_v57 = vcombine.low %v340_v55, %v341_v56  ;;  %4866 = vperm.xlu0 %4859, %v4865_v44   ;;  %v4875_v51 = vpack.i.bf16 %v995_v46, %v994_v45 }
  0x38   : > { %4886 = vset.pattern.permute.xlu1 %v7515_v12  ;;  %5125 = vrcp.f32 %v344_v57 }
  0x3a   : > { %4876 = vperm.xlu0 %4859, %v4875_v51  }
  0x3e   : > { %4880 = vset.pattern.permute.xlu0 %v7521_v2 }
  0x42   : > { %v5126_v58 = vpop.eup %5125 }
  0x43   : > { %v5742_v59 = vmul.f32 %v5126_v58, %v5704_v9 }
  0x45   : > { %7604 = vst [vmem:[#allocation2_spill] sm:$0xff] %v5742_v59  ;;  %v5746_v60 = vcombine.high %v5742_v59, %v5742_v59  ;;  %v386_v61 = vmul.f32 %v5742_v59, %v5742_v59  ;;  %v370_v62 = vsel %vm311_vm0, %v5742_v59, 0.0  ;;  %4392 = vst [vmem:[%s6192_s20] sm:$0x7] %v5742_v59 }
  0x46   : > { %v371_v3 = vrot.slane %v370_v62, 4 }
  0x47   : > { %7605 = vst [vmem:[#allocation3_spill] sm:$0xff] %v5746_v60  ;;  %v377_v63 = vsel %vm311_vm0, %v5746_v60, 0.0  ;;  %v388_v0 = vcombine.high %v386_v61, %v386_v61  ;;  %v390_v5 = vsel %vm311_vm0, %v386_v61, 0.0  ;;  %v444_v61 = vlaneseq  ;;  %4393 = vst [vmem:[%s6192_s20 + $0x8] sm:$0x7] %v5746_v60  ;;  %v4691_v60 = vld [vmem:[%s7512_s2 + $0xc0] sm:$0xff]  }
  0x48   : > { %v378_v4 = vrot.slane %v377_v63, 4  ;;  %v372_v8 = vadd.f32 %v371_v3, %v370_v62  ;;  %v391_v9 = vrot.slane %v390_v5, 4 }
  0x49   : > { %v397_v7 = vsel %vm311_vm0, %v388_v0, 0.0  ;;  %v445_v0 = vshrl.u32 %v444_v61, 7 }
  0x4a   : > { %v379_v10 = vadd.f32 %v378_v4, %v377_v63  ;;  %v398_v13 = vrot.slane %v397_v7, 4  ;;  %v373_v14 = vrot.slane %v372_v8, 2  ;;  %v392_v16 = vadd.f32 %v391_v9, %v390_v5 }
  0x4b   : > { %v5787_v5 = vsub.s32 0, %v445_v0  ;;  %v5791_v9 = vsub.s32 2, %v445_v0 }
  0x4c   : > { %v380_v17 = vrot.slane %v379_v10, 2  ;;  %v399_v18 = vadd.f32 %v398_v13, %v397_v7  ;;  %v374_v19 = vadd.f32 %v373_v14, %v372_v8  ;;  %v393_v20 = vrot.slane %v392_v16, 2 }
  0x4d   : > { %7610 = vst [vmem:[#allocation8_spill] sm:$0xff] %v5787_v5  ;;  %v5789_v7 = vsub.s32 4, %v445_v0  ;;  %7612 = vst [vmem:[#allocation10_spill] sm:$0xff] %v5791_v9  ;;  %v5795_v13 = vsub.s32 1, %v445_v0  ;;  %v5797_v14 = vsub.s32 5, %v445_v0 }
  0x4e   : > { %v381_v21 = vadd.f32 %v380_v17, %v379_v10  ;;  %v400_v23 = vrot.slane %v399_v18, 2  ;;  %v375_v24 = vrot.slane %v374_v19, 1  ;;  %v394_v25 = vadd.f32 %v393_v20, %v392_v16 }
  0x4f   : > { %7611 = vst [vmem:[#allocation9_spill] sm:$0xff] %v5789_v7  ;;  %v5793_v10 = vsub.s32 6, %v445_v0  ;;  %7614 = vst [vmem:[#allocation12_spill] sm:$0xff] %v5795_v13 }
  0x50   : > { %v382_v27 = vrot.slane %v381_v21, 1  ;;  %v401_v29 = vadd.f32 %v400_v23, %v399_v18  ;;  %v5763_v32 = vadd.f32 %v375_v24, %v374_v19  ;;  %v395_v33 = vrot.slane %v394_v25, 1  ;;  %7615 = vst [vmem:[#allocation13_spill] sm:$0xff] %v5797_v14 }
  0x51   : > { %7613 = vst [vmem:[#allocation11_spill] sm:$0xff] %v5793_v10 }
  0x52   : > { %7606 = vst [vmem:[#allocation4_spill] sm:$0xff] %v5763_v32  ;;  %v5765_v34 = vadd.f32 %v382_v27, %v381_v21  ;;  %v402_v35 = vrot.slane %v401_v29, 1  ;;  %v5775_v40 = vadd.f32 %v395_v33, %v394_v25  ;;  %v407_v41 = vmul.f32 0.33333334, %v5763_v32 }
  0x54   : > { %7607 = vst [vmem:[#allocation5_spill] sm:$0xff] %v5765_v34  ;;  %7608 = vst [vmem:[#allocation6_spill] sm:$0xff] %v5775_v40  ;;  %v5778_v42 = vadd.f32 %v402_v35, %v401_v29  ;;  %v408_v43 = vmul.f32 0.33333334, %v5765_v34  ;;  %v409_v47 = vmul.f32 0.33333334, %v5775_v40  ;;  %v411_v48 = vmul.f32 %v407_v41, %v407_v41 }
  0x56   : > { %7609 = vst [vmem:[#allocation7_spill] sm:$0xff] %v5778_v42  ;;  %v410_v49 = vmul.f32 0.33333334, %v5778_v42  ;;  %v412_v50 = vmul.f32 %v408_v43, %v408_v43  ;;  %v413_v52 = vsub.f32 %v409_v47, %v411_v48  ;;  %v425_v62 = vcombine.low %v407_v41, %v408_v43 }
  0x58   : > { %v414_v53 = vsub.f32 %v410_v49, %v412_v50  ;;  %v415_v54 = vmax.f32 %v413_v52, 0.0  ;;  %v427_v3 = vsub.f32 %v5742_v59, %v425_v62 }
  0x5a   : > { %v416_v55 = vmax.f32 %v414_v53, 0.0  ;;  %v417_v56 = vadd.f32 1e-05, %v415_v54 }
  0x5c   : > { %v418_v57 = vadd.f32 1e-05, %v416_v55  ;;  %5127 = vrsqrt.f32 %v417_v56 }
  0x5e   : > { %5129 = vrsqrt.f32 %v418_v57 }
  0x66   : > { %v5128_v58 = vpop.eup %5127 }
  0x68   : > { %v5130_v63 = vpop.eup %5129 }
  0x69   : > { %v430_v4 = vcombine.low %v5128_v58, %v5130_v63 }
  0x6b   : > { %v432_v8 = vmul.f32 %v430_v4, %v427_v3 }
  0x6d   : > { %v447_v16 = vrot.slane %v432_v8, %v5787_v5  ;;  %v451_v17 = vrot.slane %v432_v8, %v5789_v7  ;;  %v511_v18 = vrot.slane %v432_v8, %v5791_v9  ;;  %v515_v19 = vrot.slane %v432_v8, %v5793_v10 }
  0x6e   : > { %v477_v21 = vrot.slane %v432_v8, %v5795_v13  ;;  %v481_v23 = vrot.slane %v432_v8, %v5797_v14 }
  0x6f   : > { %v5806_v25 = vrot.slane %v447_v16, %v5787_v5  ;;  %v5809_v26 = vrot.slane %v451_v17, %v5787_v5  ;;  %v5812_v35 = vrot.slane %v511_v18, %v5791_v9  ;;  %v5815_v36 = vrot.slane %v515_v19, %v5791_v9 }
  0x70   : > { %v5818_v37 = vrot.slane %v477_v21, %v5795_v13  ;;  %v5821_v38 = vrot.slane %v481_v23, %v5795_v13 }
  0x71   : > { %7616 = vst [vmem:[#allocation14_spill] sm:$0xff] %v5806_v25  ;;  %7617 = vst [vmem:[#allocation15_spill] sm:$0xff] %v5809_v26 }
  0x72   : > { %7618 = vst [vmem:[#allocation16_spill] sm:$0xff] %v5812_v35  ;;  %7619 = vst [vmem:[#allocation17_spill] sm:$0xff] %v5815_v36 }
  0x73   : > { %7620 = vst [vmem:[#allocation18_spill] sm:$0xff] %v5818_v37  ;;  %7621 = vst [vmem:[#allocation19_spill] sm:$0xff] %v5821_v38 }
  0x92   : > { %v4833_v20 = vpop.permute.xlu0 %4832  ;;  %v4845_v29 = vpop.permute.xlu1 %4844 }
  0x93   : > { %v4834_v24 = vunpack.i.l.bf16 %v4833_v20  ;;  %v4835_v27 = vunpack.i.h.bf16 %v4833_v20  ;;  %v4847_v30 = vunpack.i.h.bf16 %v4845_v29  ;;  %v4846_v33 = vunpack.i.l.bf16 %v4845_v29 }
  0x95   : > { %v462_v41 = vmul.f32 %v4834_v24, %v5806_v25  ;;  %v463_v43 = vmul.f32 %v4834_v24, %v5809_v26  ;;  %v464_v45 = vmul.f32 %v4835_v27, %v5806_v25  ;;  %v465_v46 = vmul.f32 %v4835_v27, %v5809_v26 }
  0x96   : > { %v526_v49 = vmul.f32 %v4846_v33, %v5812_v35  ;;  %v527_v50 = vmul.f32 %v4846_v33, %v5815_v36  ;;  %v528_v51 = vmul.f32 %v4847_v30, %v5812_v35  ;;  %v529_v52 = vmul.f32 %v4847_v30, %v5815_v36 }
  0x97   : > { %v4839_v44 = vpop.permute.xlu0 %4838  ;;  %v4851_v53 = vpop.permute.xlu1 %4850 }
  0x98   : > { %v4841_v47 = vunpack.i.h.bf16 %v4839_v44  ;;  %v4840_v48 = vunpack.i.l.bf16 %v4839_v44  ;;  %v4853_v58 = vunpack.i.h.bf16 %v4851_v53  ;;  %v4852_v61 = vunpack.i.l.bf16 %v4851_v53 }
  0x9a   : > { %v492_v54 = vmul.f32 %v4840_v48, %v5818_v37  ;;  %v493_v55 = vmul.f32 %v4840_v48, %v5821_v38  ;;  %v494_v56 = vmul.f32 %v4841_v47, %v5818_v37  ;;  %v495_v57 = vmul.f32 %v4841_v47, %v5821_v38 }
  0x9c   : > { %v496_v62 = vadd.f32 %v492_v54, %v462_v41  ;;  %v497_v63 = vadd.f32 %v493_v55, %v463_v43  ;;  %v498_v0 = vadd.f32 %v494_v56, %v464_v45  ;;  %v499_v3 = vadd.f32 %v495_v57, %v465_v46 }
  0x9e   : > { %v530_v4 = vadd.f32 %v526_v49, %v496_v62  ;;  %v531_v8 = vadd.f32 %v527_v50, %v497_v63  ;;  %v532_v16 = vadd.f32 %v528_v51, %v498_v0  ;;  %v533_v17 = vadd.f32 %v529_v52, %v499_v3 }
  0xa0   : > { %v542_v18 = vadd.f32 %v4852_v61, %v530_v4  ;;  %v543_v19 = vadd.f32 %v4852_v61, %v531_v8  ;;  %v544_v20 = vadd.f32 %v4853_v58, %v532_v16  ;;  %v545_v21 = vadd.f32 %v4853_v58, %v533_v17 }
  0xa2   : > { %v547_v23 = vmul.f32 %v543_v19, %v543_v19  ;;  %v549_v24 = vmul.f32 %v545_v21, %v545_v21  ;;  %v546_v27 = vmul.f32 %v542_v18, %v542_v18  ;;  %v548_v29 = vmul.f32 %v544_v20, %v544_v20 }
  0xa4   : > { %v551_v30 = vmul.f32 %v547_v23, %v543_v19  ;;  %v553_v33 = vmul.f32 %v549_v24, %v545_v21  ;;  %v550_v44 = vmul.f32 %v546_v27, %v542_v18  ;;  %v552_v47 = vmul.f32 %v548_v29, %v544_v20 }
  0xa6   : > { %v555_v41 = vmul.f32 0.044715, %v551_v30  ;;  %v557_v43 = vmul.f32 0.044715, %v553_v33  ;;  %v554_v45 = vmul.f32 0.044715, %v550_v44 }
  0xa7   : > { %v556_v46 = vmul.f32 0.044715, %v552_v47 }
  0xa8   : > { %v559_v48 = vadd.f32 %v555_v41, %v543_v19  ;;  %v561_v49 = vadd.f32 %v557_v43, %v545_v21  ;;  %v558_v50 = vadd.f32 %v554_v45, %v542_v18 }
  0xa9   : > { %v560_v51 = vadd.f32 %v556_v46, %v544_v20 }
  0xaa   : > { %v563_v52 = vmul.f32 0.7978846, %v559_v48  ;;  %v565_v53 = vmul.f32 0.7978846, %v561_v49  ;;  %v562_v54 = vmul.f32 0.7978846, %v558_v50 }
  0xab   : > { %v564_v55 = vmul.f32 0.7978846, %v560_v51 }
  0xac   : > { %5131 = vtanh.f32 %v563_v52 }
  0xad   : > { %5133 = vtanh.f32 %v565_v53 }
  0xae   : > { %5135 = vtanh.f32 %v562_v54 }
  0xaf   : > { %5137 = vtanh.f32 %v564_v55 }
  0xb6   : > { %v5132_v56 = vpop.eup %5131 }
  0xb7   : > { %v5134_v57 = vpop.eup %5133  ;;  %v571_v58 = vadd.f32 1.0, %v5132_v56 }
  0xb8   : > { %v5136_v61 = vpop.eup %5135  ;;  %v573_v62 = vadd.f32 1.0, %v5134_v57 }
  0xb9   : > { %v5138_v63 = vpop.eup %5137  ;;  %v575_v0 = vmul.f32 0.5, %v571_v58  ;;  %v570_v3 = vadd.f32 1.0, %v5136_v61 }
  0xba   : > { %v577_v4 = vmul.f32 0.5, %v573_v62  ;;  %v572_v8 = vadd.f32 1.0, %v5138_v63 }
  0xbb   : > { %v579_v16 = vmul.f32 %v575_v0, %v543_v19  ;;  %v574_v17 = vmul.f32 0.5, %v570_v3 }
  0xbc   : > { %v581_v23 = vmul.f32 %v577_v4, %v545_v21  ;;  %v576_v24 = vmul.f32 0.5, %v572_v8 }
  0xbd   : > { %v578_v27 = vmul.f32 %v574_v17, %v542_v18  ;;  %v4856_v18 = vpop.permute.xlu1 %4855 }
  0xbe   : > { %v583_v29 = vpack.c.bf16 %v581_v23, %v579_v16  ;;  %v580_v30 = vmul.f32 %v576_v24, %v544_v20  ;;  %v4857_v19 = vunpack.i.l.bf16 %v4856_v18  ;;  %v4858_v20 = vunpack.i.h.bf16 %v4856_v18 }
  0xc0   : > { %665 = vmatprep.subr.bf16.mxu0 %v583_v29  ;;  %v582_v33 = vpack.c.bf16 %v580_v30, %v578_v27 }
  0xc1   : > { %v610_v53 = vpop.permute.xlu1 %609 }
  0xc2   : > { %666 = vmatpush1.bf16.msra.mxu0 %v582_v33 }
  0xc5   : > { %4600 = vmatmul.mubr.msk.bf16.vlgmr.msra.gmra.mrb[0].mxu0 %vm652_vm5, %v5694_v6  ;;  %v615_v8 = vpop.permute.xlu1 %614 }
  0xc6   : > { %707 = vmatprep.mubr.bf16.mxu0 %v7521_v2 }
  0xcd   : > { %4601 = vmatmul.mubr.msk.bf16.gmra.mrb[4].mxu0 %vm652_vm5, %v5713_v15 }
  0xce   : > { %717 = vmatprep.mubr.bf16.mxu0 %v7521_v2 }
  0xd5   : > { %4602 = vmatmul.mubr.msk.bf16.gmra.mrb[8].mxu0 %vm652_vm5, %v5722_v22 }
  0xd6   : > { %727 = vmatprep.mubr.bf16.mxu0 %v7521_v2 }
  0xdd   : > { %4603 = vmatmul.mubr.msk.bf16.gmra.mrb[12].mxu0 %vm652_vm5, %v5728_v28  ;;  %v605_v28 = vpop.permute.xlu0 %604 }
  0xde   : > { %1351 = vmatprep.mubr.bf16.mxu0 %v7521_v2 }
  0xe1   : > { %v620_v18 = vpop.permute.xlu0 %619 }
 0x198   : > { %v699_v6 = vpop.f32.mrb[0].mxu0 }
 0x199   : > { %v700_v21 = vadd.f32 %v4857_v19, %v699_v6  ;;  %v701_v44 = vpop.f32.mrb[1].mxu0 }
 0x19a   : > { %v702_v47 = vadd.f32 %v4857_v19, %v701_v44  ;;  %v703_v15 = vpop.f32.mrb[2].mxu0 }
 0x19b   : > { %v4604_v41 = vmul.f32 -1.442695, %v700_v21  ;;  %v704_v43 = vadd.f32 %v4858_v20, %v703_v15  ;;  %v705_v45 = vpop.f32.mrb[3].mxu0 }
 0x19c   : > { %v4605_v46 = vmul.f32 -1.442695, %v702_v47  ;;  %v706_v22 = vadd.f32 %v4858_v20, %v705_v45 }
 0x19d   : > { %5139 = vpow2.f32 %v4604_v41  ;;  %v4606_v48 = vmul.f32 -1.442695, %v704_v43 }
 0x19e   : > { %5141 = vpow2.f32 %v4605_v46  ;;  %v4607_v49 = vmul.f32 -1.442695, %v706_v22 }
 0x19f   : > { %5143 = vpow2.f32 %v4606_v48  ;;  %v625_v48 = vpop.permute.xlu1 %624 }
 0x1a0   : > { %5145 = vpow2.f32 %v4607_v49  ;;  %v709_v50 = vpop.f32.mrb[4].mxu0 }
 0x1a1   : > { %v710_v51 = vadd.f32 %v709_v50, %v605_v28  ;;  %v711_v52 = vpop.f32.mrb[5].mxu0 }
 0x1a2   : > { %v712_v54 = vadd.f32 %v711_v52, %v605_v28  ;;  %v713_v55 = vpop.f32.mrb[6].mxu0 }
 0x1a3   : > { %v4608_v56 = vmul.f32 -1.442695, %v710_v51  ;;  %v714_v57 = vadd.f32 %v713_v55, %v610_v53  ;;  %v715_v58 = vpop.f32.mrb[7].mxu0  ;;  %v630_v55 = vpop.permute.xlu0 %629 }
 0x1a4   : > { %v4609_v61 = vmul.f32 -1.442695, %v712_v54  ;;  %v716_v62 = vadd.f32 %v715_v58, %v610_v53 }
 0x1a5   : > { %5147 = vpow2.f32 %v4608_v56  ;;  %v4610_v63 = vmul.f32 -1.442695, %v714_v57 }
 0x1a6   : > { %5149 = vpow2.f32 %v4609_v61  ;;  %v4611_v0 = vmul.f32 -1.442695, %v716_v62 }
 0x1a7   : > { %v5140_v3 = vpop.eup %5139  ;;  %5151 = vpow2.f32 %v4610_v63 }
 0x1a8   : > { %v5142_v4 = vpop.eup %5141  ;;  %v786_v16 = vadd.f32 1.0, %v5140_v3  ;;  %5153 = vpow2.f32 %v4611_v0  ;;  %v719_v17 = vpop.f32.mrb[8].mxu0 }
 0x1a9   : > { %v5144_v23 = vpop.eup %5143  ;;  %v787_v24 = vadd.f32 1.0, %v5142_v4  ;;  %v720_v27 = vadd.f32 %v719_v17, %v615_v8  ;;  %v721_v29 = vpop.f32.mrb[9].mxu0 }
 0x1aa   : > { %v5146_v30 = vpop.eup %5145  ;;  %5155 = vrcp.f32 %v786_v16  ;;  %v788_v33 = vadd.f32 1.0, %v5144_v23  ;;  %v722_v19 = vadd.f32 %v721_v29, %v615_v8  ;;  %v723_v6 = vpop.f32.mrb[10].mxu0  ;;  %v298_v23 = vld [vmem:[%s5851_s24] sm:$0xff] }
 0x1ab   : > { %5157 = vrcp.f32 %v787_v24  ;;  %v789_v20 = vadd.f32 1.0, %v5146_v30  ;;  %v4612_v21 = vmul.f32 -1.442695, %v720_v27  ;;  %v724_v44 = vadd.f32 %v723_v6, %v620_v18  ;;  %v725_v47 = vpop.f32.mrb[11].mxu0  ;;  %v299_v24 = vld [vmem:[%s5851_s24 + $0x8] sm:$0xff] }
 0x1ac   : > { %5159 = vrcp.f32 %v788_v33  ;;  %v4613_v15 = vmul.f32 -1.442695, %v722_v19  ;;  %v726_v41 = vadd.f32 %v725_v47, %v620_v18  ;;  %v300_v33 = vld [vmem:[%s5851_s24 + $0x10] sm:$0xff]  ;;  %v5856_v19 = vunpack.c.l.bf16 %v298_v23 }
 0x1ad   : > { %5161 = vrcp.f32 %v789_v20  ;;  %v4614_v43 = vmul.f32 -1.442695, %v724_v44  ;;  %v5858_v6 = vunpack.c.l.bf16 %v299_v24  ;;  %v5860_v44 = vunpack.c.h.bf16 %v298_v23 }
 0x1ae   : > { %5163 = vpow2.f32 %v4612_v21  ;;  %v4615_v45 = vmul.f32 -1.442695, %v726_v41  ;;  %7622 = vst [vmem:[#allocation20_spill] sm:$0xff] %v5856_v19  ;;  %v5862_v47 = vunpack.c.h.bf16 %v299_v24  ;;  %v5864_v41 = vunpack.c.l.bf16 %v300_v33 }
 0x1af   : > { %v5148_v46 = vpop.eup %5147  ;;  %5165 = vpow2.f32 %v4613_v15  ;;  %7623 = vst [vmem:[#allocation21_spill] sm:$0xff] %v5858_v6  ;;  %7624 = vst [vmem:[#allocation22_spill] sm:$0xff] %v5860_v44 }
 0x1b0   : > { %v5150_v22 = vpop.eup %5149  ;;  %v790_v49 = vadd.f32 1.0, %v5148_v46  ;;  %5167 = vpow2.f32 %v4614_v43  ;;  %v729_v28 = vpop.f32.mrb[12].mxu0  ;;  %7625 = vst [vmem:[#allocation23_spill] sm:$0xff] %v5862_v47  ;;  %7626 = vst [vmem:[#allocation24_spill] sm:$0xff] %v5864_v41  ;;  %v5866_v46 = vunpack.c.h.bf16 %v300_v33 }
 0x1b1   : > { %v5152_v50 = vpop.eup %5151  ;;  %v791_v51 = vadd.f32 1.0, %v5150_v22  ;;  %5169 = vpow2.f32 %v4615_v45  ;;  %v730_v52 = vadd.f32 %v729_v28, %v625_v48  ;;  %v731_v53 = vpop.f32.mrb[13].mxu0  ;;  %v301_v22 = vld [vmem:[%s5851_s24 + $0x18] sm:$0xff]  ;;  %v302_v28 = vld [vmem:[%s5851_s24 + $0x20] sm:$0xff] }
 0x1b2   : > { %v5154_v54 = vpop.eup %5153  ;;  %5171 = vrcp.f32 %v790_v49  ;;  %v792_v56 = vadd.f32 1.0, %v5152_v50  ;;  %v732_v57 = vadd.f32 %v731_v53, %v625_v48  ;;  %v733_v58 = vpop.f32.mrb[14].mxu0  ;;  %7627 = vst [vmem:[#allocation25_spill] sm:$0xff] %v5866_v46 }
 0x1b3   : > { %5173 = vrcp.f32 %v791_v51  ;;  %v793_v61 = vadd.f32 1.0, %v5154_v54  ;;  %v4616_v62 = vmul.f32 -1.442695, %v730_v52  ;;  %v734_v63 = vadd.f32 %v733_v58, %v630_v55  ;;  %v735_v0 = vpop.f32.mrb[15].mxu0  ;;  %v303_v54 = vld [vmem:[%s5851_s24 + $0x28] sm:$0xff] }
 0x1b4   : > { %v5156_v3 = vpop.eup %5155  ;;  %5175 = vrcp.f32 %v792_v56  ;;  %v4617_v4 = vmul.f32 -1.442695, %v732_v57  ;;  %v736_v8 = vadd.f32 %v735_v0, %v630_v55  ;;  %v5891_v0 = vunpack.c.h.bf16 %v301_v22 }
 0x1b5   : > { %v5158_v16 = vpop.eup %5157  ;;  %5177 = vrcp.f32 %v793_v61  ;;  %v4618_v17 = vmul.f32 -1.442695, %v734_v63  ;;  %v5871_v51 = vmul.f32 %v5156_v3, %v5856_v19  ;;  %v5886_v61 = vunpack.c.l.bf16 %v301_v22 }
 0x1b6   : > { %v5160_v27 = vpop.eup %5159  ;;  %5179 = vpow2.f32 %v4616_v62  ;;  %v4619_v29 = vmul.f32 -1.442695, %v736_v8  ;;  %v5878_v55 = vmul.f32 %v5158_v16, %v5860_v44  ;;  %7629 = vst [vmem:[#allocation27_spill] sm:$0xff] %v5891_v0  ;;  %v5893_v3 = vunpack.c.l.bf16 %v302_v28 }
 0x1b7   : > { %v5162_v30 = vpop.eup %5161  ;;  %5181 = vpow2.f32 %v4617_v4  ;;  %v5874_v52 = vmul.f32 %v5160_v27, %v5858_v6  ;;  %7628 = vst [vmem:[#allocation26_spill] sm:$0xff] %v5886_v61  ;;  %v5895_v8 = vunpack.c.h.bf16 %v302_v28  ;;  %v5897_v16 = vunpack.c.l.bf16 %v303_v54 }
 0x1b8   : > { %v5164_v18 = vpop.eup %5163  ;;  %5183 = vpow2.f32 %v4618_v17  ;;  %v5881_v56 = vmul.f32 %v5162_v30, %v5862_v47  ;;  %7630 = vst [vmem:[#allocation28_spill] sm:$0xff] %v5893_v3  ;;  %v894_v17 = vmul.f32 %v5871_v51, %v5871_v51 }
 0x1b9   : > { %v5166_v20 = vpop.eup %5165  ;;  %v794_v21 = vadd.f32 1.0, %v5164_v18  ;;  %5185 = vpow2.f32 %v4619_v29  ;;  %7631 = vst [vmem:[#allocation29_spill] sm:$0xff] %v5895_v8  ;;  %7632 = vst [vmem:[#allocation30_spill] sm:$0xff] %v5897_v16  ;;  %v896_v23 = vmul.f32 %v5874_v52, %v5874_v52  ;;  %v895_v29 = vmul.f32 %v5878_v55, %v5878_v55 }
 0x1ba   : > { %v5168_v15 = vpop.eup %5167  ;;  %v795_v43 = vadd.f32 1.0, %v5166_v20  ;;  %v897_v30 = vmul.f32 %v5881_v56, %v5881_v56  ;;  %v866_v33 = vadd.f32 %v5874_v52, %v5871_v51 }
 0x1bb   : > { %v5170_v45 = vpop.eup %5169  ;;  %5187 = vrcp.f32 %v794_v21  ;;  %v796_v48 = vadd.f32 1.0, %v5168_v15 }
 0x1bc   : > { %v5172_v49 = vpop.eup %5171  ;;  %5189 = vrcp.f32 %v795_v43  ;;  %v797_v50 = vadd.f32 1.0, %v5170_v45  ;;  %v879_v43 = vadd.f32 %v5881_v56, %v5878_v55  ;;  %v923_v12 = vadd.f32 %v897_v30, %v895_v29 }
 0x1bd   : > { %v5174_v53 = vpop.eup %5173  ;;  %5191 = vrcp.f32 %v796_v48  ;;  %v5884_v58 = vmul.f32 %v5172_v49, %v5864_v41 }
 0x1be   : > { %v5176_v57 = vpop.eup %5175  ;;  %5193 = vrcp.f32 %v797_v50  ;;  %v5889_v63 = vmul.f32 %v5174_v53, %v5866_v46  ;;  %v910_v53 = vadd.f32 %v896_v23, %v894_v17  ;;  %v304_v23 = vld [vmem:[%s5851_s24 + $0x30] sm:$0xff] }
 0x1bf   : > { %v5178_v62 = vpop.eup %5177  ;;  %v898_v20 = vmul.f32 %v5884_v58, %v5884_v58  ;;  %v5912_v21 = vmul.f32 %v5176_v57, %v5886_v61  ;;  %v867_v50 = vadd.f32 %v866_v33, %v5884_v58 }
 0x1c0   : > { %v5180_v4 = vpop.eup %5179  ;;  %v899_v22 = vmul.f32 %v5889_v63, %v5889_v63  ;;  %v5919_v48 = vmul.f32 %v5178_v62, %v5891_v0 }
 0x1c1   : > { %v5182_v24 = vpop.eup %5181  ;;  %v798_v27 = vadd.f32 1.0, %v5180_v4  ;;  %v5922_v4 = vunpack.c.h.bf16 %v303_v54  ;;  %v900_v62 = vmul.f32 %v5912_v21, %v5912_v21 }
 0x1c2   : > { %v5184_v18 = vpop.eup %5183  ;;  %v799_v15 = vadd.f32 1.0, %v5182_v24  ;;  %v880_v24 = vadd.f32 %v879_v43, %v5889_v63  ;;  %v901_v17 = vmul.f32 %v5919_v48, %v5919_v48  ;;  %v924_v33 = vadd.f32 %v923_v12, %v899_v22 }
 0x1c3   : > { %v5186_v45 = vpop.eup %5185  ;;  %5195 = vrcp.f32 %v798_v27  ;;  %v800_v49 = vadd.f32 1.0, %v5184_v18  ;;  %7633 = vst [vmem:[#allocation31_spill] sm:$0xff] %v5922_v4  ;;  %v911_v18 = vadd.f32 %v910_v53, %v898_v20  ;;  %v5949_v53 = vunpack.c.l.bf16 %v304_v23 }
 0x1c4   : > { %5197 = vrcp.f32 %v799_v15  ;;  %v801_v28 = vadd.f32 1.0, %v5186_v45  ;;  %v868_v45 = vadd.f32 %v867_v50, %v5912_v21  ;;  %v925_v1 = vadd.f32 %v924_v33, %v901_v17 }
 0x1c5   : > { %v5188_v57 = vpop.eup %5187  ;;  %5199 = vrcp.f32 %v800_v49  ;;  %7634 = vst [vmem:[#allocation32_spill] sm:$0xff] %v5949_v53  ;;  %v912_v22 = vadd.f32 %v911_v18, %v900_v62 }
 0x1c6   : > { %v5190_v11 = vpop.eup %5189  ;;  %v5928_v27 = vmul.f32 %v5188_v57, %v5893_v3  ;;  %5201 = vrcp.f32 %v801_v28  ;;  %v305_v28 = vld [vmem:[%s5851_s24 + $0x38] sm:$0xff]  ;;  %v5952_v57 = vunpack.c.h.bf16 %v304_v23  ;;  %s7140_s24 = scalar_lea.vmem %s7514_s4, %s4789_s13 }
 0x1c7   : > { %v5192_v15 = vpop.eup %5191  ;;  %v5933_v54 = vmul.f32 %v5190_v11, %v5895_v8  ;;  %v881_v11 = vadd.f32 %v880_v24, %v5919_v48  ;;  %v5957_v2 = vunpack.c.l.bf16 %v305_v28 }
 0x1c8   : > { %v5194_v29 = vpop.eup %5193  ;;  %v902_v30 = vmul.f32 %v5928_v27, %v5928_v27  ;;  %v5939_v43 = vmul.f32 %v5192_v15, %v5897_v16  ;;  %v869_v12 = vadd.f32 %v868_v45, %v5928_v27  ;;  %7635 = vst [vmem:[#allocation33_spill] sm:$0xff] %v5952_v57  ;;  %v5961_v16 = vunpack.c.h.bf16 %v305_v28 }
 0x1c9   : > { %v903_v20 = vmul.f32 %v5933_v54, %v5933_v54  ;;  %v5945_v49 = vmul.f32 %v5194_v29, %v5922_v4  ;;  %v882_v15 = vadd.f32 %v881_v11, %v5933_v54  ;;  %7636 = vst [vmem:[#allocation34_spill] sm:$0xff] %v5957_v2 }
 0x1ca   : > { %v904_v50 = vmul.f32 %v5939_v43, %v5939_v43  ;;  %v913_v29 = vadd.f32 %v912_v22, %v902_v30  ;;  %7637 = vst [vmem:[#allocation35_spill] sm:$0xff] %v5961_v16  ;;  %v870_v18 = vadd.f32 %v869_v12, %v5939_v43 }
 0x1cb   : > { %v905_v24 = vmul.f32 %v5945_v49, %v5945_v49  ;;  %v926_v8 = vadd.f32 %v925_v1, %v903_v20  ;;  %v883_v33 = vadd.f32 %v882_v15, %v5945_v49 }
 0x1cc   : > { %v914_v20 = vadd.f32 %v913_v29, %v904_v50 }
 0x1cd   : > { %v5196_v4 = vpop.eup %5195 }
 0x1ce   : > { %v5198_v45 = vpop.eup %5197  ;;  %v5964_v62 = vmul.f32 %v5196_v4, %v5949_v53 }
 0x1cf   : > { %v5200_v17 = vpop.eup %5199  ;;  %v5968_v23 = vmul.f32 %v5198_v45, %v5952_v57  ;;  %v927_v45 = vadd.f32 %v926_v8, %v905_v24 }
 0x1d0   : > { %v5202_v30 = vpop.eup %5201  ;;  %v906_v11 = vmul.f32 %v5964_v62, %v5964_v62  ;;  %v5974_v28 = vmul.f32 %v5200_v17, %v5957_v2  ;;  %v871_v1 = vadd.f32 %v870_v18, %v5964_v62 }
 0x1d1   : > { %v907_v4 = vmul.f32 %v5968_v23, %v5968_v23  ;;  %v5980_v12 = vmul.f32 %v5202_v30, %v5961_v16  ;;  %v884_v22 = vadd.f32 %v883_v33, %v5968_v23 }
 0x1d2   : > { %v908_v15 = vmul.f32 %v5974_v28, %v5974_v28  ;;  %v872_v57 = vadd.f32 %v871_v1, %v5974_v28  ;;  %v915_v53 = vadd.f32 %v914_v20, %v906_v11 }
 0x1d3   : > { %v909_v17 = vmul.f32 %v5980_v12, %v5980_v12  ;;  %v885_v50 = vadd.f32 %v884_v22, %v5980_v12  ;;  %v928_v29 = vadd.f32 %v927_v45, %v907_v4 }
 0x1d4   : > { %v873_v18 = vrot.slane %v872_v57, 4  ;;  %v916_v2 = vadd.f32 %v915_v53, %v908_v15 }
 0x1d5   : > { %v886_v3 = vrot.slane %v885_v50, 4  ;;  %v929_v30 = vadd.f32 %v928_v29, %v909_v17 }
 0x1d6   : > { %v874_v16 = vadd.f32 %v873_v18, %v872_v57  ;;  %v917_v0 = vrot.slane %v916_v2, 4 }
 0x1d7   : > { %v887_v33 = vadd.f32 %v886_v3, %v885_v50  ;;  %v930_v8 = vrot.slane %v929_v30, 4 }
 0x1d8   : > { %v875_v24 = vrot.slane %v874_v16, 2  ;;  %v918_v61 = vadd.f32 %v917_v0, %v916_v2 }
 0x1d9   : > { %v888_v36 = vrot.slane %v887_v33, 2  ;;  %v931_v35 = vadd.f32 %v930_v8, %v929_v30 }
 0x1da   : > { %v876_v1 = vadd.f32 %v875_v24, %v874_v16  ;;  %v919_v11 = vrot.slane %v918_v61, 2 }
 0x1db   : > { %v889_v20 = vadd.f32 %v888_v36, %v887_v33  ;;  %v932_v46 = vrot.slane %v931_v35, 2 }
 0x1dc   : > { %v877_v41 = vrot.slane %v876_v1, 1  ;;  %v920_v47 = vadd.f32 %v919_v11, %v918_v61 }
 0x1dd   : > { %v890_v22 = vrot.slane %v889_v20, 1  ;;  %v933_v4 = vadd.f32 %v932_v46, %v931_v35 }
 0x1de   : > { %v878_v45 = vadd.f32 %v877_v41, %v876_v1  ;;  %v921_v53 = vrot.slane %v920_v47, 1 }
 0x1df   : > { %v891_v15 = vadd.f32 %v890_v22, %v889_v20  ;;  %v934_v17 = vrot.slane %v933_v4, 1 }
 0x1e0   : > { %v892_v57 = vmul.f32 0.015625, %v878_v45  ;;  %v922_v29 = vadd.f32 %v921_v53, %v920_v47 }
 0x1e1   : > { %v893_v3 = vmul.f32 0.015625, %v891_v15  ;;  %v935_v50 = vadd.f32 %v934_v17, %v933_v4 }
 0x1e2   : > { %v936_v18 = vmul.f32 0.015625, %v922_v29  ;;  %v938_v2 = vmul.f32 %v892_v57, %v892_v57  ;;  %v948_v35 = vsub.f32 %v5871_v51, %v892_v57  ;;  %v950_v41 = vsub.f32 %v5874_v52, %v892_v57 }
 0x1e3   : > { %v937_v0 = vmul.f32 0.015625, %v935_v50  ;;  %v939_v30 = vmul.f32 %v893_v3, %v893_v3  ;;  %v949_v47 = vsub.f32 %v5878_v55, %v893_v3  ;;  %v951_v1 = vsub.f32 %v5881_v56, %v893_v3 }
 0x1e4   : > { %v940_v16 = vsub.f32 %v936_v18, %v938_v2  ;;  %v953_v11 = vsub.f32 %v5889_v63, %v893_v3  ;;  %v955_v20 = vsub.f32 %v5919_v48, %v893_v3  ;;  %v952_v50 = vsub.f32 %v5884_v58, %v892_v57 }
 0x1e5   : > { %v941_v8 = vsub.f32 %v937_v0, %v939_v30  ;;  %v954_v18 = vsub.f32 %v5912_v21, %v892_v57  ;;  %v957_v0 = vsub.f32 %v5933_v54, %v893_v3  ;;  %v959_v30 = vsub.f32 %v5945_v49, %v893_v3 }
 0x1e6   : > { %v942_v36 = vmax.f32 %v940_v16, 0.0 }
 0x1e7   : > { %v943_v33 = vmax.f32 %v941_v8, 0.0 }
 0x1e8   : > { %v944_v24 = vadd.f32 1e-05, %v942_v36 }
 0x1e9   : > { %v945_v61 = vadd.f32 1e-05, %v943_v33 }
 0x1ea   : > { %5203 = vrsqrt.f32 %v944_v24 }
 0x1eb   : > { %5205 = vrsqrt.f32 %v945_v61 }
 0x1f4   : > { %v5204_v46 = vpop.eup %5203 }
 0x1f5   : > { %v5206_v22 = vpop.eup %5205  ;;  %v964_v4 = vmul.f32 %v5204_v46, %v948_v35  ;;  %v966_v45 = vmul.f32 %v5204_v46, %v950_v41  ;;  %v968_v8 = vmul.f32 %v5204_v46, %v952_v50  ;;  %v970_v36 = vmul.f32 %v5204_v46, %v954_v18 }
 0x1f6   : > { %v965_v53 = vmul.f32 %v5206_v22, %v949_v47  ;;  %v967_v15 = vmul.f32 %v5206_v22, %v951_v1  ;;  %v969_v17 = vmul.f32 %v5206_v22, %v953_v11  ;;  %v971_v29 = vmul.f32 %v5206_v22, %v955_v20 }
 0x1f7   : > { %v980_v16 = vpack.c.bf16 %v966_v45, %v964_v4  ;;  %v973_v24 = vmul.f32 %v5206_v22, %v957_v0  ;;  %v975_v61 = vmul.f32 %v5206_v22, %v959_v30  ;;  %v956_v35 = vsub.f32 %v5928_v27, %v892_v57 }
 0x1f8   : > { %v981_v2 = vpack.c.bf16 %v967_v15, %v965_v53  ;;  %v983_v33 = vpack.c.bf16 %v971_v29, %v969_v17  ;;  %v958_v41 = vsub.f32 %v5939_v43, %v892_v57  ;;  %v961_v47 = vsub.f32 %v5968_v23, %v893_v3 }
 0x1f9   : > { %v963_v1 = vsub.f32 %v5980_v12, %v893_v3  ;;  %v982_v11 = vpack.c.bf16 %v970_v36, %v968_v8  ;;  %v972_v20 = vmul.f32 %v5204_v46, %v956_v35  ;;  %v985_v4 = vpack.c.bf16 %v975_v61, %v973_v24  ;;  %v5587_v3 = vld [vmem:[%s7512_s2 + $0x28] sm:$0xff]   ;;  %v4633_v61 = vld [vmem:[%s7512_s2 + $0x5c] sm:$0xff]  }
 0x1fa   : > { %1069 = vmatprep.subr.bf16.mxu1 %v981_v2  ;;  %v974_v53 = vmul.f32 %v5204_v46, %v958_v41  ;;  %v977_v45 = vmul.f32 %v5206_v22, %v961_v47  ;;  %v960_v17 = vsub.f32 %v5964_v62, %v892_v57  ;;  %v962_v29 = vsub.f32 %v5974_v28, %v892_v57  ;;  %v5588_v57 = vld [vmem:[%s7512_s2 + $0x38] sm:$0xff]   ;;  %v6035_v47 = vld [vmem:[%s7512_s2 + $0x64] sm:$0xff]  }
 0x1fb   : > { %1070 = vmatpush1.bf16.msra.mxu1 %v980_v16  ;;  %v979_v15 = vmul.f32 %v5206_v22, %v963_v1  ;;  %v7638_v22 = vmov 0   ;;  %v7639_v36 = vmov 2   ;;  %v7553_v24 = vmov 4  }
 0x1fc   : > { %1071 = vmatprep.subr.bf16.mxu1 %v983_v33  ;;  %v984_v50 = vpack.c.bf16 %v974_v53, %v972_v20  ;;  %v976_v18 = vmul.f32 %v5204_v46, %v960_v17  ;;  %v978_v2 = vmul.f32 %v5204_v46, %v962_v29  ;;  %v4629_v46 = vld [vmem:[%s7512_s2 + $0x4c] sm:$0xff]   ;;  %v7554_v33 = vmov 3  }
 0x1fd   : > { %v987_v0 = vpack.c.bf16 %v979_v15, %v977_v45  ;;  %v1467_v16 = vunpack.c.h.bf16 %v4629_v46  ;;  %v1683_v35 = vunpack.c.l.bf16 %v4633_v61  ;;  %v1684_v41 = vunpack.c.h.bf16 %v4633_v61 }
 0x1fe   : > { %v986_v30 = vpack.c.bf16 %v978_v2, %v976_v18  ;;  %v1686_v1 = vunpack.c.h.bf16 %v6035_v47  ;;  %v7641_v53 = vmov 1  }
 0x1ff   : > { %1072 = vmatpush1.bf16.msra.mxu1 %v982_v11  ;;  %v6041_v11 = vld [vmem:[%s7512_s2 + $0x6c] sm:$0xff]  }
 0x200   : > { %1073 = vmatprep.subr.bf16.mxu1 %v985_v4  ;;  %v1688_v20 = vunpack.c.h.bf16 %v6041_v11  ;;  %v4862_v4 = vpop.permute.xlu1 %4861 }
 0x201   : > { %v4863_v45 = vunpack.i.l.bf16 %v4862_v4  ;;  %v4864_v17 = vunpack.i.h.bf16 %v4862_v4 }
 0x203   : > { %1074 = vmatpush1.bf16.msra.mxu1 %v984_v50 }
 0x204   : > { %1075 = vmatprep.subr.bf16.mxu1 %v987_v0 }
 0x207   : > { %1076 = vmatpush1.bf16.msra.mxu1 %v986_v30 }
 0x20a   : > { %4624 = vmatmul.mubr.msk.bf16.vlgmr.msra.gmra.mrb[0].mxu1 %vm1056_vm6, %v5587_v3 }
 0x20b   : > { %1111 = vmatprep.mubr.bf16.mxu1 %v7638_v22 }
 0x212   : > { %4625 = vmatmul.mubr.msk.bf16.gmra.mrb[4].mxu1 %vm1056_vm6, %v5761_v31  ;;  %v1466_v31 = vunpack.c.l.bf16 %v4629_v46 }
 0x213   : > { %1121 = vmatprep.mubr.bf16.mxu1 %v7638_v22 }
 0x214   : > { %v4887_v8 = vpack.i.bf16 %v1467_v16, %v1466_v31 }
 0x216   : > { %4888 = vperm.xlu1 %4886, %v4887_v8   ;;  %4882 = vperm.xlu0 %4880, %v4887_v8  }
 0x21a   : > { %4626 = vmatmul.mubr.msk.bf16.gmra.mrb[8].mxu1 %vm1056_vm6, %v5588_v57  ;;  %4892 = vset.pattern.permute.xlu1 %v7639_v36 }
 0x21b   : > { %1131 = vmatprep.mubr.bf16.mxu1 %v7638_v22  ;;  %4894 = vperm.xlu1 %4892, %v4887_v8  }
 0x21c   : > { %4898 = vset.pattern.permute.xlu0 %v7554_v33 }
 0x21d   : > { %4900 = vperm.xlu0 %4898, %v4887_v8  }
 0x21f   : > { %4904 = vset.pattern.permute.xlu1 %v7553_v24 }
 0x220   : > { %4906 = vperm.xlu1 %4904, %v4887_v8  }
 0x222   : > { %4627 = vmatmul.mubr.msk.bf16.gmra.mrb[12].mxu1 %vm1056_vm6, %v5773_v39  ;;  %v7640_v39 = vmov 64  }
 0x223   : > { %2180 = vmatprep.mubr.bf16.mxu1 %v7638_v22  ;;  %4916 = vset.pattern.permute.xlu0 %v7640_v39 }
 0x224   : > { %4910 = vset.pattern.permute.xlu1 %v7640_v39 }
 0x225   : > { %4912 = vperm.xlu1 %4910, %v4887_v8   ;;  %v4867_v8 = vpop.permute.xlu0 %4866 }
 0x229   : > { %1701 = vperm.xlu1 %4910, %v1683_v35  }
 0x22d   : > { %1706 = vperm.xlu1 %4910, %v1684_v41   ;;  %v4868_v41 = vunpack.i.l.bf16 %v4867_v8 }
 0x231   : > { %1716 = vperm.xlu1 %4910, %v1686_v1  }
 0x235   : > { %1726 = vperm.xlu1 %4910, %v1688_v20  }
 0x239   : > { %4928 = vset.pattern.permute.xlu1 %v7641_v53 }
 0x2dd   : > { %v1103_v15 = vpop.f32.mrb[0].mxu1 }
 0x2de   : > { %v6045_v29 = vadd.f32 %v4863_v45, %v1103_v15  ;;  %v1105_v50 = vpop.f32.mrb[1].mxu1 }
 0x2df   : > { %v6047_v18 = vadd.f32 %v4863_v45, %v1105_v50  ;;  %v1107_v2 = vpop.f32.mrb[2].mxu1 }
 0x2e0   : > { %v1142_v0 = vmul.f32 %v6045_v29, %v6045_v29  ;;  %v6051_v30 = vadd.f32 %v4864_v17, %v1107_v2  ;;  %v1109_v3 = vpop.f32.mrb[3].mxu1 }
 0x2e1   : > { %v1143_v57 = vmul.f32 %v6047_v18, %v6047_v18  ;;  %v6055_v46 = vadd.f32 %v4864_v17, %v1109_v3  ;;  %v4869_v17 = vunpack.i.h.bf16 %v4867_v8 }
 0x2e2   : > { %v1158_v31 = vmul.f32 %v1142_v0, %v6045_v29  ;;  %v1144_v16 = vmul.f32 %v6051_v30, %v6051_v30 }
 0x2e3   : > { %v1159_v61 = vmul.f32 %v1143_v57, %v6047_v18  ;;  %v1145_v35 = vmul.f32 %v6055_v46, %v6055_v46 }
 0x2e4   : > { %v1174_v1 = vmul.f32 0.044715, %v1158_v31  ;;  %v1160_v20 = vmul.f32 %v1144_v16, %v6051_v30 }
 0x2e5   : > { %v1175_v4 = vmul.f32 0.044715, %v1159_v61  ;;  %v1161_v45 = vmul.f32 %v1145_v35, %v6055_v46  ;;  %v1113_v15 = vpop.f32.mrb[4].mxu1 }
 0x2e6   : > { %v1190_v50 = vadd.f32 %v1174_v1, %v6045_v29  ;;  %v1176_v2 = vmul.f32 0.044715, %v1160_v20  ;;  %v6066_v0 = vadd.f32 %v4868_v41, %v1113_v15  ;;  %v1115_v3 = vpop.f32.mrb[5].mxu1  ;;  %v4872_v1 = vpop.permute.xlu1 %4871 }
 0x2e7   : > { %v1191_v57 = vadd.f32 %v1175_v4, %v6047_v18  ;;  %v1177_v24 = vmul.f32 0.044715, %v1161_v45  ;;  %v6069_v33 = vadd.f32 %v4868_v41, %v1115_v3  ;;  %v1117_v53 = vpop.f32.mrb[6].mxu1  ;;  %v6084_v3 = vpop.permute.xlu0 %4876  ;;  %v4873_v44 = vunpack.i.l.bf16 %v4872_v1 }
 0x2e8   : > { %v1206_v31 = vmul.f32 0.7978846, %v1190_v50  ;;  %v1192_v16 = vadd.f32 %v1176_v2, %v6051_v30  ;;  %v1146_v61 = vmul.f32 %v6066_v0, %v6066_v0  ;;  %v6074_v35 = vadd.f32 %v4869_v17, %v1117_v53  ;;  %v1119_v8 = vpop.f32.mrb[7].mxu1 }
 0x2e9   : > { %v1207_v20 = vmul.f32 0.7978846, %v1191_v57  ;;  %v1193_v15 = vadd.f32 %v1177_v24, %v6055_v46  ;;  %v1147_v4 = vmul.f32 %v6069_v33, %v6069_v33  ;;  %v6079_v45 = vadd.f32 %v4869_v17, %v1119_v8 }
 0x2ea   : > { %5207 = vtanh.f32 %v1206_v31  ;;  %v1208_v41 = vmul.f32 0.7978846, %v1192_v16  ;;  %v1162_v50 = vmul.f32 %v1146_v61, %v6066_v0  ;;  %v1148_v2 = vmul.f32 %v6074_v35, %v6074_v35 }
 0x2eb   : > { %5209 = vtanh.f32 %v1207_v20  ;;  %v1209_v53 = vmul.f32 0.7978846, %v1193_v15  ;;  %v1163_v57 = vmul.f32 %v1147_v4, %v6069_v33  ;;  %v1149_v24 = vmul.f32 %v6079_v45, %v6079_v45 }
 0x2ec   : > { %5211 = vtanh.f32 %v1208_v41  ;;  %v1178_v17 = vmul.f32 0.044715, %v1162_v50  ;;  %v1164_v31 = vmul.f32 %v1148_v2, %v6074_v35  ;;  %v4874_v16 = vunpack.i.h.bf16 %v4872_v1 }
 0x2ed   : > { %v1179_v8 = vmul.f32 0.044715, %v1163_v57  ;;  %v1165_v61 = vmul.f32 %v1149_v24, %v6079_v45  ;;  %v1123_v19 = vpop.f32.mrb[8].mxu1  ;;  %5213 = vtanh.f32 %v1209_v53 }
 0x2ee   : > { %v1194_v20 = vadd.f32 %v1178_v17, %v6066_v0  ;;  %v1180_v15 = vmul.f32 0.044715, %v1164_v31  ;;  %v6093_v26 = vadd.f32 %v4873_v44, %v1123_v19  ;;  %v1125_v4 = vpop.f32.mrb[9].mxu1 }
 0x2ef   : > { %v1195_v38 = vadd.f32 %v1179_v8, %v6069_v33  ;;  %v1181_v41 = vmul.f32 0.044715, %v1165_v61  ;;  %v6096_v50 = vadd.f32 %v4873_v44, %v1125_v4  ;;  %v1127_v2 = vpop.f32.mrb[10].mxu1 }
 0x2f0   : > { %v1210_v1 = vmul.f32 0.7978846, %v1194_v20  ;;  %v1196_v57 = vadd.f32 %v1180_v15, %v6074_v35  ;;  %v1150_v24 = vmul.f32 %v6093_v26, %v6093_v26  ;;  %v6101_v6 = vadd.f32 %v4874_v16, %v1127_v2  ;;  %v1129_v17 = vpop.f32.mrb[11].mxu1 }
 0x2f1   : > { %v1211_v31 = vmul.f32 0.7978846, %v1195_v38  ;;  %v1197_v19 = vadd.f32 %v1181_v41, %v6079_v45  ;;  %v1151_v53 = vmul.f32 %v6096_v50, %v6096_v50  ;;  %v6106_v8 = vadd.f32 %v4874_v16, %v1129_v17 }
 0x2f2   : > { %5215 = vtanh.f32 %v1210_v1  ;;  %v1212_v44 = vmul.f32 0.7978846, %v1196_v57  ;;  %v1166_v61 = vmul.f32 %v1150_v24, %v6093_v26  ;;  %v1152_v20 = vmul.f32 %v6101_v6, %v6101_v6 }
 0x2f3   : > { %5217 = vtanh.f32 %v1211_v31  ;;  %v1213_v15 = vmul.f32 0.7978846, %v1197_v19  ;;  %v1167_v4 = vmul.f32 %v1151_v53, %v6096_v50  ;;  %v1153_v38 = vmul.f32 %v6106_v8, %v6106_v8 }
 0x2f4   : > { %v5208_v41 = vpop.eup %5207  ;;  %v4878_v2 = vunpack.i.l.bf16 %v6084_v3  ;;  %5219 = vtanh.f32 %v1212_v44  ;;  %v1182_v16 = vmul.f32 0.044715, %v1166_v61  ;;  %v1168_v1 = vmul.f32 %v1152_v20, %v6101_v6 }
 0x2f5   : > { %v5210_v57 = vpop.eup %5209  ;;  %v1238_v17 = vadd.f32 1.0, %v5208_v41  ;;  %5221 = vtanh.f32 %v1213_v15  ;;  %v1183_v24 = vmul.f32 0.044715, %v1167_v4  ;;  %v1169_v25 = vmul.f32 %v1153_v38, %v6106_v8  ;;  %v1133_v31 = vpop.f32.mrb[12].mxu1 }
 0x2f6   : > { %v5212_v19 = vpop.eup %5211  ;;  %v1198_v53 = vadd.f32 %v1182_v16, %v6093_v26  ;;  %v1184_v37 = vmul.f32 0.044715, %v1168_v1  ;;  %v6118_v7 = vadd.f32 %v4878_v2, %v1133_v31  ;;  %v1135_v10 = vpop.f32.mrb[13].mxu1  ;;  %v1239_v9 = vadd.f32 1.0, %v5210_v57 }
 0x2f7   : > { %v1254_v14 = vmul.f32 0.5, %v1238_v17  ;;  %v1240_v44 = vadd.f32 1.0, %v5212_v19  ;;  %v1199_v61 = vadd.f32 %v1183_v24, %v6096_v50  ;;  %v1185_v20 = vmul.f32 0.044715, %v1169_v25  ;;  %v1137_v5 = vpop.f32.mrb[14].mxu1  ;;  %v5214_v1 = vpop.eup %5213 }
 0x2f8   : > { %v1214_v41 = vmul.f32 0.7978846, %v1198_v53  ;;  %v1200_v15 = vadd.f32 %v1184_v37, %v6101_v6  ;;  %v1154_v4 = vmul.f32 %v6118_v7, %v6118_v7  ;;  %v6124_v38 = vadd.f32 %v4878_v2, %v1135_v10  ;;  %v1139_v16 = vpop.f32.mrb[15].mxu1 }
 0x2f9   : > { %v1270_v31 = vmul.f32 %v1254_v14, %v6045_v29  ;;  %v1256_v13 = vmul.f32 0.5, %v1240_v44  ;;  %v1215_v57 = vmul.f32 0.7978846, %v1199_v61  ;;  %v1201_v17 = vadd.f32 %v1185_v20, %v6106_v8 }
 0x2fa   : > { %5223 = vtanh.f32 %v1214_v41  ;;  %v1216_v24 = vmul.f32 0.7978846, %v1200_v15  ;;  %v1170_v25 = vmul.f32 %v1154_v4, %v6118_v7  ;;  %v1155_v37 = vmul.f32 %v6124_v38, %v6124_v38 }
 0x2fb   : > { %v1272_v19 = vmul.f32 %v1256_v13, %v6051_v30  ;;  %5225 = vtanh.f32 %v1215_v57  ;;  %v1217_v10 = vmul.f32 0.7978846, %v1201_v17  ;;  %v7642_v2 = vunpack.i.h.bf16 %v6084_v3 }
 0x2fc   : > { %v5216_v14 = vpop.eup %5215  ;;  %5227 = vtanh.f32 %v1216_v24  ;;  %v1186_v29 = vmul.f32 0.044715, %v1170_v25  ;;  %v1171_v44 = vmul.f32 %v1155_v37, %v6124_v38  ;;  %v1241_v30 = vadd.f32 1.0, %v5214_v1 }
 0x2fd   : > { %v6134_v53 = vadd.f32 %v7642_v2, %v1137_v5  ;;  %v7643_v61 = vmov %v7642_v2  ;;  %v5218_v41 = vpop.eup %5217  ;;  %v1242_v15 = vadd.f32 1.0, %v5216_v14  ;;  %5229 = vtanh.f32 %v1217_v10 }
 0x2fe   : > { %v6139_v20 = vadd.f32 %v7643_v61, %v1139_v16  ;;  %v5220_v4 = vpop.eup %5219  ;;  %v1202_v5 = vadd.f32 %v1186_v29, %v6118_v7  ;;  %v1187_v57 = vmul.f32 0.044715, %v1171_v44  ;;  %v1255_v24 = vmul.f32 0.5, %v1239_v9 }
 0x2ff   : > { %v1156_v13 = vmul.f32 %v6134_v53, %v6134_v53  ;;  %v5222_v25 = vpop.eup %5221  ;;  %v1258_v37 = vmul.f32 0.5, %v1242_v15  ;;  %v1244_v3 = vadd.f32 1.0, %v5220_v4  ;;  %v1257_v2 = vmul.f32 0.5, %v1241_v30 }
 0x300   : > { %v1157_v17 = vmul.f32 %v6139_v20, %v6139_v20  ;;  %v1218_v14 = vmul.f32 0.7978846, %v1202_v5  ;;  %v1203_v10 = vadd.f32 %v1187_v57, %v6124_v38  ;;  %v1271_v1 = vmul.f32 %v1255_v24, %v6047_v18 }
 0x301   : > { %v1172_v16 = vmul.f32 %v1156_v13, %v6134_v53  ;;  %v1274_v29 = vmul.f32 %v1258_v37, %v6066_v0  ;;  %v1260_v44 = vmul.f32 0.5, %v1244_v3  ;;  %v1273_v40 = vmul.f32 %v1257_v2, %v6055_v46 }
 0x302   : > { %v1173_v61 = vmul.f32 %v1157_v17, %v6139_v20  ;;  %5231 = vtanh.f32 %v1218_v14  ;;  %v1219_v9 = vmul.f32 0.7978846, %v1203_v10  ;;  %v1287_v4 = vadd.f32 %v1271_v1, %v5878_v55 }
 0x303   : > { %v1188_v42 = vmul.f32 0.044715, %v1172_v16  ;;  %v1276_v13 = vmul.f32 %v1260_v44, %v6074_v35  ;;  %v1289_v5 = vadd.f32 %v1273_v40, %v5881_v56  ;;  %v1286_v57 = vadd.f32 %v1270_v31, %v5871_v51 }
 0x304   : > { %v1189_v15 = vmul.f32 0.044715, %v1173_v61  ;;  %v5224_v18 = vpop.eup %5223  ;;  %5233 = vtanh.f32 %v1219_v9  ;;  %v1288_v17 = vadd.f32 %v1272_v19, %v5874_v52  ;;  %v1243_v46 = vadd.f32 1.0, %v5218_v41 }
 0x305   : > { %v1204_v30 = vadd.f32 %v1188_v42, %v6134_v53  ;;  %v5226_v24 = vpop.eup %5225  ;;  %v1246_v37 = vadd.f32 1.0, %v5224_v18  ;;  %v1303_v16 = vpack.c.bf16 %v1289_v5, %v1287_v4  ;;  %v1245_v55 = vadd.f32 1.0, %v5222_v25 }
 0x306   : > { %v1205_v0 = vadd.f32 %v1189_v15, %v6139_v20  ;;  %v5228_v2 = vpop.eup %5227  ;;  %v1302_v14 = vpack.c.bf16 %v1288_v17, %v1286_v57  ;;  %v1259_v42 = vmul.f32 0.5, %v1243_v46  ;;  %v1290_v40 = vadd.f32 %v1274_v29, %v5884_v58 }
 0x307   : > { %v1220_v3 = vmul.f32 0.7978846, %v1204_v30  ;;  %v5230_v56 = vpop.eup %5229  ;;  %v1262_v51 = vmul.f32 0.5, %v1246_v37  ;;  %v1248_v31 = vadd.f32 1.0, %v5228_v2  ;;  %1319 = vmatprep.subr.bf16.mxu0 %v1303_v16  ;;  %v1261_v10 = vmul.f32 0.5, %v1245_v55 }
 0x308   : > { %v1221_v35 = vmul.f32 0.7978846, %v1205_v0  ;;  %1320 = vmatpush1.bf16.msra.mxu0 %v1302_v14  ;;  %v1275_v52 = vmul.f32 %v1259_v42, %v6069_v33  ;;  %v1292_v19 = vadd.f32 %v1276_v13, %v5912_v21  ;;  %v1247_v41 = vadd.f32 1.0, %v5226_v24 }
 0x309   : > { %5235 = vtanh.f32 %v1220_v3  ;;  %v1278_v25 = vmul.f32 %v1262_v51, %v6093_v26  ;;  %v1264_v61 = vmul.f32 0.5, %v1248_v31  ;;  %v1277_v1 = vmul.f32 %v1261_v10, %v6079_v45 }
 0x30a   : > { %5237 = vtanh.f32 %v1221_v35  ;;  %v1249_v44 = vadd.f32 1.0, %v5230_v56  ;;  %v1304_v58 = vpack.c.bf16 %v1292_v19, %v1290_v40  ;;  %v1263_v29 = vmul.f32 0.5, %v1247_v41 }
 0x30b   : > { %v1280_v9 = vmul.f32 %v1264_v61, %v6101_v6  ;;  %v1291_v15 = vadd.f32 %v1275_v52, %v5889_v63  ;;  %v1293_v4 = vadd.f32 %v1277_v1, %v5919_v48  ;;  %v1294_v21 = vadd.f32 %v1278_v25, %v5928_v27 }
 0x30c   : > { %v1265_v30 = vmul.f32 0.5, %v1249_v44  ;;  %v5232_v5 = vpop.eup %5231  ;;  %v1279_v33 = vmul.f32 %v1263_v29, %v6096_v50 }
 0x30d   : > { %v1250_v13 = vadd.f32 1.0, %v5232_v5  ;;  %v1305_v26 = vpack.c.bf16 %v1293_v4, %v1291_v15  ;;  %v1296_v45 = vadd.f32 %v1280_v9, %v5939_v43 }
 0x30e   : > { %v1281_v57 = vmul.f32 %v1265_v30, %v6106_v8  ;;  %v5234_v18 = vpop.eup %5233  ;;  %v1295_v6 = vadd.f32 %v1279_v33, %v5933_v54 }
 0x30f   : > { %1321 = vmatprep.subr.bf16.mxu0 %v1305_v26  ;;  %v1306_v0 = vpack.c.bf16 %v1296_v45, %v1294_v21  ;;  %v1251_v48 = vadd.f32 1.0, %v5234_v18  ;;  %v1266_v17 = vmul.f32 0.5, %v1250_v13 }
 0x310   : > { %v1297_v63 = vadd.f32 %v1281_v57, %v5945_v49  ;;  %1322 = vmatpush1.bf16.msra.mxu0 %v1304_v58 }
 0x311   : > { %v1267_v24 = vmul.f32 0.5, %v1251_v48  ;;  %v1282_v8 = vmul.f32 %v1266_v17, %v6118_v7  ;;  %v6203_v17 = vld [vmem:[%s7512_s2 + $0x54] sm:$0xff]  }
 0x312   : > { %v1307_v50 = vpack.c.bf16 %v1297_v63, %v1295_v6 }
 0x313   : > { %v5236_v46 = vpop.eup %5235  ;;  %v1283_v54 = vmul.f32 %v1267_v24, %v6124_v38  ;;  %v1298_v2 = vadd.f32 %v1282_v8, %v5964_v62  ;;  %v5589_v38 = vld [vmem:[%s7512_s2 + $0x48] sm:$0xf]  ;;  %v1314_v62 = vpop.permute.xlu1 %1313  ;;  %v4799_v24 = vld [vmem:[%s7512_s2 + $0x98] sm:$0xff]  }
 0x314   : > { %v5238_v27 = vpop.eup %5237  ;;  %v1252_v37 = vadd.f32 1.0, %v5236_v46  ;;  %1323 = vmatprep.subr.bf16.mxu0 %v1307_v50  ;;  %v1681_v46 = vunpack.c.l.bf16 %v6203_v17  ;;  %v1682_v50 = vunpack.c.h.bf16 %v6203_v17 }
 0x315   : > { %v1253_v3 = vadd.f32 1.0, %v5238_v27  ;;  %1324 = vmatpush1.bf16.msra.mxu0 %v1306_v0  ;;  %v1299_v14 = vadd.f32 %v1283_v54, %v5968_v23  ;;  %v4797_v27 = vunpack.c.l.bf16 %v4799_v24 }
 0x316   : > { %v1268_v43 = vmul.f32 0.5, %v1252_v37  ;;  %v4798_v37 = vunpack.c.h.bf16 %v4799_v24 }
 0x317   : > { %v1269_v16 = vmul.f32 0.5, %v1253_v3  ;;  %v4917_v3 = vpack.i.bf16 %v1682_v50, %v1681_v46  ;;  %v7645_v46 = vld [vmem:[#allocation7_spill] sm:$0xff] }
 0x318   : > { %v1284_v49 = vmul.f32 %v1268_v43, %v6134_v53  ;;  %v4929_v8 = vpack.i.bf16 %v4798_v37, %v4797_v27  ;;  %v1685_v43 = vunpack.c.l.bf16 %v6035_v47 }
 0x319   : > { %v1285_v55 = vmul.f32 %v1269_v16, %v6139_v20  ;;  %4918 = vperm.xlu0 %4916, %v4917_v3   ;;  %v1687_v16 = vunpack.c.l.bf16 %v6041_v11 }
 0x31a   : > { %v1300_v35 = vadd.f32 %v1284_v49, %v5974_v28  ;;  %4930 = vperm.xlu1 %4928, %v4929_v8  }
 0x31b   : > { %v1301_v42 = vadd.f32 %v1285_v55, %v5980_v12 }
 0x31c   : > { %v1308_v7 = vpack.c.bf16 %v1300_v35, %v1298_v2 }
 0x31d   : > { %v1309_v40 = vpack.c.bf16 %v1301_v42, %v1299_v14  ;;  %1711 = vperm.xlu0 %4916, %v1685_v43  }
 0x31e   : > { %4934 = vset.pattern.permute.xlu1 %v7639_v36 }
 0x31f   : > { %1325 = vmatprep.subr.bf16.mxu0 %v1309_v40  ;;  %4936 = vperm.xlu1 %4934, %v4929_v8  }
 0x320   : > { %1326 = vmatpush1.bf16.msra.mxu0 %v1308_v7 }
 0x321   : > { %1721 = vperm.xlu0 %4916, %v1687_v16  }
 0x323   : > { %4628 = vmatmul.mubr.msk.bf16.vlgmr.msra.gmra.mrb[16].mxu0 %vm1056_vm6, %v5589_v38  ;;  %4946 = vset.pattern.permute.xlu1 %v7640_v39 }
 0x324   : > { %1793 = vmatprep.mubr.bf16.mxu0 %v7638_v22 }
 0x325   : > { %4922 = vset.pattern.permute.xlu0 %v7638_v22 }
 0x326   : > { %4924 = vperm.xlu0 %4922, %v4929_v8  }
 0x32a   : > { %4940 = vset.pattern.permute.xlu0 %v7640_v39 }
 0x32b   : > { %4942 = vperm.xlu0 %4940, %v4929_v8  }
 0x3f6   : > { %v1353_v23 = vpop.f32.mrb[16].mxu0 }
 0x3f7   : > { %v1354_v28 = vadd.f32 %v1353_v23, %v1314_v62  ;;  %v1355_v12 = vpop.f32.mrb[17].mxu0 }
 0x3f8   : > { %v1356_v53 = vadd.f32 %v1355_v12, %v1314_v62  ;;  %v1357_v20 = vpop.f32.mrb[18].mxu0 }
 0x3f9   : > { %v1360_v56 = vmul.f32 %v1354_v28, %v1354_v28  ;;  %v1358_v51 = vpop.f32.mrb[19].mxu0 }
 0x3fa   : > { %v1361_v31 = vmul.f32 %v1356_v53, %v1356_v53 }
 0x3fb   : > { %v1363_v10 = vsel %vm1362_vm7, %v1360_v56, 0.0 }
 0x3fc   : > { %v1364_v52 = vrot.slane %v1363_v10, 4  ;;  %v1370_v19 = vsel %vm1362_vm7, %v1361_v31, 0.0 }
 0x3fd   : > { %v1371_v41 = vrot.slane %v1370_v19, 4 }
 0x3fe   : > { %v1365_v25 = vadd.f32 %v1364_v52, %v1363_v10 }
 0x3ff   : > { %v1372_v61 = vadd.f32 %v1371_v41, %v1370_v19  ;;  %v6236_v41 = vld [vmem:[%s7512_s2 + $0xa8] sm:$0xff]  }
 0x400   : > { %v1366_v1 = vrot.slane %v1365_v25, 2 }
 0x401   : > { %v1373_v44 = vrot.slane %v1372_v61, 2 }
 0x402   : > { %v1367_v58 = vadd.f32 %v1366_v1, %v1365_v25 }
 0x403   : > { %v1374_v29 = vadd.f32 %v1373_v44, %v1372_v61 }
 0x404   : > { %v1368_v9 = vrot.slane %v1367_v58, 1 }
 0x405   : > { %v1375_v15 = vrot.slane %v1374_v29, 1 }
 0x406   : > { %v1369_v4 = vadd.f32 %v1368_v9, %v1367_v58  ;;  %v2560_v9 = vunpack.c.h.bf16 %v6236_v41 }
 0x407   : > { %v1376_v30 = vadd.f32 %v1375_v15, %v1374_v29 }
 0x408   : > { %5239 = vrsqrt.f32 %v1369_v4  ;;  %vm1379_vm8 = vcmp.eq.f32.partialorder %v1369_v4, inf  ;;  %v1382_v13 = vand.u32 2147483648, %v1369_v4  ;;  %vm1381_vm9 = vcmp.eq.f32.partialorder %v1369_v4, 0.0  ;;  %2582 = vperm.xlu0 %4940, %v2560_v9  }
 0x409   : > { %5241 = vrsqrt.f32 %v1376_v30  ;;  %vm1386_vm10 = vcmp.eq.f32.partialorder %v1376_v30, inf  ;;  %v1389_v45 = vand.u32 2147483648, %v1376_v30  ;;  %vm1388_vm11 = vcmp.eq.f32.partialorder %v1376_v30, 0.0 }
 0x412   : > { %v5240_v5 = vpop.eup %5239 }
 0x413   : > { %v5242_v33 = vpop.eup %5241  ;;  %v1378_v21 = vmul.f32 %v5240_v5, %v1369_v4 }
 0x414   : > { %v1385_v26 = vmul.f32 %v5242_v33, %v1376_v30 }
 0x415   : > { %v1380_v57 = vsel %vm1379_vm8, %v1369_v4, %v1378_v21 }
 0x416   : > { %v1383_v18 = vsel %vm1381_vm9, %v1382_v13, %v1380_v57  ;;  %v1387_v6 = vsel %vm1386_vm10, %v1376_v30, %v1385_v26  ;;  %v6243_v30 = vld [vmem:[%s7512_s2 + $0xb0] sm:$0xff]  }
 0x417   : > { %v1391_v63 = vmax.f32 %v1383_v18, 1e-12  ;;  %v1390_v0 = vsel %vm1388_vm11, %v1389_v45, %v1387_v6  ;;  %v2562_v45 = vunpack.c.h.bf16 %v6243_v30  ;;  %v6251_v18 = vld [vmem:[%s7512_s2 + $0xb8] sm:$0xff]  }
 0x418   : > { %v1392_v48 = vmax.f32 %v1390_v0, 1e-12  ;;  %v4641_v6 = vld [vmem:[%s7512_s2 + $0x7c] sm:$0xff]   ;;  %v2564_v3 = vunpack.c.h.bf16 %v6251_v18 }
 0x419   : > { %5243 = vrcp.f32 %v1391_v63  ;;  %v7644_v63 = vld [vmem:[#allocation6_spill] sm:$0xff]  ;;  %v2070_v8 = vunpack.c.l.bf16 %v4641_v6  ;;  %2592 = vperm.xlu0 %4940, %v2562_v45  }
 0x41a   : > { %5245 = vrcp.f32 %v1392_v48 }
 0x41d   : > { %2602 = vperm.xlu0 %4940, %v2564_v3  }
 0x423   : > { %v5244_v54 = vpop.eup %5243 }
 0x424   : > { %v5246_v49 = vpop.eup %5245  ;;  %v6213_v55 = vmul.f32 %v5244_v54, %v1354_v28 }
 0x425   : > { %v6215_v2 = vmul.f32 %v5246_v49, %v1356_v53  ;;  %v2071_v49 = vunpack.c.h.bf16 %v4641_v6 }
 0x426   : > { %v1417_v35 = vsel %vm1362_vm7, %v6213_v55, 0.0  ;;  %v1433_v47 = vmul.f32 %v6213_v55, %v6213_v55  ;;  %v4396_v14 = vrot.slane %v6213_v55, 5 }
 0x427   : > { %v1418_v11 = vrot.slane %v1417_v35, 4  ;;  %v1424_v42 = vsel %vm1362_vm7, %v6215_v2, 0.0  ;;  %v1434_v7 = vmul.f32 %v6215_v2, %v6215_v2  ;;  %v4397_v40 = vrot.slane %v6215_v2, 5 }
 0x428   : > { %v1435_v38 = vsel %vm1362_vm7, %v1433_v47, 0.0  ;;  %v1425_v62 = vrot.slane %v1424_v42, 4  ;;  %4400 = vst [vmem:[%s6192_s20] sm:$0x18] %v4396_v14  ;;  %v4645_v47 = vld [vmem:[%s7512_s2 + $0x8c] sm:$0xff]  }
 0x429   : > { %v1419_v23 = vadd.f32 %v1418_v11, %v1417_v35  ;;  %v1436_v28 = vrot.slane %v1435_v38, 4  ;;  %v1442_v12 = vsel %vm1362_vm7, %v1434_v7, 0.0  ;;  %4401 = vst [vmem:[%s6192_s20 + $0x8] sm:$0x18] %v4397_v40  ;;  %v6262_v11 = vpop.permute.xlu1 %4888  ;;  %v4957_v40 = vpack.i.bf16 %v2071_v49, %v2070_v8  ;;  %v7647_v8 = vld [vmem:[#allocation8_spill] sm:$0xff] }
 0x42a   : > { %v1426_v53 = vadd.f32 %v1425_v62, %v1424_v42  ;;  %v1443_v20 = vrot.slane %v1442_v12, 4  ;;  %v2075_v62 = vunpack.c.h.bf16 %v4645_v47  ;;  %v4891_v9 = vunpack.i.h.bf16 %v6262_v11 }
 0x42b   : > { %v1420_v56 = vrot.slane %v1419_v23, 2  ;;  %v1437_v51 = vadd.f32 %v1436_v28, %v1435_v38  ;;  %v2074_v38 = vunpack.c.l.bf16 %v4645_v47  ;;  %v4693_v28 = vld [vmem:[%s7512_s2 + $0xc8] sm:$0xff]   ;;  %4958 = vperm.xlu0 %4940, %v4957_v40  }
 0x42c   : > { %v1427_v31 = vrot.slane %v1426_v53, 2  ;;  %v1444_v10 = vadd.f32 %v1443_v20, %v1442_v12  ;;  %v7650_v40 = vld [vmem:[#allocation11_spill] sm:$0xff] }
 0x42d   : > { %v1421_v52 = vadd.f32 %v1420_v56, %v1419_v23  ;;  %v1438_v19 = vrot.slane %v1437_v51, 2  ;;  %v4967_v20 = vpack.i.bf16 %v2075_v62, %v2074_v38  ;;  %v2946_v56 = vunpack.c.l.bf16 %v4693_v28 }
 0x42e   : > { %v1428_v25 = vadd.f32 %v1427_v31, %v1426_v53  ;;  %v1445_v61 = vrot.slane %v1444_v10, 2  ;;  %v6267_v53 = vpop.permute.xlu1 %4894  ;;  %v4697_v31 = vld [vmem:[%s7512_s2 + $0xd8] sm:$0xff]  }
 0x42f   : > { %v1422_v1 = vrot.slane %v1421_v52, 1  ;;  %v1439_v44 = vadd.f32 %v1438_v19, %v1437_v51  ;;  %v2947_v51 = vunpack.c.h.bf16 %v4693_v28  ;;  %4968 = vperm.xlu0 %4940, %v4967_v20   ;;  %v2950_v19 = vunpack.c.l.bf16 %v4697_v31 }
 0x430   : > { %v1429_v58 = vrot.slane %v1428_v25, 1  ;;  %v1446_v29 = vadd.f32 %v1445_v61, %v1444_v10  ;;  %v6272_v10 = vpop.permute.xlu0 %4882 }
 0x431   : > { %v1423_v15 = vadd.f32 %v1422_v1, %v1421_v52  ;;  %v1440_v4 = vrot.slane %v1439_v44, 1  ;;  %v4977_v52 = vpack.i.bf16 %v2947_v51, %v2946_v56  ;;  %v4884_v49 = vunpack.i.l.bf16 %v6272_v10 }
 0x432   : > { %v1430_v5 = vadd.f32 %v1429_v58, %v1428_v25  ;;  %v1447_v33 = vrot.slane %v1446_v29, 1  ;;  %v2951_v25 = vunpack.c.h.bf16 %v4697_v31  ;;  %v4907_v61 = vpop.permute.xlu1 %4906 }
 0x433   : > { %v1431_v21 = vadd.f32 %v1423_v15, %v5763_v32  ;;  %v1441_v13 = vadd.f32 %v1440_v4, %v1439_v44  ;;  %4978 = vperm.xlu0 %4940, %v4977_v52  }
 0x434   : > { %v1432_v26 = vadd.f32 %v1430_v5, %v5765_v34  ;;  %v1448_v57 = vadd.f32 %v1447_v33, %v1446_v29  ;;  %v4901_v44 = vpop.permute.xlu0 %4900  ;;  %v4987_v58 = vpack.i.bf16 %v2951_v25, %v2950_v19  ;;  %v4890_v5 = vunpack.i.l.bf16 %v6262_v11 }
 0x435   : > { %v1449_v0 = vadd.f32 %v1441_v13, %v7644_v63  ;;  %v1452_v48 = vmul.f32 0.2, %v1431_v21  ;;  %v4909_v33 = vunpack.i.h.bf16 %v4907_v61  ;;  %v4908_v21 = vunpack.i.l.bf16 %v4907_v61 }
 0x436   : > { %v1450_v50 = vadd.f32 %v1448_v57, %v7645_v46  ;;  %v1453_v24 = vmul.f32 0.2, %v1432_v26  ;;  %v4903_v6 = vunpack.i.h.bf16 %v4901_v44 }
 0x437   : > { %v1454_v27 = vmul.f32 0.2, %v1449_v0  ;;  %v1456_v37 = vmul.f32 %v1452_v48, %v1452_v48  ;;  %v1591_v1 = vsub.f32 %v6213_v55, %v1452_v48  ;;  %v4897_v55 = vunpack.i.h.bf16 %v6267_v53  ;;  %4988 = vperm.xlu0 %4940, %v4987_v58  }
 0x438   : > { %v1455_v43 = vmul.f32 0.2, %v1450_v50  ;;  %v1457_v16 = vmul.f32 %v1453_v24, %v1453_v24  ;;  %v1470_v54 = vcombine.low %v1452_v48, %v1453_v24  ;;  %v1592_v15 = vsub.f32 %v6215_v2, %v1453_v24  ;;  %v7646_v48 = vld [vmem:[#allocation12_spill] sm:$0xff] }
 0x439   : > { %v1458_v35 = vsub.f32 %v1454_v27, %v1456_v37  ;;  %v4896_v0 = vunpack.i.l.bf16 %v6267_v53  ;;  %v4913_v27 = vpop.permute.xlu1 %4912  ;;  %v4902_v37 = vunpack.i.l.bf16 %v4901_v44 }
 0x43a   : > { %v1459_v14 = vsub.f32 %v1455_v43, %v1457_v16  ;;  %v1472_v26 = vsub.f32 %v5742_v59, %v1470_v54  ;;  %v4915_v24 = vunpack.i.h.bf16 %v4913_v27  ;;  %v4914_v3 = vunpack.i.l.bf16 %v4913_v27 }
 0x43b   : > { %v1460_v42 = vmax.f32 %v1458_v35, 0.0  ;;  %v4885_v54 = vunpack.i.h.bf16 %v6272_v10  ;;  %4992 = vset.pattern.permute.xlu0 %v7638_v22 }
 0x43c   : > { %v1461_v7 = vmax.f32 %v1459_v14, 0.0  ;;  %v7648_v14 = vld [vmem:[#allocation13_spill] sm:$0xff] }
 0x43d   : > { %v1462_v23 = vadd.f32 1e-05, %v1460_v42  ;;  %v7649_v42 = vld [vmem:[#allocation10_spill] sm:$0xff] }
 0x43e   : > { %v1463_v12 = vadd.f32 1e-05, %v1461_v7 }
 0x43f   : > { %5247 = vrsqrt.f32 %v1462_v23 }
 0x440   : > { %5249 = vrsqrt.f32 %v1463_v12  ;;  %v7651_v12 = vld [vmem:[#allocation9_spill] sm:$0xff] }
 0x449   : > { %v5248_v29 = vpop.eup %5247 }
 0x44a   : > { %v5250_v4 = vpop.eup %5249  ;;  %v1593_v13 = vmul.f32 %v5248_v29, %v1591_v1 }
 0x44b   : > { %v1475_v57 = vcombine.low %v5248_v29, %v5250_v4  ;;  %v1594_v45 = vmul.f32 %v5250_v4, %v1592_v15 }
 0x44c   : > { %v1626_v50 = vrot.slane %v1593_v13, %v7646_v48  ;;  %v1606_v43 = vrot.slane %v1593_v13, %v7647_v8 }
 0x44d   : > { %v1477_v2 = vmul.f32 %v1475_v57, %v1472_v26  ;;  %v1630_v16 = vrot.slane %v1594_v45, %v7646_v48  ;;  %v1610_v35 = vrot.slane %v1594_v45, %v7647_v8 }
 0x44e   : > { %v1631_v62 = vmul.f32 %v4908_v21, %v1626_v50  ;;  %v1633_v23 = vmul.f32 %v4909_v33, %v1626_v50  ;;  %v1611_v51 = vmul.f32 %v4902_v37, %v1606_v43  ;;  %v1613_v31 = vmul.f32 %v4903_v6, %v1606_v43 }
 0x44f   : > { %v1522_v47 = vrot.slane %v1477_v2, %v7646_v48  ;;  %v1526_v11 = vrot.slane %v1477_v2, %v7648_v14  ;;  %v1556_v7 = vrot.slane %v1477_v2, %v7649_v42  ;;  %v1560_v38 = vrot.slane %v1477_v2, %v7650_v40 }
 0x450   : > { %v1492_v28 = vrot.slane %v1477_v2, %v7647_v8  ;;  %v1496_v53 = vrot.slane %v1477_v2, %v7651_v12  ;;  %v1632_v29 = vmul.f32 %v4908_v21, %v1630_v16  ;;  %v1634_v15 = vmul.f32 %v4909_v33, %v1630_v16  ;;  %v7667_v12 = vld [vmem:[#allocation29_spill] sm:$0xff] }
 0x451   : > { %v1532_v20 = vrot.slane %v1522_v47, %v7646_v48  ;;  %v1536_v56 = vrot.slane %v1526_v11, %v7646_v48  ;;  %v1566_v10 = vrot.slane %v1556_v7, %v7649_v42  ;;  %v1570_v52 = vrot.slane %v1560_v38, %v7649_v42 }
 0x452   : > { %v1502_v19 = vrot.slane %v1492_v28, %v7647_v8  ;;  %v1506_v25 = vrot.slane %v1496_v53, %v7647_v8  ;;  %v1612_v4 = vmul.f32 %v4902_v37, %v1610_v35  ;;  %v1614_v13 = vmul.f32 %v4903_v6, %v1610_v35 }
 0x453   : > { %v1537_v61 = vmul.f32 %v4890_v5, %v1532_v20  ;;  %v1538_v1 = vmul.f32 %v4890_v5, %v1536_v56  ;;  %v1539_v44 = vmul.f32 %v4891_v9, %v1532_v20  ;;  %v1540_v58 = vmul.f32 %v4891_v9, %v1536_v56 }
 0x454   : > { %v1507_v26 = vmul.f32 %v4884_v49, %v1502_v19  ;;  %v1508_v57 = vmul.f32 %v4884_v49, %v1506_v25  ;;  %v1509_v45 = vmul.f32 %v4885_v54, %v1502_v19  ;;  %v1510_v50 = vmul.f32 %v4885_v54, %v1506_v25 }
 0x455   : > { %v1571_v27 = vmul.f32 %v4896_v0, %v1566_v10  ;;  %v1572_v2 = vmul.f32 %v4896_v0, %v1570_v52  ;;  %v1573_v43 = vmul.f32 %v4897_v55, %v1566_v10  ;;  %v1574_v47 = vmul.f32 %v4897_v55, %v1570_v52 }
 0x456   : > { %v1541_v11 = vadd.f32 %v1537_v61, %v1507_v26  ;;  %v1542_v7 = vadd.f32 %v1538_v1, %v1508_v57  ;;  %v1543_v38 = vadd.f32 %v1539_v44, %v1509_v45  ;;  %v1544_v28 = vadd.f32 %v1540_v58, %v1510_v50 }
 0x457   : > { %v1635_v21 = vadd.f32 %v1631_v62, %v1611_v51  ;;  %v1636_v33 = vadd.f32 %v1632_v29, %v1612_v4  ;;  %v1637_v37 = vadd.f32 %v1633_v23, %v1613_v31  ;;  %v1638_v6 = vadd.f32 %v1634_v15, %v1614_v13 }
 0x458   : > { %v1575_v53 = vadd.f32 %v1571_v27, %v1541_v11  ;;  %v1576_v5 = vadd.f32 %v1572_v2, %v1542_v7  ;;  %v1577_v20 = vadd.f32 %v1573_v43, %v1543_v38  ;;  %v1578_v9 = vadd.f32 %v1574_v47, %v1544_v28 }
 0x45a   : > { %v1587_v16 = vadd.f32 %v4914_v3, %v1575_v53  ;;  %v1588_v49 = vadd.f32 %v4914_v3, %v1576_v5  ;;  %v1589_v35 = vadd.f32 %v4915_v24, %v1577_v20  ;;  %v1590_v54 = vadd.f32 %v4915_v24, %v1578_v9 }
 0x45c   : > { %v1639_v56 = vadd.f32 %v1635_v21, %v1587_v16  ;;  %v1640_v0 = vadd.f32 %v1636_v33, %v1588_v49  ;;  %v1641_v10 = vadd.f32 %v1637_v37, %v1589_v35  ;;  %v1642_v55 = vadd.f32 %v1638_v6, %v1590_v54  ;;  %v5590_v49 = vld [vmem:[%s7512_s2 + $0x5c] sm:$0xff]   ;;  %v5591_v35 = vld [vmem:[%s7512_s2 + $0x64] sm:$0xff]   ;;  %v4919_v54 = vpop.permute.xlu0 %4918 }
 0x45e   : > { %v1643_v52 = vmul.f32 %v1639_v56, %v1639_v56  ;;  %v1644_v19 = vmul.f32 %v1640_v0, %v1640_v0  ;;  %v1645_v25 = vmul.f32 %v1641_v10, %v1641_v10  ;;  %v1646_v61 = vmul.f32 %v1642_v55, %v1642_v55 }
 0x460   : > { %v1647_v1 = vmul.f32 %v1643_v52, %v1639_v56  ;;  %v1649_v44 = vmul.f32 %v1645_v25, %v1641_v10  ;;  %v1648_v58 = vmul.f32 %v1644_v19, %v1640_v0  ;;  %v1650_v26 = vmul.f32 %v1646_v61, %v1642_v55  ;;  %v1702_v19 = vpop.permute.xlu1 %1701 }
 0x462   : > { %v1651_v62 = vmul.f32 0.044715, %v1647_v1  ;;  %v1653_v51 = vmul.f32 0.044715, %v1649_v44  ;;  %v1652_v23 = vmul.f32 0.044715, %v1648_v58 }
 0x463   : > { %v1654_v31 = vmul.f32 0.044715, %v1650_v26 }
 0x464   : > { %v1656_v29 = vadd.f32 %v1652_v23, %v1640_v0  ;;  %v1655_v3 = vadd.f32 %v1651_v62, %v1639_v56  ;;  %v1657_v15 = vadd.f32 %v1653_v51, %v1641_v10 }
 0x465   : > { %v1658_v24 = vadd.f32 %v1654_v31, %v1642_v55  ;;  %v1707_v31 = vpop.permute.xlu1 %1706 }
 0x466   : > { %v1660_v4 = vmul.f32 0.7978846, %v1656_v29  ;;  %v1659_v13 = vmul.f32 0.7978846, %v1655_v3  ;;  %v1661_v45 = vmul.f32 0.7978846, %v1657_v15 }
 0x467   : > { %v1662_v57 = vmul.f32 0.7978846, %v1658_v24 }
 0x468   : > { %5251 = vtanh.f32 %v1660_v4 }
 0x469   : > { %5253 = vtanh.f32 %v1662_v57 }
 0x46a   : > { %5255 = vtanh.f32 %v1659_v13 }
 0x46b   : > { %5257 = vtanh.f32 %v1661_v45 }
 0x472   : > { %v5252_v50 = vpop.eup %5251 }
 0x473   : > { %v5254_v27 = vpop.eup %5253  ;;  %v1668_v2 = vadd.f32 1.0, %v5252_v50 }
 0x474   : > { %v5256_v43 = vpop.eup %5255  ;;  %v1670_v47 = vadd.f32 1.0, %v5254_v27 }
 0x475   : > { %v5258_v11 = vpop.eup %5257  ;;  %v1672_v7 = vmul.f32 0.5, %v1668_v2  ;;  %v1667_v38 = vadd.f32 1.0, %v5256_v43  ;;  %v1712_v2 = vpop.permute.xlu0 %1711 }
 0x476   : > { %v1674_v28 = vmul.f32 0.5, %v1670_v47  ;;  %v1669_v53 = vadd.f32 1.0, %v5258_v11  ;;  %v1717_v47 = vpop.permute.xlu1 %1716 }
 0x477   : > { %v1676_v5 = vmul.f32 %v1672_v7, %v1640_v0  ;;  %v1671_v20 = vmul.f32 0.5, %v1667_v38  ;;  %v4921_v0 = vunpack.i.h.bf16 %v4919_v54 }
 0x478   : > { %v1678_v9 = vmul.f32 %v1674_v28, %v1642_v55  ;;  %v1673_v21 = vmul.f32 0.5, %v1669_v53 }
 0x479   : > { %v1675_v33 = vmul.f32 %v1671_v20, %v1639_v56  ;;  %v4920_v56 = vunpack.i.l.bf16 %v4919_v54 }
 0x47a   : > { %v1680_v37 = vpack.c.bf16 %v1678_v9, %v1676_v5  ;;  %v1677_v6 = vmul.f32 %v1673_v21, %v1641_v10 }
 0x47c   : > { %1761 = vmatprep.subr.bf16.mxu0 %v1680_v37  ;;  %v1679_v16 = vpack.c.bf16 %v1677_v6, %v1675_v33 }
 0x47e   : > { %1762 = vmatpush1.bf16.msra.mxu0 %v1679_v16 }
 0x481   : > { %4652 = vmatmul.mubr.msk.bf16.vlgmr.msra.gmra.mrb[20].mxu0 %vm652_vm5, %v6203_v17  ;;  %v5592_v17 = vld [vmem:[%s7512_s2 + $0x6c] sm:$0xff]  }
 0x482   : > { %1803 = vmatprep.mubr.bf16.mxu0 %v7638_v22 }
 0x489   : > { %4653 = vmatmul.mubr.msk.bf16.gmra.mrb[24].mxu0 %vm652_vm5, %v5590_v49 }
 0x48a   : > { %1813 = vmatprep.mubr.bf16.mxu0 %v7638_v22 }
 0x491   : > { %4654 = vmatmul.mubr.msk.bf16.gmra.mrb[28].mxu0 %vm652_vm5, %v5591_v35  ;;  %v1722_v35 = vpop.permute.xlu0 %1721 }
 0x492   : > { %1823 = vmatprep.mubr.bf16.mxu0 %v7638_v22 }
 0x499   : > { %4655 = vmatmul.mubr.msk.bf16.gmra.mrb[32].mxu0 %vm652_vm5, %v5592_v17 }
 0x49a   : > { %2430 = vmatprep.mubr.bf16.mxu0 %v7638_v22 }
 0x554   : > { %v1795_v10 = vpop.f32.mrb[20].mxu0 }
 0x555   : > { %v1796_v55 = vadd.f32 %v4920_v56, %v1795_v10  ;;  %v1797_v52 = vpop.f32.mrb[21].mxu0 }
 0x556   : > { %v1798_v25 = vadd.f32 %v4920_v56, %v1797_v52  ;;  %v1799_v61 = vpop.f32.mrb[22].mxu0 }
 0x557   : > { %v4656_v1 = vmul.f32 -1.442695, %v1796_v55  ;;  %v1800_v44 = vadd.f32 %v4921_v0, %v1799_v61  ;;  %v1801_v58 = vpop.f32.mrb[23].mxu0  ;;  %v4925_v61 = vpop.permute.xlu0 %4924 }
 0x558   : > { %v4657_v26 = vmul.f32 -1.442695, %v1798_v25  ;;  %v1802_v62 = vadd.f32 %v4921_v0, %v1801_v58  ;;  %v1727_v0 = vpop.permute.xlu1 %1726 }
 0x559   : > { %5259 = vpow2.f32 %v4656_v1  ;;  %v4658_v51 = vmul.f32 -1.442695, %v1800_v44 }
 0x55a   : > { %5261 = vpow2.f32 %v4657_v26  ;;  %v4659_v23 = vmul.f32 -1.442695, %v1802_v62 }
 0x55b   : > { %5263 = vpow2.f32 %v4658_v51 }
 0x55c   : > { %5265 = vpow2.f32 %v4659_v23  ;;  %v1805_v29 = vpop.f32.mrb[24].mxu0  ;;  %v4931_v26 = vpop.permute.xlu1 %4930 }
 0x55d   : > { %v1806_v3 = vadd.f32 %v1805_v29, %v1702_v19  ;;  %v1807_v15 = vpop.f32.mrb[25].mxu0  ;;  %v4932_v29 = vunpack.i.l.bf16 %v4931_v26 }
 0x55e   : > { %v1808_v24 = vadd.f32 %v1807_v15, %v1702_v19  ;;  %v1809_v4 = vpop.f32.mrb[26].mxu0 }
 0x55f   : > { %v4660_v13 = vmul.f32 -1.442695, %v1806_v3  ;;  %v1810_v57 = vadd.f32 %v1809_v4, %v1707_v31  ;;  %v1811_v45 = vpop.f32.mrb[27].mxu0 }
 0x560   : > { %v4661_v50 = vmul.f32 -1.442695, %v1808_v24  ;;  %v1812_v27 = vadd.f32 %v1811_v45, %v1707_v31 }
 0x561   : > { %5267 = vpow2.f32 %v4660_v13  ;;  %v4662_v43 = vmul.f32 -1.442695, %v1810_v57  ;;  %v4926_v13 = vunpack.i.l.bf16 %v4925_v61 }
 0x562   : > { %5269 = vpow2.f32 %v4661_v50  ;;  %v4663_v11 = vmul.f32 -1.442695, %v1812_v27 }
 0x563   : > { %v5260_v7 = vpop.eup %5259  ;;  %5271 = vpow2.f32 %v4662_v43 }
 0x564   : > { %v5262_v38 = vpop.eup %5261  ;;  %v1882_v28 = vadd.f32 1.0, %v5260_v7  ;;  %5273 = vpow2.f32 %v4663_v11  ;;  %v1815_v53 = vpop.f32.mrb[28].mxu0  ;;  %v4933_v11 = vunpack.i.h.bf16 %v4931_v26 }
 0x565   : > { %v5264_v5 = vpop.eup %5263  ;;  %v1883_v20 = vadd.f32 1.0, %v5262_v38  ;;  %v1816_v9 = vadd.f32 %v1815_v53, %v1712_v2  ;;  %v1817_v21 = vpop.f32.mrb[29].mxu0 }
 0x566   : > { %v5266_v33 = vpop.eup %5265  ;;  %5275 = vrcp.f32 %v1882_v28  ;;  %v1884_v37 = vadd.f32 1.0, %v5264_v5  ;;  %v1818_v6 = vadd.f32 %v1817_v21, %v1712_v2  ;;  %v1819_v16 = vpop.f32.mrb[30].mxu0  ;;  %v4927_v28 = vunpack.i.h.bf16 %v4925_v61 }
 0x567   : > { %5277 = vrcp.f32 %v1883_v20  ;;  %v1885_v49 = vadd.f32 1.0, %v5266_v33  ;;  %v4664_v17 = vmul.f32 -1.442695, %v1816_v9  ;;  %v1820_v54 = vadd.f32 %v1819_v16, %v1717_v47  ;;  %v1821_v56 = vpop.f32.mrb[31].mxu0  ;;  %v7652_v9 = vld [vmem:[#allocation18_spill] sm:$0xff] }
 0x568   : > { %5279 = vrcp.f32 %v1884_v37  ;;  %v4665_v10 = vmul.f32 -1.442695, %v1818_v6  ;;  %v1822_v55 = vadd.f32 %v1821_v56, %v1717_v47  ;;  %v2483_v21 = vmul.f32 %v4932_v29, %v7652_v9  ;;  %v7653_v33 = vld [vmem:[#allocation14_spill] sm:$0xff]  ;;  %v4937_v6 = vpop.permute.xlu1 %4936 }
 0x569   : > { %5281 = vrcp.f32 %v1885_v49  ;;  %v4666_v52 = vmul.f32 -1.442695, %v1820_v54  ;;  %v2471_v37 = vmul.f32 %v4926_v13, %v7653_v33  ;;  %v7654_v49 = vld [vmem:[#allocation19_spill] sm:$0xff] }
 0x56a   : > { %5283 = vpow2.f32 %v4664_v17  ;;  %v4667_v19 = vmul.f32 -1.442695, %v1822_v55  ;;  %v2485_v17 = vmul.f32 %v4933_v11, %v7652_v9  ;;  %v2486_v54 = vmul.f32 %v4933_v11, %v7654_v49  ;;  %v7663_v9 = vld [vmem:[#allocation17_spill] sm:$0xff] }
 0x56b   : > { %v5268_v25 = vpop.eup %5267  ;;  %5285 = vpow2.f32 %v4665_v10  ;;  %v7655_v10 = vld [vmem:[#allocation15_spill] sm:$0xff] }
 0x56c   : > { %v5270_v1 = vpop.eup %5269  ;;  %v1886_v44 = vadd.f32 1.0, %v5268_v25  ;;  %5287 = vpow2.f32 %v4666_v52  ;;  %v1825_v58 = vpop.f32.mrb[32].mxu0  ;;  %v2472_v55 = vmul.f32 %v4926_v13, %v7655_v10  ;;  %v2473_v52 = vmul.f32 %v4927_v28, %v7653_v33  ;;  %v7656_v25 = vld [vmem:[#allocation21_spill] sm:$0xff] }
 0x56d   : > { %v5272_v62 = vpop.eup %5271  ;;  %v1887_v51 = vadd.f32 1.0, %v5270_v1  ;;  %5289 = vpow2.f32 %v4667_v19  ;;  %v1826_v23 = vadd.f32 %v1825_v58, %v1722_v35  ;;  %v1827_v31 = vpop.f32.mrb[33].mxu0  ;;  %v4939_v58 = vunpack.i.h.bf16 %v4937_v6 }
 0x56e   : > { %v5274_v3 = vpop.eup %5273  ;;  %5291 = vrcp.f32 %v1886_v44  ;;  %v1888_v15 = vadd.f32 1.0, %v5272_v62  ;;  %v1828_v24 = vadd.f32 %v1827_v31, %v1722_v35  ;;  %v1829_v4 = vpop.f32.mrb[34].mxu0  ;;  %v2484_v35 = vmul.f32 %v4932_v29, %v7654_v49  ;;  %v7657_v29 = vld [vmem:[#allocation20_spill] sm:$0xff] }
 0x56f   : > { %5293 = vrcp.f32 %v1887_v51  ;;  %v1889_v57 = vadd.f32 1.0, %v5274_v3  ;;  %v4668_v45 = vmul.f32 -1.442695, %v1826_v23  ;;  %v1830_v50 = vadd.f32 %v1829_v4, %v1727_v0  ;;  %v1831_v27 = vpop.f32.mrb[35].mxu0 }
 0x570   : > { %v5276_v2 = vpop.eup %5275  ;;  %5295 = vrcp.f32 %v1888_v15  ;;  %v4669_v43 = vmul.f32 -1.442695, %v1828_v24  ;;  %v1832_v47 = vadd.f32 %v1831_v27, %v1727_v0  ;;  %v2474_v44 = vmul.f32 %v4927_v28, %v7655_v10  ;;  %v7658_v15 = vld [vmem:[#allocation22_spill] sm:$0xff] }
 0x571   : > { %v5278_v7 = vpop.eup %5277  ;;  %5297 = vrcp.f32 %v1889_v57  ;;  %v4670_v38 = vmul.f32 -1.442695, %v1830_v50  ;;  %v6329_v51 = vadd.f32 %v2483_v21, %v2471_v37  ;;  %v4938_v23 = vunpack.i.l.bf16 %v4937_v6  ;;  %v7659_v57 = vld [vmem:[#allocation23_spill] sm:$0xff]  ;;  %v7660_v50 = vld [vmem:[#allocation24_spill] sm:$0xff] }
 0x572   : > { %v5280_v53 = vpop.eup %5279  ;;  %5299 = vpow2.f32 %v4668_v45  ;;  %v4671_v5 = vmul.f32 -1.442695, %v1832_v47  ;;  %v6332_v3 = vmul.f32 %v5276_v2, %v7657_v29  ;;  %v6335_v24 = vmul.f32 %v5278_v7, %v7658_v15  ;;  %v7661_v2 = vld [vmem:[#allocation25_spill] sm:$0xff] }
 0x573   : > { %v5282_v20 = vpop.eup %5281  ;;  %5301 = vpow2.f32 %v4669_v43  ;;  %v6326_v61 = vmul.f32 %v5280_v53, %v7656_v25  ;;  %v2488_v43 = vadd.f32 %v2484_v35, %v2472_v55  ;;  %v6348_v7 = vadd.f32 %v2485_v17, %v2473_v52 }
 0x574   : > { %v5284_v16 = vpop.eup %5283  ;;  %5303 = vpow2.f32 %v4670_v38  ;;  %v6338_v45 = vmul.f32 %v5282_v20, %v7659_v57  ;;  %v2490_v53 = vadd.f32 %v2486_v54, %v2474_v44  ;;  %v2500_v21 = vmul.f32 %v4938_v23, %v7663_v9 }
 0x575   : > { %v5286_v56 = vpop.eup %5285  ;;  %v1890_v0 = vadd.f32 1.0, %v5284_v16  ;;  %5305 = vpow2.f32 %v4671_v5  ;;  %v1976_v11 = vmul.f32 %v6326_v61, %v6326_v61  ;;  %v7662_v5 = vld [vmem:[#allocation16_spill] sm:$0xff]  ;;  %v1974_v6 = vmul.f32 %v6332_v3, %v6332_v3 }
 0x576   : > { %v5288_v19 = vpop.eup %5287  ;;  %v1891_v1 = vadd.f32 1.0, %v5286_v56  ;;  %v2499_v20 = vmul.f32 %v4938_v23, %v7662_v5  ;;  %v6353_v33 = vmul.f32 %v4939_v58, %v7662_v5  ;;  %v1975_v16 = vmul.f32 %v6335_v24, %v6335_v24  ;;  %v7665_v23 = vld [vmem:[#allocation27_spill] sm:$0xff] }
 0x577   : > { %v5290_v26 = vpop.eup %5289  ;;  %5307 = vrcp.f32 %v1890_v0  ;;  %v1892_v62 = vadd.f32 1.0, %v5288_v19  ;;  %v1946_v49 = vadd.f32 %v6326_v61, %v6332_v3  ;;  %v2502_v35 = vmul.f32 %v4939_v58, %v7663_v9 }
 0x578   : > { %v5292_v31 = vpop.eup %5291  ;;  %5309 = vrcp.f32 %v1891_v1  ;;  %v1893_v4 = vadd.f32 1.0, %v5290_v26  ;;  %v1959_v54 = vadd.f32 %v6338_v45, %v6335_v24  ;;  %v1977_v56 = vmul.f32 %v6338_v45, %v6338_v45  ;;  %v7664_v1 = vld [vmem:[#allocation26_spill] sm:$0xff] }
 0x579   : > { %v5294_v13 = vpop.eup %5293  ;;  %v6341_v27 = vmul.f32 %v5292_v31, %v7660_v50  ;;  %5311 = vrcp.f32 %v1892_v62  ;;  %v1990_v52 = vadd.f32 %v1976_v11, %v1974_v6  ;;  %v6376_v26 = vld [vmem:[%s7512_s2 + $0xa0] sm:$0xff]   ;;  %v2506_v8 = vadd.f32 %v2502_v35, %v2490_v53 }
 0x57a   : > { %v5296_v47 = vpop.eup %5295  ;;  %v6346_v38 = vmul.f32 %v5294_v13, %v7661_v2  ;;  %5313 = vrcp.f32 %v1893_v4  ;;  %v2557_v13 = vunpack.c.l.bf16 %v6376_v26  ;;  %v2558_v9 = vunpack.c.h.bf16 %v6376_v26 }
 0x57b   : > { %v5298_v28 = vpop.eup %5297  ;;  %v1978_v0 = vmul.f32 %v6341_v27, %v6341_v27  ;;  %v6371_v44 = vmul.f32 %v5296_v47, %v7664_v1  ;;  %v1947_v11 = vadd.f32 %v1946_v49, %v6341_v27  ;;  %v6383_v47 = vpop.permute.xlu0 %4942  ;;  %v2003_v6 = vadd.f32 %v1977_v56, %v1975_v16 }
 0x57c   : > { %v5300_v37 = vpop.eup %5299  ;;  %v1979_v19 = vmul.f32 %v6346_v38, %v6346_v38  ;;  %v6379_v31 = vmul.f32 %v5298_v28, %v7665_v23  ;;  %v1960_v40 = vadd.f32 %v1959_v54, %v6346_v38  ;;  %v4947_v49 = vpack.i.bf16 %v2558_v9, %v2557_v13  ;;  %v7669_v9 = vld [vmem:[#allocation31_spill] sm:$0xff] }
 0x57d   : > { %v5302_v17 = vpop.eup %5301  ;;  %v1894_v10 = vadd.f32 1.0, %v5300_v37  ;;  %v4945_v48 = vunpack.i.h.bf16 %v6383_v47  ;;  %v2505_v53 = vadd.f32 %v6353_v33, %v6348_v7 }
 0x57e   : > { %v5304_v55 = vpop.eup %5303  ;;  %v1895_v58 = vadd.f32 1.0, %v5302_v17  ;;  %v1991_v17 = vadd.f32 %v1990_v52, %v1978_v0  ;;  %v1981_v14 = vmul.f32 %v6379_v31, %v6379_v31  ;;  %v1948_v0 = vadd.f32 %v1947_v11, %v6371_v44  ;;  %4948 = vperm.xlu1 %4946, %v4947_v49  }
 0x57f   : > { %v5306_v62 = vpop.eup %5305  ;;  %5315 = vrcp.f32 %v1894_v10  ;;  %v1896_v4 = vadd.f32 1.0, %v5304_v55  ;;  %v1980_v10 = vmul.f32 %v6371_v44, %v6371_v44  ;;  %v7666_v55 = vld [vmem:[#allocation28_spill] sm:$0xff]  ;;  %v1961_v13 = vadd.f32 %v1960_v40, %v6379_v31 }
 0x580   : > { %5317 = vrcp.f32 %v1895_v58  ;;  %v1897_v5 = vadd.f32 1.0, %v5306_v62  ;;  %v2004_v62 = vadd.f32 %v2003_v6, %v1979_v19  ;;  %v2559_v19 = vunpack.c.l.bf16 %v6236_v41 }
 0x581   : > { %v5308_v37 = vpop.eup %5307  ;;  %5319 = vrcp.f32 %v1896_v4  ;;  %v7668_v4 = vld [vmem:[#allocation30_spill] sm:$0xff]  ;;  %v1992_v54 = vadd.f32 %v1991_v17, %v1980_v10  ;;  %v2503_v40 = vadd.f32 %v2499_v20, %v6329_v51  ;;  %v6430_v20 = vadd.f32 %v4945_v48, %v2506_v8 }
 0x582   : > { %v5310_v28 = vpop.eup %5309  ;;  %v6390_v42 = vmul.f32 %v5308_v37, %v7666_v55  ;;  %5321 = vrcp.f32 %v1897_v5  ;;  %2577 = vperm.xlu1 %4946, %v2559_v19  }
 0x583   : > { %v5312_v58 = vpop.eup %5311  ;;  %v6395_v16 = vmul.f32 %v5310_v28, %v7667_v12  ;;  %v2504_v28 = vadd.f32 %v2500_v21, %v2488_v43 }
 0x584   : > { %v5314_v56 = vpop.eup %5313  ;;  %v1982_v52 = vmul.f32 %v6390_v42, %v6390_v42  ;;  %v6402_v37 = vmul.f32 %v5312_v58, %v7668_v4  ;;  %v1949_v11 = vadd.f32 %v1948_v0, %v6390_v42  ;;  %v2005_v58 = vadd.f32 %v2004_v62, %v1981_v14  ;;  %v7671_v62 = vld [vmem:[#allocation32_spill] sm:$0xff]  ;;  %v7673_v0 = vld [vmem:[#allocation33_spill] sm:$0xff] }
 0x585   : > { %v1983_v5 = vmul.f32 %v6395_v16, %v6395_v16  ;;  %v6409_v6 = vmul.f32 %v5314_v56, %v7669_v9  ;;  %v1962_v49 = vadd.f32 %v1961_v13, %v6395_v16  ;;  %v2561_v56 = vunpack.c.l.bf16 %v6243_v30  ;;  %v6435_v30 = vld [vmem:[%s7512_s2 + $0x74] sm:$0xff]  }
 0x586   : > { %v1993_v46 = vadd.f32 %v1992_v54, %v1982_v52  ;;  %v1984_v41 = vmul.f32 %v6402_v37, %v6402_v37  ;;  %v7670_v14 = vunpack.i.l.bf16 %v6383_v47  ;;  %v1950_v10 = vadd.f32 %v1949_v11, %v6402_v37  ;;  %v7675_v11 = vld [vmem:[#allocation34_spill] sm:$0xff] }
 0x587   : > { %v2006_v43 = vadd.f32 %v2005_v58, %v1983_v5  ;;  %v1985_v21 = vmul.f32 %v6409_v6, %v6409_v6  ;;  %v2563_v54 = vunpack.c.l.bf16 %v6251_v18  ;;  %v1963_v33 = vadd.f32 %v1962_v49, %v6409_v6  ;;  %2587 = vperm.xlu1 %4946, %v2561_v56   ;;  %v6464_v56 = vld [vmem:[%s7512_s2 + $0x84] sm:$0xff]  }
 0x588   : > { %v6424_v35 = vadd.f32 %v7670_v14, %v2504_v28  ;;  %v2068_v19 = vunpack.c.l.bf16 %v6435_v30  ;;  %v1994_v8 = vadd.f32 %v1993_v46, %v1984_v41 }
 0x589   : > { %v5316_v63 = vpop.eup %5315  ;;  %v2007_v18 = vadd.f32 %v2006_v43, %v1985_v21 }
 0x58a   : > { %v5318_v17 = vpop.eup %5317  ;;  %v6428_v51 = vmul.f32 %v5316_v63, %v7671_v62  ;;  %v2069_v63 = vunpack.c.h.bf16 %v6435_v30 }
 0x58b   : > { %v5320_v7 = vpop.eup %5319  ;;  %v6440_v52 = vmul.f32 %v5318_v17, %v7673_v0  ;;  %v7677_v17 = vld [vmem:[#allocation35_spill] sm:$0xff]  ;;  %2597 = vperm.xlu1 %4946, %v2563_v54  }
 0x58c   : > { %7672 = vst [vmem:[#allocation18_spill] sm:$0xff] %v6428_v51  ;;  %v5322_v13 = vpop.eup %5321  ;;  %v1951_v5 = vadd.f32 %v1950_v10, %v6428_v51  ;;  %v1986_v28 = vmul.f32 %v6428_v51, %v6428_v51  ;;  %v6448_v58 = vmul.f32 %v5320_v7, %v7675_v11  ;;  %v2520_v10 = vmul.f32 %v6424_v35, %v6424_v35 }
 0x58d   : > { %7674 = vst [vmem:[#allocation14_spill] sm:$0xff] %v6440_v52  ;;  %v1964_v49 = vadd.f32 %v1963_v33, %v6440_v52  ;;  %v1987_v14 = vmul.f32 %v6440_v52, %v6440_v52  ;;  %v6454_v34 = vmul.f32 %v5322_v13, %v7677_v17  ;;  %v2072_v33 = vunpack.c.l.bf16 %v6464_v56 }
 0x58e   : > { %7676 = vst [vmem:[#allocation19_spill] sm:$0xff] %v6448_v58  ;;  %v1995_v32 = vadd.f32 %v1994_v8, %v1986_v28  ;;  %v1952_v46 = vadd.f32 %v1951_v5, %v6448_v58  ;;  %v1988_v41 = vmul.f32 %v6448_v58, %v6448_v58  ;;  %v4952_v5 = vpack.i.bf16 %v2069_v63, %v2068_v19 }
 0x58f   : > { %7678 = vst [vmem:[#allocation15_spill] sm:$0xff] %v6454_v34  ;;  %v2008_v43 = vadd.f32 %v2007_v18, %v1987_v14  ;;  %v1965_v21 = vadd.f32 %v1964_v49, %v6454_v34  ;;  %v1989_v7 = vmul.f32 %v6454_v34, %v6454_v34  ;;  %v2073_v28 = vunpack.c.h.bf16 %v6464_v56 }
 0x590   : > { %v1953_v13 = vrot.slane %v1952_v46, 4  ;;  %v1996_v8 = vadd.f32 %v1995_v32, %v1988_v41  ;;  %v7679_v18 = vunpack.i.l.bf16 %v6383_v47  ;;  %v2522_v14 = vmul.f32 %v6430_v20, %v6430_v20  ;;  %4953 = vperm.xlu1 %4946, %v4952_v5   ;;  %v4695_v47 = vld [vmem:[%s7512_s2 + $0xd0] sm:$0xff]  }
 0x591   : > { %v1966_v59 = vrot.slane %v1965_v21, 4  ;;  %v2009_v36 = vadd.f32 %v2008_v43, %v1989_v7  ;;  %v6480_v32 = vadd.f32 %v4945_v48, %v2505_v53  ;;  %v2524_v63 = vmul.f32 %v2520_v10, %v6424_v35 }
 0x592   : > { %v6476_v49 = vadd.f32 %v7679_v18, %v2503_v40  ;;  %v1954_v39 = vadd.f32 %v1953_v13, %v1952_v46  ;;  %v1997_v17 = vrot.slane %v1996_v8, 4  ;;  %v2944_v41 = vunpack.c.l.bf16 %v4691_v60 }
 0x593   : > { %v1967_v54 = vadd.f32 %v1966_v59, %v1965_v21  ;;  %v2010_v19 = vrot.slane %v2009_v36, 4  ;;  %v4962_v43 = vpack.i.bf16 %v2073_v28, %v2072_v33  ;;  %v2945_v7 = vunpack.c.h.bf16 %v4691_v60 }
 0x594   : > { %v1955_v11 = vrot.slane %v1954_v39, 2  ;;  %v1998_v0 = vadd.f32 %v1997_v17, %v1996_v8  ;;  %v2519_v48 = vmul.f32 %v6476_v49, %v6476_v49  ;;  %v2526_v59 = vmul.f32 %v2522_v14, %v6430_v20 }
 0x595   : > { %v1968_v40 = vrot.slane %v1967_v54, 2  ;;  %v2011_v18 = vadd.f32 %v2010_v19, %v2009_v36  ;;  %v2521_v10 = vmul.f32 %v6480_v32, %v6480_v32  ;;  %v2528_v33 = vmul.f32 0.044715, %v2524_v63  ;;  %4963 = vperm.xlu1 %4946, %v4962_v43  }
 0x596   : > { %v1956_v53 = vadd.f32 %v1955_v11, %v1954_v39  ;;  %v1999_v46 = vrot.slane %v1998_v0, 2  ;;  %v2948_v60 = vunpack.c.l.bf16 %v4695_v47  ;;  %v4972_v5 = vpack.i.bf16 %v2945_v7, %v2944_v41 }
 0x597   : > { %v1969_v17 = vadd.f32 %v1968_v40, %v1967_v54  ;;  %v2012_v21 = vrot.slane %v2011_v18, 2  ;;  %v2949_v28 = vunpack.c.h.bf16 %v4695_v47  ;;  %v2523_v62 = vmul.f32 %v2519_v48, %v6476_v49 }
 0x598   : > { %v1957_v13 = vrot.slane %v1956_v53, 1  ;;  %v2000_v8 = vadd.f32 %v1999_v46, %v1998_v0  ;;  %v2530_v9 = vmul.f32 0.044715, %v2526_v59  ;;  %v2525_v11 = vmul.f32 %v2521_v10, %v6480_v32 }
 0x599   : > { %v1970_v36 = vrot.slane %v1969_v17, 1  ;;  %v2013_v19 = vadd.f32 %v2012_v21, %v2011_v18  ;;  %v2532_v40 = vadd.f32 %v2528_v33, %v6424_v35  ;;  %4973 = vperm.xlu1 %4946, %v4972_v5   ;;  %v4982_v0 = vpack.i.bf16 %v2949_v28, %v2948_v60  ;;  %v4699_v18 = vld [vmem:[%s7512_s2 + $0xe0] sm:$0xf] }
 0x59a   : > { %v1958_v14 = vadd.f32 %v1957_v13, %v1956_v53  ;;  %v2001_v39 = vrot.slane %v2000_v8, 1  ;;  %v2527_v7 = vmul.f32 0.044715, %v2523_v62  ;;  %v2534_v47 = vadd.f32 %v2530_v9, %v6430_v20 }
 0x59b   : > { %v1971_v4 = vadd.f32 %v1970_v36, %v1969_v17  ;;  %v2014_v12 = vrot.slane %v2013_v19, 1  ;;  %v2529_v53 = vmul.f32 0.044715, %v2525_v11 }
 0x59c   : > { %v6493_v54 = vmul.f32 0.015625, %v1958_v14  ;;  %v2002_v63 = vadd.f32 %v2001_v39, %v2000_v8  ;;  %v2531_v9 = vadd.f32 %v2527_v7, %v6476_v49  ;;  %v2538_v21 = vmul.f32 0.7978846, %v2534_v47 }
 0x59d   : > { %v6496_v41 = vmul.f32 0.015625, %v1971_v4  ;;  %v2015_v43 = vadd.f32 %v2014_v12, %v2013_v19  ;;  %v2536_v4 = vmul.f32 0.7978846, %v2532_v40  ;;  %4983 = vperm.xlu1 %4946, %v4982_v0   ;;  %v3265_v12 = vunpack.c.l.bf16 %v4699_v18 }
 0x59e   : > { %v2016_v48 = vmul.f32 0.015625, %v2002_v63  ;;  %v2018_v59 = vmul.f32 %v6493_v54, %v6493_v54  ;;  %v2533_v60 = vadd.f32 %v2529_v53, %v6480_v32  ;;  %v2535_v28 = vmul.f32 0.7978846, %v2531_v9 }
 0x59f   : > { %v2017_v46 = vmul.f32 0.015625, %v2015_v43  ;;  %v2019_v10 = vmul.f32 %v6496_v41, %v6496_v41  ;;  %5323 = vtanh.f32 %v2536_v4  ;;  %v7680_v19 = vmov 1  }
 0x5a0   : > { %v2020_v17 = vsub.f32 %v2016_v48, %v2018_v59  ;;  %5325 = vtanh.f32 %v2538_v21  ;;  %v2537_v36 = vmul.f32 0.7978846, %v2533_v60  ;;  %v2028_v11 = vsub.f32 %v6332_v3, %v6493_v54 }
 0x5a1   : > { %v2021_v62 = vsub.f32 %v2017_v46, %v2019_v10  ;;  %3268 = vperm.xlu1 %4946, %v3265_v12   ;;  %v2030_v63 = vsub.f32 %v6326_v61, %v6493_v54  ;;  %v2029_v0 = vsub.f32 %v6335_v24, %v6496_v41  ;;  %v2031_v43 = vsub.f32 %v6338_v45, %v6496_v41 }
 0x5a2   : > { %v2022_v33 = vmax.f32 %v2020_v17, 0.0  ;;  %v2033_v7 = vsub.f32 %v6346_v38, %v6496_v41  ;;  %v2035_v47 = vsub.f32 %v6379_v31, %v6496_v41  ;;  %v2032_v12 = vsub.f32 %v6341_v27, %v6493_v54 }
 0x5a3   : > { %v2023_v13 = vmax.f32 %v2021_v62, 0.0  ;;  %v2034_v62 = vsub.f32 %v6371_v44, %v6493_v54  ;;  %v2037_v60 = vsub.f32 %v6395_v16, %v6496_v41 }
 0x5a4   : > { %v2024_v8 = vadd.f32 1e-05, %v2022_v33 }
 0x5a5   : > { %v2025_v5 = vadd.f32 1e-05, %v2023_v13  ;;  %4998 = vset.pattern.permute.xlu1 %v7680_v19  ;;  %v2039_v13 = vsub.f32 %v6409_v6, %v6496_v41 }
 0x5a6   : > { %5327 = vrsqrt.f32 %v2024_v8 }
 0x5a7   : > { %5329 = vrsqrt.f32 %v2025_v5 }
 0x5a8   : > { %5331 = vtanh.f32 %v2535_v28 }
 0x5a9   : > { %5333 = vtanh.f32 %v2537_v36  ;;  %v5324_v14 = vpop.eup %5323 }
 0x5aa   : > { %v5326_v39 = vpop.eup %5325  ;;  %v2544_v9 = vadd.f32 1.0, %v5324_v14  ;;  %v2036_v14 = vsub.f32 %v6390_v42, %v6493_v54 }
 0x5ab   : > { %v2546_v8 = vadd.f32 1.0, %v5326_v39  ;;  %v2041_v39 = vsub.f32 %v6440_v52, %v6496_v41 }
 0x5b0   : > { %v5328_v40 = vpop.eup %5327 }
 0x5b1   : > { %v5330_v18 = vpop.eup %5329  ;;  %v2044_v48 = vmul.f32 %v5328_v40, %v2028_v11  ;;  %v2046_v59 = vmul.f32 %v5328_v40, %v2030_v63  ;;  %v2048_v28 = vmul.f32 %v5328_v40, %v2032_v12  ;;  %v2050_v36 = vmul.f32 %v5328_v40, %v2034_v62 }
 0x5b2   : > { %v2045_v53 = vmul.f32 %v5330_v18, %v2029_v0  ;;  %v2047_v46 = vmul.f32 %v5330_v18, %v2031_v43  ;;  %v2049_v10 = vmul.f32 %v5330_v18, %v2033_v7  ;;  %v2051_v17 = vmul.f32 %v5330_v18, %v2035_v47  ;;  %v5332_v4 = vpop.eup %5331 }
 0x5b3   : > { %v5334_v21 = vpop.eup %5333  ;;  %v2060_v5 = vpack.c.bf16 %v2046_v59, %v2044_v48  ;;  %v2053_v11 = vmul.f32 %v5330_v18, %v2037_v60  ;;  %v2055_v63 = vmul.f32 %v5330_v18, %v2039_v13  ;;  %v2038_v0 = vsub.f32 %v6402_v37, %v6493_v54 }
 0x5b4   : > { %v2061_v33 = vpack.c.bf16 %v2047_v46, %v2045_v53  ;;  %v2063_v19 = vpack.c.bf16 %v2051_v17, %v2049_v10  ;;  %v2543_v43 = vadd.f32 1.0, %v5332_v4  ;;  %v2545_v7 = vadd.f32 1.0, %v5334_v21 }
 0x5b5   : > { %v2043_v47 = vsub.f32 %v6454_v34, %v6496_v41  ;;  %v2548_v48 = vmul.f32 0.5, %v2544_v9  ;;  %v2550_v59 = vmul.f32 0.5, %v2546_v8  ;;  %v2062_v53 = vpack.c.bf16 %v2050_v36, %v2048_v28 }
 0x5b6   : > { %2148 = vmatprep.subr.bf16.mxu1 %v2061_v33  ;;  %v2052_v46 = vmul.f32 %v5328_v40, %v2036_v14  ;;  %v2054_v10 = vmul.f32 %v5328_v40, %v2038_v0  ;;  %v2065_v17 = vpack.c.bf16 %v2055_v63, %v2053_v11  ;;  %v2057_v12 = vmul.f32 %v5330_v18, %v2041_v39  ;;  %v6585_v63 = vpop.permute.xlu0 %2582 }
 0x5b7   : > { %2149 = vmatpush1.bf16.msra.mxu1 %v2060_v5  ;;  %v2059_v62 = vmul.f32 %v5330_v18, %v2043_v47  ;;  %v2040_v4 = vsub.f32 %v6428_v51, %v6493_v54  ;;  %v2042_v21 = vsub.f32 %v6448_v58, %v6493_v54  ;;  %v2547_v33 = vmul.f32 0.5, %v2543_v43 }
 0x5b8   : > { %2150 = vmatprep.subr.bf16.mxu1 %v2063_v19  ;;  %v2549_v60 = vmul.f32 0.5, %v2545_v7  ;;  %v2552_v41 = vmul.f32 %v2548_v48, %v6424_v35  ;;  %v2554_v9 = vmul.f32 %v2550_v59, %v6430_v20  ;;  %v2064_v13 = vpack.c.bf16 %v2054_v10, %v2052_v46  ;;  %v5593_v35 = vld [vmem:[%s7512_s2 + $0x7c] sm:$0xff]   ;;  %v5594_v20 = vld [vmem:[%s7512_s2 + $0x8c] sm:$0xff]  }
 0x5b9   : > { %v2056_v8 = vmul.f32 %v5328_v40, %v2040_v4  ;;  %v2058_v5 = vmul.f32 %v5328_v40, %v2042_v21  ;;  %v2067_v28 = vpack.c.bf16 %v2059_v62, %v2057_v12  ;;  %v2551_v18 = vmul.f32 %v2547_v33, %v6476_v49 }
 0x5ba   : > { %v2553_v36 = vmul.f32 %v2549_v60, %v6480_v32  ;;  %v2556_v19 = vpack.c.bf16 %v2554_v9, %v2552_v41  ;;  %v6589_v0 = vpop.permute.xlu0 %2592 }
 0x5bb   : > { %2151 = vmatpush1.bf16.msra.mxu1 %v2062_v53  ;;  %v2066_v11 = vpack.c.bf16 %v2058_v5, %v2056_v8 }
 0x5bc   : > { %2152 = vmatprep.subr.bf16.mxu1 %v2065_v17  ;;  %v2555_v54 = vpack.c.bf16 %v2553_v36, %v2551_v18 }
 0x5be   : > { %v6591_v47 = vpop.permute.xlu0 %2602 }
 0x5bf   : > { %2153 = vmatpush1.bf16.msra.mxu1 %v2064_v13 }
 0x5c0   : > { %2154 = vmatprep.subr.bf16.mxu1 %v2067_v28 }
 0x5c2   : > { %v4959_v41 = vpop.permute.xlu0 %4958 }
 0x5c3   : > { %2155 = vmatpush1.bf16.msra.mxu1 %v2066_v11  ;;  %v4960_v8 = vunpack.i.l.bf16 %v4959_v41  ;;  %v4961_v11 = vunpack.i.h.bf16 %v4959_v41 }
 0x5c4   : > { %2637 = vmatprep.subr.bf16.mxu1 %v2556_v19 }
 0x5c6   : > { %4676 = vmatmul.mubr.msk.bf16.vlgmr.msra.gmra.mrb[16].mxu1 %vm1056_vm6, %v6435_v30  ;;  %v5595_v30 = vld [vmem:[%s7512_s2 + $0xa8] sm:$0xff]  }
 0x5c7   : > { %2638 = vmatpush1.bf16.msra.mxu1 %v2555_v54  ;;  %2190 = vmatprep.mubr.bf16.mxu1 %v7638_v22 }
 0x5ce   : > { %4677 = vmatmul.mubr.msk.bf16.gmra.mrb[20].mxu1 %vm1056_vm6, %v5593_v35 }
 0x5cf   : > { %2200 = vmatprep.mubr.bf16.mxu1 %v7638_v22 }
 0x5d6   : > { %4678 = vmatmul.mubr.msk.bf16.gmra.mrb[24].mxu1 %vm1056_vm6, %v6464_v56  ;;  %v5596_v56 = vld [vmem:[%s7512_s2 + $0xb0] sm:$0xff]  }
 0x5d7   : > { %2210 = vmatprep.mubr.bf16.mxu1 %v7638_v22 }
 0x5de   : > { %4679 = vmatmul.mubr.msk.bf16.gmra.mrb[28].mxu1 %vm1056_vm6, %v5594_v20 }
 0x5df   : > { %2669 = vmatprep.mubr.bf16.mxu1 %v7638_v22 }
 0x5e6   : > { %4704 = vmatmul.mubr.msk.bf16.vlgmr.msra.gmra.mrb[32].mxu1 %vm652_vm5, %v6376_v26  ;;  %v5597_v26 = vld [vmem:[%s7512_s2 + $0xb8] sm:$0xff]  }
 0x5e7   : > { %2679 = vmatprep.mubr.bf16.mxu1 %v7638_v22 }
 0x5ee   : > { %4705 = vmatmul.mubr.msk.bf16.gmra.mrb[36].mxu1 %vm652_vm5, %v5595_v30 }
 0x5ef   : > { %2689 = vmatprep.mubr.bf16.mxu1 %v7638_v22 }
 0x5f6   : > { %4706 = vmatmul.mubr.msk.bf16.gmra.mrb[40].mxu1 %vm652_vm5, %v5596_v56 }
 0x5f7   : > { %2699 = vmatprep.mubr.bf16.mxu1 %v7638_v22 }
 0x5fd   : > { %v6579_v49 = vpop.permute.xlu1 %4948 }
 0x5fe   : > { %4707 = vmatmul.mubr.msk.bf16.gmra.mrb[44].mxu1 %vm652_vm5, %v5597_v26 }
 0x5ff   : > { %3306 = vmatprep.mubr.bf16.mxu1 %v7638_v22 }
 0x601   : > { %v6581_v32 = vpop.permute.xlu1 %2577 }
 0x606   : > { %v6583_v40 = vpop.permute.xlu1 %2587 }
 0x60a   : > { %v6587_v14 = vpop.permute.xlu1 %2597 }
 0x60f   : > { %v4954_v43 = vpop.permute.xlu1 %4953 }
 0x610   : > { %v4955_v7 = vunpack.i.l.bf16 %v4954_v43  ;;  %v4956_v39 = vunpack.i.h.bf16 %v4954_v43 }
 0x614   : > { %v4964_v56 = vpop.permute.xlu1 %4963 }
 0x615   : > { %v4965_v41 = vunpack.i.l.bf16 %v4964_v56 }
 0x699   : > { %v2182_v48 = vpop.f32.mrb[16].mxu1 }
 0x69a   : > { %v6593_v59 = vadd.f32 %v4955_v7, %v2182_v48  ;;  %v2184_v53 = vpop.f32.mrb[17].mxu1 }
 0x69b   : > { %v6595_v46 = vadd.f32 %v4955_v7, %v2184_v53  ;;  %v2186_v10 = vpop.f32.mrb[18].mxu1 }
 0x69c   : > { %v2221_v17 = vmul.f32 %v6593_v59, %v6593_v59  ;;  %v6599_v12 = vadd.f32 %v4956_v39, %v2186_v10  ;;  %v2188_v62 = vpop.f32.mrb[19].mxu1 }
 0x69d   : > { %v2222_v4 = vmul.f32 %v6595_v46, %v6595_v46  ;;  %v6603_v21 = vadd.f32 %v4956_v39, %v2188_v62 }
 0x69e   : > { %v2237_v33 = vmul.f32 %v2221_v17, %v6593_v59  ;;  %v2223_v60 = vmul.f32 %v6599_v12, %v6599_v12 }
 0x69f   : > { %v2238_v9 = vmul.f32 %v2222_v4, %v6595_v46  ;;  %v2224_v13 = vmul.f32 %v6603_v21, %v6603_v21 }
 0x6a0   : > { %v2253_v5 = vmul.f32 0.044715, %v2237_v33  ;;  %v2239_v28 = vmul.f32 %v2223_v60, %v6599_v12 }
 0x6a1   : > { %v2254_v18 = vmul.f32 0.044715, %v2238_v9  ;;  %v2240_v36 = vmul.f32 %v2224_v13, %v6603_v21  ;;  %v2192_v19 = vpop.f32.mrb[20].mxu1 }
 0x6a2   : > { %v2269_v54 = vadd.f32 %v2253_v5, %v6593_v59  ;;  %v2255_v35 = vmul.f32 0.044715, %v2239_v28  ;;  %v6614_v20 = vadd.f32 %v4960_v8, %v2192_v19  ;;  %v2194_v30 = vpop.f32.mrb[21].mxu1 }
 0x6a3   : > { %v2270_v26 = vadd.f32 %v2254_v18, %v6595_v46  ;;  %v2256_v43 = vmul.f32 0.044715, %v2240_v36  ;;  %v6617_v7 = vadd.f32 %v4960_v8, %v2194_v30  ;;  %v2196_v39 = vpop.f32.mrb[22].mxu1  ;;  %v6635_v36 = vpop.permute.xlu0 %4968 }
 0x6a4   : > { %v2285_v48 = vmul.f32 0.7978846, %v2269_v54  ;;  %v2271_v53 = vadd.f32 %v2255_v35, %v6599_v12  ;;  %v2225_v10 = vmul.f32 %v6614_v20, %v6614_v20  ;;  %v6622_v17 = vadd.f32 %v4961_v11, %v2196_v39  ;;  %v2198_v62 = vpop.f32.mrb[23].mxu1 }
 0x6a5   : > { %v2286_v4 = vmul.f32 0.7978846, %v2270_v26  ;;  %v2226_v33 = vmul.f32 %v6617_v7, %v6617_v7  ;;  %v6626_v60 = vadd.f32 %v4961_v11, %v2198_v62  ;;  %v2272_v5 = vadd.f32 %v2256_v43, %v6603_v21 }
 0x6a6   : > { %5335 = vtanh.f32 %v2285_v48  ;;  %v2287_v9 = vmul.f32 0.7978846, %v2271_v53  ;;  %v2241_v13 = vmul.f32 %v2225_v10, %v6614_v20  ;;  %v2227_v8 = vmul.f32 %v6622_v17, %v6622_v17 }
 0x6a7   : > { %v2242_v28 = vmul.f32 %v2226_v33, %v6617_v7  ;;  %v2228_v18 = vmul.f32 %v6626_v60, %v6626_v60  ;;  %v4966_v54 = vunpack.i.h.bf16 %v4964_v56  ;;  %v2288_v62 = vmul.f32 0.7978846, %v2272_v5 }
 0x6a8   : > { %5337 = vtanh.f32 %v2287_v9  ;;  %v2257_v19 = vmul.f32 0.044715, %v2241_v13  ;;  %v2243_v11 = vmul.f32 %v2227_v8, %v6622_v17 }
 0x6a9   : > { %v2258_v30 = vmul.f32 0.044715, %v2242_v28  ;;  %v2244_v26 = vmul.f32 %v2228_v18, %v6626_v60  ;;  %v2202_v39 = vpop.f32.mrb[24].mxu1  ;;  %5339 = vtanh.f32 %v2286_v4 }
 0x6aa   : > { %v2273_v43 = vadd.f32 %v2257_v19, %v6614_v20  ;;  %v2259_v48 = vmul.f32 0.044715, %v2243_v11  ;;  %v6641_v53 = vadd.f32 %v4965_v41, %v2202_v39  ;;  %v2204_v10 = vpop.f32.mrb[25].mxu1 }
 0x6ab   : > { %v2274_v33 = vadd.f32 %v2258_v30, %v6617_v7  ;;  %v2260_v9 = vmul.f32 0.044715, %v2244_v26  ;;  %v6644_v13 = vadd.f32 %v4965_v41, %v2204_v10  ;;  %v2206_v56 = vpop.f32.mrb[26].mxu1 }
 0x6ac   : > { %v2289_v8 = vmul.f32 0.7978846, %v2273_v43  ;;  %v2275_v28 = vadd.f32 %v2259_v48, %v6622_v17  ;;  %v2229_v18 = vmul.f32 %v6641_v53, %v6641_v53  ;;  %v6649_v4 = vadd.f32 %v4966_v54, %v2206_v56  ;;  %v2208_v19 = vpop.f32.mrb[27].mxu1 }
 0x6ad   : > { %v2290_v11 = vmul.f32 0.7978846, %v2274_v33  ;;  %v2276_v39 = vadd.f32 %v2260_v9, %v6626_v60  ;;  %v2230_v5 = vmul.f32 %v6644_v13, %v6644_v13  ;;  %v6654_v30 = vadd.f32 %v4966_v54, %v2208_v19 }
 0x6ae   : > { %5341 = vtanh.f32 %v2289_v8  ;;  %v2291_v41 = vmul.f32 0.7978846, %v2275_v28  ;;  %v2245_v26 = vmul.f32 %v2229_v18, %v6641_v53  ;;  %v2231_v43 = vmul.f32 %v6649_v4, %v6649_v4 }
 0x6af   : > { %v4970_v48 = vunpack.i.l.bf16 %v6635_v36  ;;  %5343 = vtanh.f32 %v2288_v62  ;;  %v2246_v10 = vmul.f32 %v2230_v5, %v6644_v13  ;;  %v2232_v33 = vmul.f32 %v6654_v30, %v6654_v30 }
 0x6b0   : > { %v5336_v9 = vpop.eup %5335  ;;  %5345 = vtanh.f32 %v2291_v41  ;;  %v2261_v54 = vmul.f32 0.044715, %v2245_v26  ;;  %v2247_v8 = vmul.f32 %v2231_v43, %v6649_v4  ;;  %v2292_v18 = vmul.f32 0.7978846, %v2276_v39 }
 0x6b1   : > { %v2317_v28 = vadd.f32 1.0, %v5336_v9  ;;  %v2262_v19 = vmul.f32 0.044715, %v2246_v10  ;;  %v2248_v35 = vmul.f32 %v2232_v33, %v6654_v30  ;;  %v2212_v22 = vpop.f32.mrb[28].mxu1  ;;  %5347 = vtanh.f32 %v2290_v11 }
 0x6b2   : > { %v5338_v55 = vpop.eup %5337  ;;  %v2277_v62 = vadd.f32 %v2261_v54, %v6641_v53  ;;  %v2263_v5 = vmul.f32 0.044715, %v2247_v8  ;;  %v6667_v23 = vadd.f32 %v4970_v48, %v2212_v22  ;;  %v2214_v1 = vpop.f32.mrb[29].mxu1  ;;  %v4950_v22 = vunpack.i.l.bf16 %v6579_v49 }
 0x6b3   : > { %v2333_v34 = vmul.f32 0.5, %v2317_v28  ;;  %v2319_v56 = vadd.f32 1.0, %v5338_v55  ;;  %v2278_v41 = vadd.f32 %v2262_v19, %v6644_v13  ;;  %v2264_v26 = vmul.f32 0.044715, %v2248_v35  ;;  %v2216_v43 = vpop.f32.mrb[30].mxu1  ;;  %v5340_v9 = vpop.eup %5339 }
 0x6b4   : > { %v2293_v39 = vmul.f32 0.7978846, %v2277_v62  ;;  %v2279_v10 = vadd.f32 %v2263_v5, %v6649_v4  ;;  %v2233_v33 = vmul.f32 %v6667_v23, %v6667_v23  ;;  %v6673_v11 = vadd.f32 %v4970_v48, %v2214_v1  ;;  %v2218_v54 = vpop.f32.mrb[31].mxu1 }
 0x6b5   : > { %v2335_v8 = vmul.f32 0.5, %v2319_v56  ;;  %5349 = vtanh.f32 %v2292_v18  ;;  %v2280_v55 = vadd.f32 %v2264_v26, %v6654_v30  ;;  %v6681_v62 = vmul.f32 %v2333_v34, %v6593_v59 }
 0x6b6   : > { %5351 = vtanh.f32 %v2293_v39  ;;  %v2295_v28 = vmul.f32 0.7978846, %v2279_v10  ;;  %v2249_v35 = vmul.f32 %v2233_v33, %v6667_v23  ;;  %v2234_v19 = vmul.f32 %v6673_v11, %v6673_v11 }
 0x6b7   : > { %v2294_v5 = vmul.f32 0.7978846, %v2278_v41  ;;  %v7681_v1 = vunpack.i.h.bf16 %v6635_v36  ;;  %v2318_v52 = vadd.f32 1.0, %v5340_v9  ;;  %v2351_v2 = vmul.f32 %v2335_v8, %v6599_v12 }
 0x6b8   : > { %v5342_v56 = vpop.eup %5341  ;;  %5353 = vtanh.f32 %v2295_v28  ;;  %v2265_v18 = vmul.f32 0.044715, %v2249_v35  ;;  %v2250_v26 = vmul.f32 %v2234_v19, %v6673_v11  ;;  %v2296_v59 = vmul.f32 0.7978846, %v2280_v55 }
 0x6b9   : > { %v6685_v48 = vadd.f32 %v7681_v1, %v2216_v43  ;;  %v7682_v39 = vmov %v7681_v1  ;;  %v5344_v33 = vpop.eup %5343  ;;  %v2321_v34 = vadd.f32 1.0, %v5342_v56  ;;  %v2671_v43 = vpop.f32.mrb[32].mxu1  ;;  %5355 = vtanh.f32 %v2294_v5 }
 0x6ba   : > { %v6690_v10 = vadd.f32 %v7682_v39, %v2218_v54  ;;  %v5346_v1 = vpop.eup %5345  ;;  %v2281_v9 = vadd.f32 %v2265_v18, %v6667_v23  ;;  %v2266_v28 = vmul.f32 0.044715, %v2250_v26  ;;  %v2672_v19 = vadd.f32 %v4950_v22, %v2671_v43  ;;  %v2673_v36 = vpop.f32.mrb[33].mxu1 }
 0x6bb   : > { %v2235_v41 = vmul.f32 %v6685_v48, %v6685_v48  ;;  %v2323_v54 = vadd.f32 1.0, %v5346_v1  ;;  %v2674_v12 = vadd.f32 %v4950_v22, %v2673_v36  ;;  %v2675_v8 = vpop.f32.mrb[34].mxu1  ;;  %v5348_v55 = vpop.eup %5347  ;;  %5357 = vtanh.f32 %v2296_v59 }
 0x6bc   : > { %v2236_v35 = vmul.f32 %v6690_v10, %v6690_v10  ;;  %v2297_v56 = vmul.f32 0.7978846, %v2281_v9  ;;  %v2282_v58 = vadd.f32 %v2266_v28, %v6673_v11  ;;  %v4708_v50 = vmul.f32 -1.442695, %v2672_v19  ;;  %v2677_v18 = vpop.f32.mrb[35].mxu1 }
 0x6bd   : > { %v2251_v39 = vmul.f32 %v2235_v41, %v6685_v48  ;;  %v4709_v57 = vmul.f32 -1.442695, %v2674_v12  ;;  %v2320_v15 = vadd.f32 1.0, %v5344_v33  ;;  %v2337_v43 = vmul.f32 0.5, %v2321_v34 }
 0x6be   : > { %v2252_v51 = vmul.f32 %v2236_v35, %v6690_v10  ;;  %v2339_v29 = vmul.f32 0.5, %v2323_v54  ;;  %v7683_v5 = vunpack.i.h.bf16 %v6579_v49  ;;  %v2298_v36 = vmul.f32 0.7978846, %v2282_v58 }
 0x6bf   : > { %v2267_v26 = vmul.f32 0.044715, %v2251_v39  ;;  %v5350_v22 = vpop.eup %5349  ;;  %5359 = vpow2.f32 %v4708_v50  ;;  %v2334_v33 = vmul.f32 0.5, %v2318_v52  ;;  %v2353_v58 = vmul.f32 %v2337_v43, %v6614_v20 }
 0x6c0   : > { %v2268_v1 = vmul.f32 0.044715, %v2252_v51  ;;  %v2676_v41 = vadd.f32 %v7683_v5, %v2675_v8  ;;  %v7684_v28 = vmov %v7683_v5  ;;  %v5352_v19 = vpop.eup %5351  ;;  %5361 = vtanh.f32 %v2297_v56 }
 0x6c1   : > { %v2283_v9 = vadd.f32 %v2267_v26, %v6685_v48  ;;  %v2678_v35 = vadd.f32 %v7684_v28, %v2677_v18  ;;  %v2325_v34 = vadd.f32 1.0, %v5352_v19  ;;  %5363 = vpow2.f32 %v4709_v57  ;;  %v2681_v12 = vpop.f32.mrb[36].mxu1 }
 0x6c2   : > { %v2284_v59 = vadd.f32 %v2268_v1, %v6690_v10  ;;  %v4710_v39 = vmul.f32 -1.442695, %v2676_v41  ;;  %v5354_v8 = vpop.eup %5353  ;;  %v2336_v26 = vmul.f32 0.5, %v2320_v15  ;;  %v2350_v50 = vmul.f32 %v2334_v33, %v6595_v46  ;;  %v2683_v49 = vpop.f32.mrb[37].mxu1 }
 0x6c3   : > { %v2299_v54 = vmul.f32 0.7978846, %v2283_v9  ;;  %v4711_v51 = vmul.f32 -1.442695, %v2678_v35  ;;  %v2355_v18 = vmul.f32 %v2339_v29, %v6622_v17  ;;  %v2341_v56 = vmul.f32 0.5, %v2325_v34  ;;  %v2685_v5 = vpop.f32.mrb[38].mxu1  ;;  %v6714_v43 = vpop.eup %5355 }
 0x6c4   : > { %5365 = vpow2.f32 %v4710_v39  ;;  %v2300_v1 = vmul.f32 0.7978846, %v2284_v59  ;;  %v2352_v52 = vmul.f32 %v2336_v26, %v6603_v21  ;;  %v2365_v57 = vadd.f32 %v6681_v62, %v6332_v3  ;;  %v2687_v20 = vpop.f32.mrb[39].mxu1 }
 0x6c5   : > { %5367 = vtanh.f32 %v2298_v36  ;;  %v2367_v41 = vadd.f32 %v2351_v2, %v6326_v61  ;;  %v2327_v15 = vadd.f32 1.0, %v5354_v8  ;;  %v2366_v46 = vadd.f32 %v2350_v50, %v6335_v24  ;;  %v5358_v28 = vpop.eup %5357 }
 0x6c6   : > { %5369 = vtanh.f32 %v2299_v54  ;;  %v2682_v29 = vadd.f32 %v2681_v12, %v6581_v32  ;;  %v2368_v17 = vadd.f32 %v2352_v52, %v6338_v45  ;;  %v2684_v9 = vadd.f32 %v2683_v49, %v6581_v32 }
 0x6c7   : > { %5371 = vpow2.f32 %v4711_v51  ;;  %v2381_v36 = vpack.c.bf16 %v2367_v41, %v2365_v57  ;;  %v2686_v21 = vadd.f32 %v2685_v5, %v6585_v63  ;;  %v2688_v61 = vadd.f32 %v2687_v20, %v6585_v63 }
 0x6c8   : > { %5373 = vtanh.f32 %v2300_v1  ;;  %v4712_v3 = vmul.f32 -1.442695, %v2682_v29  ;;  %v2322_v2 = vadd.f32 1.0, %v5348_v55  ;;  %v2382_v62 = vpack.c.bf16 %v2368_v17, %v2366_v46 }
 0x6c9   : > { %v4713_v35 = vmul.f32 -1.442695, %v2684_v9  ;;  %v4714_v19 = vmul.f32 -1.442695, %v2686_v21  ;;  %v2324_v59 = vadd.f32 1.0, %v5350_v22  ;;  %v5360_v24 = vpop.eup %5359  ;;  %v2343_v39 = vmul.f32 0.5, %v2327_v15 }
 0x6ca   : > { %5375 = vpow2.f32 %v4712_v3  ;;  %v4715_v33 = vmul.f32 -1.442695, %v2688_v61  ;;  %v2338_v45 = vmul.f32 0.5, %v2322_v2  ;;  %v2691_v34 = vpop.f32.mrb[40].mxu1  ;;  %v5362_v54 = vpop.eup %5361  ;;  %v2758_v32 = vadd.f32 1.0, %v5360_v24  ;;  %2398 = vmatprep.subr.bf16.mxu0 %v2382_v62 }
 0x6cb   : > { %5377 = vpow2.f32 %v4713_v35  ;;  %v2340_v51 = vmul.f32 0.5, %v2324_v59  ;;  %v2693_v12 = vpop.f32.mrb[41].mxu1  ;;  %v5364_v8 = vpop.eup %5363  ;;  %v2357_v63 = vmul.f32 %v2341_v56, %v6641_v53  ;;  %2399 = vmatpush1.bf16.msra.mxu0 %v2381_v36  ;;  %v2371_v22 = vadd.f32 %v2355_v18, %v6371_v44 }
 0x6cc   : > { %5379 = vpow2.f32 %v4714_v19  ;;  %v2354_v55 = vmul.f32 %v2338_v45, %v6617_v7  ;;  %v2695_v26 = vpop.f32.mrb[42].mxu1  ;;  %v2759_v49 = vadd.f32 1.0, %v5364_v8  ;;  %v2369_v5 = vadd.f32 %v2353_v58, %v6341_v27 }
 0x6cd   : > { %v2356_v1 = vmul.f32 %v2340_v51, %v6626_v60  ;;  %v2692_v52 = vadd.f32 %v2691_v34, %v6583_v40  ;;  %v2697_v57 = vpop.f32.mrb[43].mxu1  ;;  %v2359_v53 = vmul.f32 %v2343_v39, %v6649_v4  ;;  %v2329_v56 = vadd.f32 1.0, %v5362_v54 }
 0x6ce   : > { %v5366_v50 = vpop.eup %5365  ;;  %5381 = vpow2.f32 %v4715_v33  ;;  %v2370_v44 = vadd.f32 %v2354_v55, %v6346_v38  ;;  %v2383_v15 = vpack.c.bf16 %v2371_v22, %v2369_v5  ;;  %v2694_v58 = vadd.f32 %v2693_v12, %v6583_v40 }
 0x6cf   : > { %v6728_v41 = vpop.eup %5367  ;;  %v2760_v20 = vadd.f32 1.0, %v5366_v50  ;;  %5383 = vrcp.f32 %v2758_v32  ;;  %v2372_v18 = vadd.f32 %v2356_v1, %v6379_v31  ;;  %v4716_v27 = vmul.f32 -1.442695, %v2692_v52 }
 0x6d0   : > { %v5370_v7 = vpop.eup %5369  ;;  %v2696_v46 = vadd.f32 %v2695_v26, %v6589_v0  ;;  %v2698_v17 = vadd.f32 %v2697_v57, %v6589_v0  ;;  %v4717_v9 = vmul.f32 -1.442695, %v2694_v58  ;;  %v2326_v31 = vadd.f32 1.0, %v6714_v43 }
 0x6d1   : > { %v5372_v60 = vpop.eup %5371  ;;  %5385 = vrcp.f32 %v2760_v20  ;;  %v2384_v4 = vpack.c.bf16 %v2372_v18, %v2370_v44  ;;  %v2701_v21 = vpop.f32.mrb[44].mxu1  ;;  %v2331_v3 = vadd.f32 1.0, %v5370_v7  ;;  %v2328_v40 = vadd.f32 1.0, %v5358_v28 }
 0x6d2   : > { %5387 = vrcp.f32 %v2759_v49  ;;  %v2761_v29 = vadd.f32 1.0, %v5372_v60  ;;  %v6736_v36 = vpop.eup %5373  ;;  %v4718_v38 = vmul.f32 -1.442695, %v2696_v46  ;;  %v4719_v61 = vmul.f32 -1.442695, %v2698_v17  ;;  %v2703_v2 = vpop.f32.mrb[45].mxu1 }
 0x6d3   : > { %5389 = vpow2.f32 %v4716_v27  ;;  %2400 = vmatprep.subr.bf16.mxu0 %v2384_v4  ;;  %v2342_v35 = vmul.f32 0.5, %v2326_v31  ;;  %v2373_v0 = vadd.f32 %v2357_v63, %v6390_v42  ;;  %v2375_v19 = vadd.f32 %v2359_v53, %v6402_v37  ;;  %v2705_v59 = vpop.f32.mrb[46].mxu1  ;;  %v7685_v46 = vld [vmem:[#allocation20_spill] sm:$0xff] }
 0x6d4   : > { %5391 = vrcp.f32 %v2761_v29  ;;  %v5376_v62 = vpop.eup %5375  ;;  %2401 = vmatpush1.bf16.msra.mxu0 %v2383_v15  ;;  %v2344_v43 = vmul.f32 0.5, %v2328_v40  ;;  %v2702_v33 = vadd.f32 %v2701_v21, %v6587_v14  ;;  %v2707_v45 = vpop.f32.mrb[47].mxu1  ;;  %v2345_v8 = vmul.f32 0.5, %v2329_v56  ;;  %v7688_v40 = vld [vmem:[#allocation24_spill] sm:$0xff] }
 0x6d5   : > { %5393 = vpow2.f32 %v4717_v9  ;;  %v5378_v24 = vpop.eup %5377  ;;  %v2762_v39 = vadd.f32 1.0, %v5376_v62  ;;  %v2358_v28 = vmul.f32 %v2342_v35, %v6644_v13  ;;  %v2385_v32 = vpack.c.bf16 %v2375_v19, %v2373_v0  ;;  %v7687_v9 = vld [vmem:[#allocation23_spill] sm:$0xff]  ;;  %v7689_v62 = vld [vmem:[#allocation18_spill] sm:$0xff] }
 0x6d6   : > { %5395 = vpow2.f32 %v4718_v38  ;;  %v5380_v34 = vpop.eup %5379  ;;  %v2763_v54 = vadd.f32 1.0, %v5378_v24  ;;  %v2360_v42 = vmul.f32 %v2344_v43, %v6654_v30  ;;  %v4720_v12 = vmul.f32 -1.442695, %v2702_v33  ;;  %v7690_v0 = vld [vmem:[#allocation19_spill] sm:$0xff] }
 0x6d7   : > { %5397 = vpow2.f32 %v4719_v61  ;;  %v2764_v51 = vadd.f32 1.0, %v5380_v34  ;;  %v2374_v63 = vadd.f32 %v2358_v28, %v6395_v16  ;;  %v2704_v55 = vadd.f32 %v2703_v2, %v6587_v14 }
 0x6d8   : > { %5399 = vrcp.f32 %v2762_v39  ;;  %v5382_v37 = vpop.eup %5381  ;;  %v2376_v50 = vadd.f32 %v2360_v42, %v6409_v6  ;;  %v2706_v13 = vadd.f32 %v2705_v59, %v6591_v47  ;;  %v2347_v1 = vmul.f32 0.5, %v2331_v3  ;;  %v7692_v42 = vld [vmem:[#allocation14_spill] sm:$0xff] }
 0x6d9   : > { %5401 = vrcp.f32 %v2763_v54  ;;  %v5384_v22 = vpop.eup %5383  ;;  %v2765_v26 = vadd.f32 1.0, %v5382_v37  ;;  %v4721_v5 = vmul.f32 -1.442695, %v2704_v55  ;;  %v2708_v14 = vadd.f32 %v2707_v45, %v6591_v47  ;;  %v7686_v47 = vld [vmem:[#allocation22_spill] sm:$0xff]  ;;  %v7691_v45 = vld [vmem:[#allocation25_spill] sm:$0xff]  ;;  %v7693_v37 = vld [vmem:[#allocation15_spill] sm:$0xff] }
 0x6da   : > { %5403 = vrcp.f32 %v2764_v51  ;;  %v2386_v52 = vpack.c.bf16 %v2376_v50, %v2374_v63  ;;  %v4722_v57 = vmul.f32 -1.442695, %v2706_v13  ;;  %v2330_v56 = vadd.f32 1.0, %v6728_v41 }
 0x6db   : > { %v5386_v49 = vpop.eup %5385  ;;  %5405 = vpow2.f32 %v4720_v12  ;;  %v2361_v20 = vmul.f32 %v2345_v8, %v6667_v23  ;;  %v2363_v18 = vmul.f32 %v2347_v1, %v6685_v48  ;;  %v4723_v15 = vmul.f32 -1.442695, %v2708_v14 }
 0x6dc   : > { %v5388_v30 = vpop.eup %5387  ;;  %5407 = vrcp.f32 %v2765_v26  ;;  %v6749_v16 = vmul.f32 %v5386_v49, %v7656_v25  ;;  %2402 = vmatprep.subr.bf16.mxu0 %v2386_v52  ;;  %v2332_v60 = vadd.f32 1.0, %v6736_v36  ;;  %v2346_v27 = vmul.f32 0.5, %v2330_v56  ;;  %v7694_v26 = vld [vmem:[#allocation26_spill] sm:$0xff] }
 0x6dd   : > { %v5390_v53 = vpop.eup %5389  ;;  %5409 = vpow2.f32 %v4721_v5  ;;  %2403 = vmatpush1.bf16.msra.mxu0 %v2385_v32  ;;  %v6757_v29 = vmul.f32 %v5384_v22, %v7685_v46  ;;  %v6760_v41 = vmul.f32 %v5388_v30, %v7686_v47  ;;  %v2377_v35 = vadd.f32 %v2361_v20, %v7689_v62  ;;  %v4733_v30 = vld [vmem:[%s7512_s2 + $0xe4] sm:$0xff]  }
 0x6de   : > { %v5392_v6 = vpop.eup %5391  ;;  %v2766_v7 = vadd.f32 1.0, %v5390_v53  ;;  %5411 = vpow2.f32 %v4722_v57  ;;  %v2852_v17 = vmul.f32 %v6749_v16, %v6749_v16  ;;  %v2348_v21 = vmul.f32 0.5, %v2332_v60  ;;  %v7695_v57 = vld [vmem:[#allocation27_spill] sm:$0xff] }
 0x6df   : > { %v5394_v44 = vpop.eup %5393  ;;  %v6765_v48 = vmul.f32 %v5392_v6, %v7687_v9  ;;  %v2362_v3 = vmul.f32 %v2346_v27, %v6673_v11  ;;  %v2379_v19 = vadd.f32 %v2363_v18, %v7690_v0  ;;  %v2850_v24 = vmul.f32 %v6757_v29, %v6757_v29  ;;  %v6812_v27 = vld [vmem:[%s7512_s2 + $0x94] sm:$0xf] }
 0x6e0   : > { %v5396_v58 = vpop.eup %5395  ;;  %5413 = vrcp.f32 %v2766_v7  ;;  %v2767_v23 = vadd.f32 1.0, %v5394_v44  ;;  %v2364_v39 = vmul.f32 %v2348_v21, %v6690_v10  ;;  %v2822_v11 = vadd.f32 %v6749_v16, %v6757_v29 }
 0x6e1   : > { %v5398_v4 = vpop.eup %5397  ;;  %v2768_v38 = vadd.f32 1.0, %v5396_v58  ;;  %5415 = vpow2.f32 %v4723_v15  ;;  %v2853_v33 = vmul.f32 %v6765_v48, %v6765_v48  ;;  %v2387_v54 = vpack.c.bf16 %v2379_v19, %v2377_v35  ;;  %v7696_v15 = vld [vmem:[#allocation28_spill] sm:$0xff]  ;;  %v7698_v19 = vld [vmem:[#allocation30_spill] sm:$0xff] }
 0x6e2   : > { %v5400_v36 = vpop.eup %5399  ;;  %5417 = vrcp.f32 %v2767_v23  ;;  %v2769_v31 = vadd.f32 1.0, %v5398_v4  ;;  %v2378_v12 = vadd.f32 %v2362_v3, %v7692_v42  ;;  %v2380_v10 = vadd.f32 %v2364_v39, %v7693_v37 }
 0x6e3   : > { %v5402_v61 = vpop.eup %5401  ;;  %v6769_v2 = vmul.f32 %v5400_v36, %v7688_v40  ;;  %5419 = vrcp.f32 %v2768_v38  ;;  %v2851_v63 = vmul.f32 %v6760_v41, %v6760_v41  ;;  %v2866_v55 = vadd.f32 %v2852_v17, %v2850_v24 }
 0x6e4   : > { %v5404_v59 = vpop.eup %5403  ;;  %5421 = vrcp.f32 %v2769_v31  ;;  %v6781_v34 = vmul.f32 %v5402_v61, %v7691_v45  ;;  %v2835_v22 = vadd.f32 %v6765_v48, %v6760_v41  ;;  %v2388_v5 = vpack.c.bf16 %v2380_v10, %v2378_v12  ;;  %v7697_v61 = vld [vmem:[#allocation29_spill] sm:$0xff] }
 0x6e5   : > { %v5406_v43 = vpop.eup %5405  ;;  %v2854_v32 = vmul.f32 %v6769_v2, %v6769_v2  ;;  %v6792_v50 = vmul.f32 %v5404_v59, %v7694_v26  ;;  %v2823_v49 = vadd.f32 %v2822_v11, %v6769_v2  ;;  %v2879_v6 = vadd.f32 %v2853_v33, %v2851_v63  ;;  %v7699_v33 = vld [vmem:[#allocation31_spill] sm:$0xff] }
 0x6e6   : > { %v5408_v28 = vpop.eup %5407  ;;  %v2770_v51 = vadd.f32 1.0, %v5406_v43  ;;  %v2855_v52 = vmul.f32 %v6781_v34, %v6781_v34  ;;  %v2836_v7 = vadd.f32 %v2835_v22, %v6781_v34  ;;  %2404 = vmatprep.subr.bf16.mxu0 %v2388_v5  ;;  %v3419_v58 = vunpack.c.l.bf16 %v4733_v30 }
 0x6e7   : > { %v5410_v8 = vpop.eup %5409  ;;  %v6801_v53 = vmul.f32 %v5408_v28, %v7695_v57  ;;  %v2867_v20 = vadd.f32 %v2866_v55, %v2854_v32  ;;  %v2856_v18 = vmul.f32 %v6792_v50, %v6792_v50  ;;  %2405 = vmatpush1.bf16.msra.mxu0 %v2387_v54  ;;  %v2824_v4 = vadd.f32 %v2823_v49, %v6792_v50  ;;  %v4735_v32 = vld [vmem:[%s7512_s2 + $0xec] sm:$0xff]  }
 0x6e8   : > { %v5412_v13 = vpop.eup %5411  ;;  %5423 = vrcp.f32 %v2770_v51  ;;  %v2771_v1 = vadd.f32 1.0, %v5410_v8  ;;  %v3420_v38 = vunpack.c.h.bf16 %v4733_v30  ;;  %v2880_v31 = vadd.f32 %v2879_v6, %v2855_v52  ;;  %v7701_v49 = vld [vmem:[#allocation32_spill] sm:$0xff] }
 0x6e9   : > { %v2772_v14 = vadd.f32 1.0, %v5412_v13  ;;  %v2857_v21 = vmul.f32 %v6801_v53, %v6801_v53  ;;  %v2837_v0 = vadd.f32 %v2836_v7, %v6801_v53  ;;  %v2868_v39 = vadd.f32 %v2867_v20, %v2856_v18  ;;  %v7703_v7 = vld [vmem:[#allocation33_spill] sm:$0xff]  ;;  %v7704_v18 = vld [vmem:[#allocation34_spill] sm:$0xff] }
 0x6ea   : > { %v5414_v56 = vpop.eup %5413  ;;  %5425 = vrcp.f32 %v2771_v1  ;;  %4680 = vmatmul.mubr.msk.bf16.vlgmr.msra.gmra.mrb[36].mxu0 %vm1056_vm6, %v6812_v27  ;;  %v6828_v24 = vpack.i.bf16 %v3420_v38, %v3419_v58  ;;  %v7700_v28 = vmov 0   ;;  %v3634_v8 = vunpack.c.l.bf16 %v4735_v32 }
 0x6eb   : > { %v5416_v44 = vpop.eup %5415  ;;  %v6807_v60 = vmul.f32 %v5414_v56, %v7696_v15  ;;  %5427 = vrcp.f32 %v2772_v14  ;;  %3056 = vmatprep.mubr.bf16.mxu0 %v7700_v28  ;;  %v2881_v42 = vadd.f32 %v2880_v31, %v2857_v21  ;;  %v3635_v63 = vunpack.c.h.bf16 %v4735_v32  ;;  %v4739_v31 = vld [vmem:[%s7512_s2 + $0xfc] sm:$0xf] }
 0x6ec   : > { %v5418_v23 = vpop.eup %5417  ;;  %v2773_v17 = vadd.f32 1.0, %v5416_v44  ;;  %4994 = vperm.xlu0 %4992, %v6828_v24   ;;  %v7702_v52 = vmov 3   ;;  %5000 = vperm.xlu1 %4998, %v6828_v24  }
 0x6ed   : > { %v5420_v36 = vpop.eup %5419  ;;  %v2858_v3 = vmul.f32 %v6807_v60, %v6807_v60  ;;  %v6820_v62 = vmul.f32 %v5418_v23, %v7697_v61  ;;  %v2825_v43 = vadd.f32 %v2824_v4, %v6807_v60  ;;  %v5029_v23 = vpack.i.bf16 %v3635_v63, %v3634_v8  ;;  %v4743_v8 = vld [vmem:[%s7512_s2 + $0x10c] sm:$0xff]  }
 0x6ee   : > { %v5422_v35 = vpop.eup %5421  ;;  %v6824_v59 = vmul.f32 %v5420_v36, %v7698_v19  ;;  %5429 = vrcp.f32 %v2773_v17 }
 0x6ef   : > { %v2859_v11 = vmul.f32 %v6820_v62, %v6820_v62  ;;  %v6834_v54 = vmul.f32 %v5422_v35, %v7699_v33  ;;  %v2838_v51 = vadd.f32 %v2837_v0, %v6820_v62  ;;  %v2869_v12 = vadd.f32 %v2868_v39, %v2858_v3  ;;  %v7705_v39 = vld [vmem:[#allocation35_spill] sm:$0xff] }
 0x6f0   : > { %v2860_v37 = vmul.f32 %v6824_v59, %v6824_v59  ;;  %v2826_v22 = vadd.f32 %v2825_v43, %v6824_v59  ;;  %5010 = vset.pattern.permute.xlu0 %v7702_v52 }
 0x6f1   : > { %v2882_v55 = vadd.f32 %v2881_v42, %v2859_v11  ;;  %v2861_v13 = vmul.f32 %v6834_v54, %v6834_v54  ;;  %v2839_v30 = vadd.f32 %v2838_v51, %v6834_v54  ;;  %5012 = vperm.xlu0 %5010, %v6828_v24   ;;  %v7706_v11 = vmov 64  }
 0x6f2   : > { %v5424_v10 = vpop.eup %5423  ;;  %v2870_v56 = vadd.f32 %v2869_v12, %v2860_v37  ;;  %v3638_v42 = vunpack.c.l.bf16 %v4739_v31  ;;  %v4741_v12 = vld [vmem:[%s7512_s2 + $0x104] sm:$0xf] }
 0x6f3   : > { %v6848_v1 = vmul.f32 %v5424_v10, %v7701_v49  ;;  %v2883_v4 = vadd.f32 %v2882_v55, %v2861_v13 }
 0x6f4   : > { %v5426_v5 = vpop.eup %5425 }
 0x6f5   : > { %v5428_v14 = vpop.eup %5427  ;;  %v2827_v6 = vadd.f32 %v2826_v22, %v6848_v1  ;;  %v2862_v20 = vmul.f32 %v6848_v1, %v6848_v1  ;;  %v6856_v44 = vmul.f32 %v5426_v5, %v7703_v7  ;;  %5028 = vset.pattern.permute.xlu0 %v7706_v11  ;;  %v3640_v5 = vunpack.c.l.bf16 %v4741_v12 }
 0x6f6   : > { %v6860_v58 = vmul.f32 %v5428_v14, %v7704_v18  ;;  %5030 = vperm.xlu0 %5028, %v5029_v23   ;;  %v4021_v14 = vunpack.c.l.bf16 %v4743_v8 }
 0x6f7   : > { %v2871_v17 = vadd.f32 %v2870_v56, %v2862_v20  ;;  %v2840_v38 = vadd.f32 %v2839_v30, %v6856_v44  ;;  %v2863_v36 = vmul.f32 %v6856_v44, %v6856_v44  ;;  %v4022_v56 = vunpack.c.h.bf16 %v4743_v8 }
 0x6f8   : > { %v5430_v21 = vpop.eup %5429  ;;  %v2828_v3 = vadd.f32 %v2827_v6, %v6860_v58  ;;  %v2864_v35 = vmul.f32 %v6860_v58, %v6860_v58  ;;  %v4747_v6 = vld [vmem:[%s7512_s2 + $0x11c] sm:$0xff]  }
 0x6f9   : > { %v2884_v0 = vadd.f32 %v2883_v4, %v2863_v36  ;;  %v6872_v43 = vmul.f32 %v5430_v21, %v7705_v39  ;;  %v4025_v31 = vunpack.c.l.bf16 %v4747_v6 }
 0x6fa   : > { %v2829_v32 = vrot.slane %v2828_v3, 4  ;;  %v2872_v51 = vadd.f32 %v2871_v17, %v2864_v35  ;;  %3664 = vperm.xlu0 %5028, %v3638_v42   ;;  %v5034_v35 = vpack.i.bf16 %v4022_v56, %v4021_v14  ;;  %v4751_v42 = vld [vmem:[%s7512_s2 + $0x12c] sm:$0xf] }
 0x6fb   : > { %v2841_v37 = vadd.f32 %v2840_v38, %v6872_v43  ;;  %v2865_v10 = vmul.f32 %v6872_v43, %v6872_v43 }
 0x6fc   : > { %v2830_v63 = vadd.f32 %v2829_v32, %v2828_v3  ;;  %v2873_v55 = vrot.slane %v2872_v51, 4 }
 0x6fd   : > { %v2842_v22 = vrot.slane %v2841_v37, 4  ;;  %v2885_v13 = vadd.f32 %v2884_v0, %v2865_v10  ;;  %v4026_v0 = vunpack.c.h.bf16 %v4747_v6 }
 0x6fe   : > { %v2831_v30 = vrot.slane %v2830_v63, 2  ;;  %v2874_v52 = vadd.f32 %v2873_v55, %v2872_v51  ;;  %3674 = vperm.xlu0 %5028, %v3640_v5   ;;  %v4342_v5 = vunpack.c.l.bf16 %v4751_v42 }
 0x6ff   : > { %v2843_v20 = vadd.f32 %v2842_v22, %v2841_v37  ;;  %v2886_v23 = vrot.slane %v2885_v13, 4 }
 0x700   : > { %v2832_v4 = vadd.f32 %v2831_v30, %v2830_v63  ;;  %v2875_v17 = vrot.slane %v2874_v52, 2  ;;  %v2389_v63 = vunpack.c.l.bf16 %v6812_v27 }
 0x701   : > { %v2844_v38 = vrot.slane %v2843_v20, 2  ;;  %v2887_v36 = vadd.f32 %v2886_v23, %v2885_v13  ;;  %v5044_v13 = vpack.i.bf16 %v4026_v0, %v4025_v31 }
 0x702   : > { %v2833_v21 = vrot.slane %v2832_v4, 1  ;;  %v2876_v3 = vadd.f32 %v2875_v17, %v2874_v52  ;;  %5035 = vperm.xlu0 %5028, %v5034_v35  }
 0x703   : > { %v2845_v32 = vadd.f32 %v2844_v38, %v2843_v20  ;;  %v2888_v51 = vrot.slane %v2887_v36, 2 }
 0x704   : > { %v2834_v12 = vadd.f32 %v2833_v21, %v2832_v4  ;;  %v2877_v10 = vrot.slane %v2876_v3, 1  ;;  %v5054_v4 = vpack.i.bf16 %v4342_v5, %v2389_v63 }
 0x705   : > { %v2846_v37 = vrot.slane %v2845_v32, 1  ;;  %v2889_v8 = vadd.f32 %v2888_v51, %v2887_v36 }
 0x706   : > { %v6891_v55 = vmul.f32 0.015625, %v2834_v12  ;;  %v2878_v22 = vadd.f32 %v2877_v10, %v2876_v3  ;;  %5045 = vperm.xlu0 %5028, %v5044_v13  }
 0x707   : > { %v2847_v30 = vadd.f32 %v2846_v37, %v2845_v32  ;;  %v2890_v52 = vrot.slane %v2889_v8, 1 }
 0x708   : > { %v2892_v14 = vmul.f32 0.015625, %v2878_v22  ;;  %v2894_v56 = vmul.f32 %v6891_v55, %v6891_v55  ;;  %v2904_v0 = vsub.f32 %v6757_v29, %v6891_v55  ;;  %v2906_v32 = vsub.f32 %v6749_v16, %v6891_v55 }
 0x709   : > { %v2849_v6 = vmul.f32 0.015625, %v2847_v30  ;;  %v2891_v20 = vadd.f32 %v2890_v52, %v2889_v8  ;;  %v2908_v52 = vsub.f32 %v6769_v2, %v6891_v55 }
 0x70a   : > { %v2896_v23 = vsub.f32 %v2892_v14, %v2894_v56  ;;  %5055 = vperm.xlu0 %5028, %v5054_v4   ;;  %v2910_v14 = vsub.f32 %v6792_v50, %v6891_v55 }
 0x70b   : > { %v2893_v17 = vmul.f32 0.015625, %v2891_v20  ;;  %v2895_v38 = vmul.f32 %v2849_v6, %v2849_v6  ;;  %v2905_v51 = vsub.f32 %v6760_v41, %v2849_v6  ;;  %v2907_v42 = vsub.f32 %v6765_v48, %v2849_v6 }
 0x70c   : > { %v2898_v27 = vmax.f32 %v2896_v23, 0.0  ;;  %v2909_v12 = vsub.f32 %v6781_v34, %v2849_v6  ;;  %v2911_v10 = vsub.f32 %v6801_v53, %v2849_v6  ;;  %v2913_v20 = vsub.f32 %v6820_v62, %v2849_v6 }
 0x70d   : > { %v2897_v36 = vsub.f32 %v2893_v17, %v2895_v38  ;;  %v2915_v23 = vsub.f32 %v6834_v54, %v2849_v6 }
 0x70e   : > { %v2900_v21 = vadd.f32 1e-05, %v2898_v27 }
 0x70f   : > { %v2899_v3 = vmax.f32 %v2897_v36, 0.0 }
 0x710   : > { %5431 = vrsqrt.f32 %v2900_v21 }
 0x711   : > { %v2901_v31 = vadd.f32 1e-05, %v2899_v3  ;;  %v2912_v3 = vsub.f32 %v6807_v60, %v6891_v55 }
 0x713   : > { %5433 = vrsqrt.f32 %v2901_v31  ;;  %v2914_v31 = vsub.f32 %v6824_v59, %v6891_v55 }
 0x71a   : > { %v5432_v35 = vpop.eup %5431 }
 0x71b   : > { %v2920_v8 = vmul.f32 %v5432_v35, %v2904_v0  ;;  %v2922_v63 = vmul.f32 %v5432_v35, %v2906_v32  ;;  %v2924_v17 = vmul.f32 %v5432_v35, %v2908_v52  ;;  %v2926_v38 = vmul.f32 %v5432_v35, %v2910_v14 }
 0x71c   : > { %v2917_v0 = vsub.f32 %v6856_v44, %v2849_v6  ;;  %v2919_v32 = vsub.f32 %v6872_v43, %v2849_v6 }
 0x71d   : > { %v5434_v37 = vpop.eup %5433  ;;  %v2936_v4 = vpack.c.bf16 %v2922_v63, %v2920_v8 }
 0x71e   : > { %v2921_v22 = vmul.f32 %v5434_v37, %v2905_v51  ;;  %v2923_v13 = vmul.f32 %v5434_v37, %v2907_v42  ;;  %v2925_v5 = vmul.f32 %v5434_v37, %v2909_v12  ;;  %v2927_v30 = vmul.f32 %v5434_v37, %v2911_v10 }
 0x71f   : > { %v2929_v36 = vmul.f32 %v5434_v37, %v2913_v20  ;;  %v2931_v21 = vmul.f32 %v5434_v37, %v2915_v23  ;;  %v2938_v51 = vpack.c.bf16 %v2926_v38, %v2924_v17  ;;  %v2928_v42 = vmul.f32 %v5432_v35, %v2912_v3  ;;  %v6939_v20 = vpop.permute.xlu0 %4978 }
 0x720   : > { %v2937_v56 = vpack.c.bf16 %v2923_v13, %v2921_v22  ;;  %v2939_v27 = vpack.c.bf16 %v2927_v30, %v2925_v5  ;;  %v2930_v12 = vmul.f32 %v5432_v35, %v2914_v31  ;;  %v2933_v8 = vmul.f32 %v5434_v37, %v2917_v0 }
 0x721   : > { %v2941_v10 = vpack.c.bf16 %v2931_v21, %v2929_v36  ;;  %v2935_v63 = vmul.f32 %v5434_v37, %v2919_v32  ;;  %v2916_v22 = vsub.f32 %v6848_v1, %v6891_v55  ;;  %v2918_v13 = vsub.f32 %v6860_v58, %v6891_v55  ;;  %v5599_v55 = vld [vmem:[%s7512_s2 + $0xc8] sm:$0xff]   ;;  %v5601_v37 = vld [vmem:[%s7512_s2 + $0xd8] sm:$0xff]  }
 0x722   : > { %3024 = vmatprep.subr.bf16.mxu0 %v2937_v56  ;;  %v2940_v5 = vpack.c.bf16 %v2930_v12, %v2928_v42  ;;  %v5598_v56 = vld [vmem:[%s7512_s2 + $0xc0] sm:$0xff]  }
 0x723   : > { %3025 = vmatpush1.bf16.msra.mxu0 %v2936_v4  ;;  %v2932_v30 = vmul.f32 %v5432_v35, %v2916_v22  ;;  %v2934_v52 = vmul.f32 %v5432_v35, %v2918_v13  ;;  %v2943_v14 = vpack.c.bf16 %v2935_v63, %v2933_v8  ;;  %v5600_v35 = vld [vmem:[%s7512_s2 + $0xd0] sm:$0xff]   ;;  %v6941_v23 = vpop.permute.xlu0 %4988  ;;  %v7710_v13 = vmov 2  }
 0x724   : > { %3026 = vmatprep.subr.bf16.mxu0 %v2939_v27  ;;  %5004 = vset.pattern.permute.xlu1 %v7710_v13 }
 0x725   : > { %v2942_v6 = vpack.c.bf16 %v2934_v52, %v2932_v30  ;;  %5006 = vperm.xlu1 %5004, %v6828_v24   ;;  %v6970_v30 = vld [vmem:[%s7512_s2 + $0xf4] sm:$0xff]  }
 0x726   : > { %v3636_v52 = vunpack.c.l.bf16 %v6970_v30 }
 0x727   : > { %3027 = vmatpush1.bf16.msra.mxu0 %v2938_v51 }
 0x728   : > { %3028 = vmatprep.subr.bf16.mxu0 %v2941_v10 }
 0x72b   : > { %3029 = vmatpush1.bf16.msra.mxu0 %v2940_v5  ;;  %v7711_v5 = vmov 4  }
 0x72c   : > { %3030 = vmatprep.subr.bf16.mxu0 %v2943_v14  ;;  %5016 = vset.pattern.permute.xlu1 %v7711_v5  ;;  %v3637_v14 = vunpack.c.h.bf16 %v6970_v30 }
 0x72d   : > { %5018 = vperm.xlu1 %5016, %v6828_v24  }
 0x72f   : > { %3031 = vmatpush1.bf16.msra.mxu0 %v2942_v6  ;;  %v6979_v6 = vld [vmem:[%s7512_s2 + $0x100] sm:$0xf] }
 0x731   : > { %5022 = vset.pattern.permute.xlu1 %v7706_v11 }
 0x732   : > { %4728 = vmatmul.mubr.msk.bf16.vlgmr.msra.gmra.mrb[40].mxu0 %vm1056_vm6, %v5598_v56  ;;  %5024 = vperm.xlu1 %5022, %v6828_v24   ;;  %v3639_v56 = vunpack.c.l.bf16 %v6979_v6  ;;  %v4745_v24 = vld [vmem:[%s7512_s2 + $0x114] sm:$0xff]  }
 0x733   : > { %3066 = vmatprep.mubr.bf16.mxu0 %v7700_v28 }
 0x736   : > { %3654 = vperm.xlu1 %5022, %v3636_v52  }
 0x73a   : > { %4729 = vmatmul.mubr.msk.bf16.gmra.mrb[44].mxu0 %vm1056_vm6, %v5599_v55  ;;  %3659 = vperm.xlu1 %5022, %v3637_v14   ;;  %v6985_v55 = vld [vmem:[%s7512_s2 + $0x108] sm:$0xf] }
 0x73b   : > { %3076 = vmatprep.mubr.bf16.mxu0 %v7700_v28  ;;  %v3641_v11 = vunpack.c.l.bf16 %v6985_v55 }
 0x73e   : > { %3669 = vperm.xlu1 %5022, %v3639_v56  }
 0x742   : > { %4730 = vmatmul.mubr.msk.bf16.gmra.mrb[48].mxu0 %vm1056_vm6, %v5600_v35  ;;  %v4023_v35 = vunpack.c.l.bf16 %v4745_v24  ;;  %3679 = vperm.xlu1 %5022, %v3641_v11  }
 0x743   : > { %3086 = vmatprep.mubr.bf16.mxu0 %v7700_v28 }
 0x74a   : > { %4731 = vmatmul.mubr.msk.bf16.gmra.mrb[52].mxu0 %vm1056_vm6, %v5601_v37  ;;  %v4024_v37 = vunpack.c.h.bf16 %v4745_v24 }
 0x74b   : > { %4133 = vmatprep.mubr.bf16.mxu0 %v7700_v28 }
 0x76b   : > { %v6943_v4 = vpop.permute.xlu0 %4994 }
 0x770   : > { %v6945_v17 = vpop.permute.xlu0 %5012 }
 0x775   : > { %v6947_v38 = vpop.permute.xlu0 %5030 }
 0x779   : > { %v6949_v27 = vpop.permute.xlu0 %3664 }
 0x77d   : > { %v6951_v36 = vpop.permute.xlu0 %3674 }
 0x781   : > { %v6953_v21 = vpop.permute.xlu0 %5035 }
 0x782   : > { %7707 = vst [vmem:[#allocation16_spill] sm:$0xff] %v6953_v21 }
 0x785   : > { %v6955_v3 = vpop.permute.xlu0 %5045 }
 0x786   : > { %7708 = vst [vmem:[#allocation17_spill] sm:$0xff] %v6955_v3 }
 0x789   : > { %v6957_v31 = vpop.permute.xlu0 %5055 }
 0x78a   : > { %7709 = vst [vmem:[#allocation18_spill] sm:$0xff] %v6957_v31  ;;  %v5057_v0 = vunpack.i.l.bf16 %v6957_v31 }
 0x7bd   : > { %v2432_v32 = vpop.f32.mrb[36].mxu0 }
 0x7be   : > { %v2433_v51 = vadd.f32 %v5057_v0, %v2432_v32  ;;  %v2434_v42 = vpop.f32.mrb[37].mxu0  ;;  %v5039_v32 = vpack.i.bf16 %v4024_v37, %v4023_v35 }
 0x7bf   : > { %v2435_v12 = vadd.f32 %v5057_v0, %v2434_v42  ;;  %v2436_v10 = vpop.f32.mrb[38].mxu0  ;;  %v4749_v0 = vld [vmem:[%s7512_s2 + $0x124] sm:$0xff]  }
 0x7c0   : > { %v4404_v8 = vrot.slane %v2433_v51, 3  ;;  %v2437_v63 = vpop.f32.mrb[39].mxu0  ;;  %v4027_v51 = vunpack.c.l.bf16 %v4749_v0  ;;  %v4028_v42 = vunpack.c.h.bf16 %v4749_v0  ;;  %5040 = vperm.xlu1 %5022, %v5039_v32   ;;  %v4974_v10 = vpop.permute.xlu1 %4973 }
 0x7c1   : > { %v4405_v22 = vrot.slane %v2435_v12, 3 }
 0x7c2   : > { %4408 = vst [vmem:[%s6192_s20] sm:$0x60] %v4404_v8  ;;  %v5049_v12 = vpack.i.bf16 %v4028_v42, %v4027_v51  ;;  %v4975_v8 = vunpack.i.l.bf16 %v4974_v10 }
 0x7c3   : > { %4409 = vst [vmem:[%s6192_s20 + $0x8] sm:$0x60] %v4405_v22  ;;  %v4976_v22 = vunpack.i.h.bf16 %v4974_v10 }
 0x7c4   : > { %5050 = vperm.xlu1 %5022, %v5049_v12   ;;  %v4980_v12 = vunpack.i.l.bf16 %v6939_v20 }
 0x805   : > { %v3058_v63 = vpop.f32.mrb[40].mxu0 }
 0x806   : > { %v6994_v13 = vadd.f32 %v4975_v8, %v3058_v63  ;;  %v3060_v5 = vpop.f32.mrb[41].mxu0 }
 0x807   : > { %v6996_v52 = vadd.f32 %v4975_v8, %v3060_v5  ;;  %v3062_v14 = vpop.f32.mrb[42].mxu0 }
 0x808   : > { %v3097_v56 = vmul.f32 %v6994_v13, %v6994_v13  ;;  %v7000_v24 = vadd.f32 %v4976_v22, %v3062_v14  ;;  %v3064_v11 = vpop.f32.mrb[43].mxu0  ;;  %v4981_v14 = vunpack.i.h.bf16 %v6939_v20 }
 0x809   : > { %v3098_v35 = vmul.f32 %v6996_v52, %v6996_v52  ;;  %v7004_v37 = vadd.f32 %v4976_v22, %v3064_v11 }
 0x80a   : > { %v3113_v0 = vmul.f32 %v3097_v56, %v6994_v13  ;;  %v3099_v32 = vmul.f32 %v7000_v24, %v7000_v24 }
 0x80b   : > { %v3114_v51 = vmul.f32 %v3098_v35, %v6996_v52  ;;  %v3100_v42 = vmul.f32 %v7004_v37, %v7004_v37 }
 0x80c   : > { %v3129_v10 = vmul.f32 0.044715, %v3113_v0  ;;  %v3115_v8 = vmul.f32 %v3099_v32, %v7000_v24 }
 0x80d   : > { %v3130_v63 = vmul.f32 0.044715, %v3114_v51  ;;  %v3116_v5 = vmul.f32 %v3100_v42, %v7004_v37  ;;  %v3068_v22 = vpop.f32.mrb[44].mxu0 }
 0x80e   : > { %v3145_v56 = vadd.f32 %v3129_v10, %v6994_v13  ;;  %v3131_v11 = vmul.f32 0.044715, %v3115_v8  ;;  %v7017_v31 = vadd.f32 %v4980_v12, %v3068_v22  ;;  %v3070_v35 = vpop.f32.mrb[45].mxu0 }
 0x80f   : > { %v3146_v3 = vadd.f32 %v3130_v63, %v6996_v52  ;;  %v3132_v21 = vmul.f32 0.044715, %v3116_v5  ;;  %v7020_v39 = vadd.f32 %v4980_v12, %v3070_v35  ;;  %v3072_v0 = vpop.f32.mrb[46].mxu0 }
 0x810   : > { %v3161_v18 = vmul.f32 0.7978846, %v3145_v56  ;;  %v3147_v32 = vadd.f32 %v3131_v11, %v7000_v24  ;;  %v3101_v51 = vmul.f32 %v7017_v31, %v7017_v31  ;;  %v7025_v42 = vadd.f32 %v4981_v14, %v3072_v0  ;;  %v3074_v20 = vpop.f32.mrb[47].mxu0  ;;  %v4984_v11 = vpop.permute.xlu1 %4983 }
 0x811   : > { %v3162_v10 = vmul.f32 0.7978846, %v3146_v3  ;;  %v3148_v8 = vadd.f32 %v3132_v21, %v7004_v37  ;;  %v3102_v22 = vmul.f32 %v7020_v39, %v7020_v39  ;;  %v7030_v63 = vadd.f32 %v4981_v14, %v3074_v20 }
 0x812   : > { %5435 = vtanh.f32 %v3161_v18  ;;  %v3163_v12 = vmul.f32 0.7978846, %v3147_v32  ;;  %v3117_v5 = vmul.f32 %v3101_v51, %v7017_v31  ;;  %v3103_v56 = vmul.f32 %v7025_v42, %v7025_v42 }
 0x813   : > { %5437 = vtanh.f32 %v3162_v10  ;;  %v3164_v35 = vmul.f32 0.7978846, %v3148_v8  ;;  %v3118_v0 = vmul.f32 %v3102_v22, %v7020_v39  ;;  %v3104_v21 = vmul.f32 %v7030_v63, %v7030_v63 }
 0x814   : > { %v4985_v3 = vunpack.i.l.bf16 %v4984_v11  ;;  %5439 = vtanh.f32 %v3163_v12  ;;  %v3133_v7 = vmul.f32 0.044715, %v3117_v5  ;;  %v3119_v14 = vmul.f32 %v3103_v56, %v7025_v42 }
 0x815   : > { %v3134_v32 = vmul.f32 0.044715, %v3118_v0  ;;  %v3120_v51 = vmul.f32 %v3104_v21, %v7030_v63  ;;  %v3078_v20 = vpop.f32.mrb[48].mxu0  ;;  %v4986_v49 = vunpack.i.h.bf16 %v4984_v11  ;;  %5441 = vtanh.f32 %v3164_v35 }
 0x816   : > { %v3149_v10 = vadd.f32 %v3133_v7, %v7017_v31  ;;  %v3135_v8 = vmul.f32 0.044715, %v3119_v14  ;;  %v7042_v33 = vadd.f32 %v4985_v3, %v3078_v20  ;;  %v3080_v22 = vpop.f32.mrb[49].mxu0 }
 0x817   : > { %v3150_v19 = vadd.f32 %v3134_v32, %v7020_v39  ;;  %v3136_v12 = vmul.f32 0.044715, %v3120_v51  ;;  %v7045_v5 = vadd.f32 %v4985_v3, %v3080_v22  ;;  %v3082_v56 = vpop.f32.mrb[50].mxu0 }
 0x818   : > { %v3165_v61 = vmul.f32 0.7978846, %v3149_v10  ;;  %v3151_v0 = vadd.f32 %v3135_v8, %v7025_v42  ;;  %v3105_v21 = vmul.f32 %v7042_v33, %v7042_v33  ;;  %v7050_v11 = vadd.f32 %v4986_v49, %v3082_v56  ;;  %v3084_v7 = vpop.f32.mrb[51].mxu0 }
 0x819   : > { %v3166_v14 = vmul.f32 0.7978846, %v3150_v19  ;;  %v3152_v20 = vadd.f32 %v3136_v12, %v7030_v63  ;;  %v3106_v35 = vmul.f32 %v7045_v5, %v7045_v5  ;;  %v7055_v32 = vadd.f32 %v4986_v49, %v3084_v7 }
 0x81a   : > { %5443 = vtanh.f32 %v3165_v61  ;;  %v3167_v3 = vmul.f32 0.7978846, %v3151_v0  ;;  %v3121_v51 = vmul.f32 %v3105_v21, %v7042_v33  ;;  %v3107_v10 = vmul.f32 %v7050_v11, %v7050_v11 }
 0x81b   : > { %5445 = vtanh.f32 %v3166_v14  ;;  %v3168_v8 = vmul.f32 0.7978846, %v3152_v20  ;;  %v3122_v22 = vmul.f32 %v3106_v35, %v7045_v5  ;;  %v3108_v19 = vmul.f32 %v7055_v32, %v7055_v32 }
 0x81c   : > { %v5436_v12 = vpop.eup %5435  ;;  %v4990_v56 = vunpack.i.l.bf16 %v6941_v23  ;;  %5447 = vtanh.f32 %v3167_v3  ;;  %v3137_v49 = vmul.f32 0.044715, %v3121_v51  ;;  %v3123_v61 = vmul.f32 %v3107_v10, %v7050_v11 }
 0x81d   : > { %v5438_v0 = vpop.eup %5437  ;;  %v3193_v7 = vadd.f32 1.0, %v5436_v12  ;;  %5449 = vtanh.f32 %v3168_v8  ;;  %v3138_v21 = vmul.f32 0.044715, %v3122_v22  ;;  %v3124_v18 = vmul.f32 %v3108_v19, %v7055_v32  ;;  %v3088_v14 = vpop.f32.mrb[52].mxu0 }
 0x81e   : > { %v5440_v20 = vpop.eup %5439  ;;  %v3153_v35 = vadd.f32 %v3137_v49, %v7042_v33  ;;  %v3139_v15 = vmul.f32 0.044715, %v3123_v61  ;;  %v7067_v57 = vadd.f32 %v4990_v56, %v3088_v14  ;;  %v3090_v26 = vpop.f32.mrb[53].mxu0  ;;  %v3194_v45 = vadd.f32 1.0, %v5438_v0 }
 0x81f   : > { %v3209_v40 = vmul.f32 0.5, %v3193_v7  ;;  %v3195_v3 = vadd.f32 1.0, %v5440_v20  ;;  %v3154_v51 = vadd.f32 %v3138_v21, %v7045_v5  ;;  %v3140_v10 = vmul.f32 0.044715, %v3124_v18  ;;  %v3092_v9 = vpop.f32.mrb[54].mxu0  ;;  %v5442_v61 = vpop.eup %5441 }
 0x820   : > { %v3169_v12 = vmul.f32 0.7978846, %v3153_v35  ;;  %v3155_v8 = vadd.f32 %v3139_v15, %v7050_v11  ;;  %v3109_v22 = vmul.f32 %v7067_v57, %v7067_v57  ;;  %v7073_v19 = vadd.f32 %v4990_v56, %v3090_v26  ;;  %v3094_v49 = vpop.f32.mrb[55].mxu0 }
 0x821   : > { %v3225_v14 = vmul.f32 %v3209_v40, %v6994_v13  ;;  %v3211_v47 = vmul.f32 0.5, %v3195_v3  ;;  %v3170_v0 = vmul.f32 0.7978846, %v3154_v51  ;;  %v3156_v7 = vadd.f32 %v3140_v10, %v7055_v32 }
 0x822   : > { %5451 = vtanh.f32 %v3169_v12  ;;  %v3171_v21 = vmul.f32 0.7978846, %v3155_v8  ;;  %v3125_v18 = vmul.f32 %v3109_v22, %v7067_v57  ;;  %v3110_v15 = vmul.f32 %v7073_v19, %v7073_v19 }
 0x823   : > { %v3227_v20 = vmul.f32 %v3211_v47, %v7000_v24  ;;  %5453 = vtanh.f32 %v3170_v0  ;;  %v3172_v26 = vmul.f32 0.7978846, %v3156_v7  ;;  %v7712_v56 = vunpack.i.h.bf16 %v6941_v23 }
 0x824   : > { %v5444_v40 = vpop.eup %5443  ;;  %5455 = vtanh.f32 %v3171_v21  ;;  %v3141_v13 = vmul.f32 0.044715, %v3125_v18  ;;  %v3126_v3 = vmul.f32 %v3110_v15, %v7073_v19  ;;  %v3196_v24 = vadd.f32 1.0, %v5442_v61 }
 0x825   : > { %v7083_v35 = vadd.f32 %v7712_v56, %v3092_v9  ;;  %v7713_v51 = vmov %v7712_v56  ;;  %v5446_v12 = vpop.eup %5445  ;;  %v3197_v8 = vadd.f32 1.0, %v5444_v40  ;;  %5457 = vtanh.f32 %v3172_v26 }
 0x826   : > { %v7088_v10 = vadd.f32 %v7713_v51, %v3094_v49  ;;  %v5448_v22 = vpop.eup %5447  ;;  %v3157_v9 = vadd.f32 %v3141_v13, %v7067_v57  ;;  %v3142_v0 = vmul.f32 0.044715, %v3126_v3  ;;  %v3210_v21 = vmul.f32 0.5, %v3194_v45 }
 0x827   : > { %v3111_v47 = vmul.f32 %v7083_v35, %v7083_v35  ;;  %v5450_v18 = vpop.eup %5449  ;;  %v3213_v15 = vmul.f32 0.5, %v3197_v8  ;;  %v3199_v23 = vadd.f32 1.0, %v5448_v22  ;;  %v3212_v56 = vmul.f32 0.5, %v3196_v24 }
 0x828   : > { %v3112_v7 = vmul.f32 %v7088_v10, %v7088_v10  ;;  %v3173_v40 = vmul.f32 0.7978846, %v3157_v9  ;;  %v3158_v26 = vadd.f32 %v3142_v0, %v7073_v19  ;;  %v3226_v61 = vmul.f32 %v3210_v21, %v6996_v52 }
 0x829   : > { %v3127_v49 = vmul.f32 %v3111_v47, %v7083_v35  ;;  %v3229_v13 = vmul.f32 %v3213_v15, %v7017_v31  ;;  %v3215_v3 = vmul.f32 0.5, %v3199_v23  ;;  %v3228_v46 = vmul.f32 %v3212_v56, %v7004_v37 }
 0x82a   : > { %v3128_v51 = vmul.f32 %v3112_v7, %v7088_v10  ;;  %5459 = vtanh.f32 %v3173_v40  ;;  %v3174_v45 = vmul.f32 0.7978846, %v3158_v26  ;;  %v3242_v22 = vadd.f32 %v3226_v61, %v6760_v41 }
 0x82b   : > { %v3143_v25 = vmul.f32 0.044715, %v3127_v49  ;;  %v3231_v47 = vmul.f32 %v3215_v3, %v7025_v42  ;;  %v3244_v9 = vadd.f32 %v3228_v46, %v6765_v48  ;;  %v3241_v0 = vadd.f32 %v3225_v14, %v6757_v29 }
 0x82c   : > { %v3144_v8 = vmul.f32 0.044715, %v3128_v51  ;;  %v5452_v52 = vpop.eup %5451  ;;  %5461 = vtanh.f32 %v3174_v45  ;;  %v3243_v7 = vadd.f32 %v3227_v20, %v6749_v16  ;;  %v3198_v37 = vadd.f32 1.0, %v5446_v12 }
 0x82d   : > { %v3159_v24 = vadd.f32 %v3143_v25, %v7083_v35  ;;  %v5454_v21 = vpop.eup %5453  ;;  %v3201_v15 = vadd.f32 1.0, %v5452_v52  ;;  %v3258_v49 = vpack.c.bf16 %v3244_v9, %v3242_v22  ;;  %v3200_v41 = vadd.f32 1.0, %v5450_v18 }
 0x82e   : > { %v3160_v31 = vadd.f32 %v3144_v8, %v7088_v10  ;;  %v5456_v56 = vpop.eup %5455  ;;  %v3257_v40 = vpack.c.bf16 %v3243_v7, %v3241_v0  ;;  %v3214_v25 = vmul.f32 0.5, %v3198_v37  ;;  %v3245_v46 = vadd.f32 %v3229_v13, %v6769_v2 }
 0x82f   : > { %v3175_v23 = vmul.f32 0.7978846, %v3159_v24  ;;  %v5458_v48 = vpop.eup %5457  ;;  %v3217_v29 = vmul.f32 0.5, %v3201_v15  ;;  %v3203_v14 = vadd.f32 1.0, %v5456_v56  ;;  %3274 = vmatprep.subr.bf16.mxu1 %v3258_v49  ;;  %v3216_v26 = vmul.f32 0.5, %v3200_v41 }
 0x830   : > { %v3176_v42 = vmul.f32 0.7978846, %v3160_v31  ;;  %3275 = vmatpush1.bf16.msra.mxu1 %v3257_v40  ;;  %v3230_v16 = vmul.f32 %v3214_v25, %v7020_v39  ;;  %v3247_v20 = vadd.f32 %v3231_v47, %v6792_v50  ;;  %v3202_v12 = vadd.f32 1.0, %v5454_v21 }
 0x831   : > { %5463 = vtanh.f32 %v3175_v23  ;;  %v3233_v18 = vmul.f32 %v3217_v29, %v7042_v33  ;;  %v3219_v51 = vmul.f32 0.5, %v3203_v14  ;;  %v3232_v61 = vmul.f32 %v3216_v26, %v7030_v63 }
 0x832   : > { %5465 = vtanh.f32 %v3176_v42  ;;  %v3204_v3 = vadd.f32 1.0, %v5458_v48  ;;  %v3259_v2 = vpack.c.bf16 %v3247_v20, %v3245_v46  ;;  %v3218_v13 = vmul.f32 0.5, %v3202_v12 }
 0x833   : > { %v3235_v45 = vmul.f32 %v3219_v51, %v7050_v11  ;;  %v3246_v8 = vadd.f32 %v3230_v16, %v6781_v34  ;;  %v3248_v22 = vadd.f32 %v3232_v61, %v6801_v53  ;;  %v3249_v50 = vadd.f32 %v3233_v18, %v6807_v60 }
 0x834   : > { %v3220_v24 = vmul.f32 0.5, %v3204_v3  ;;  %v5460_v9 = vpop.eup %5459  ;;  %v3234_v39 = vmul.f32 %v3218_v13, %v7045_v5 }
 0x835   : > { %v3205_v47 = vadd.f32 1.0, %v5460_v9  ;;  %v3260_v33 = vpack.c.bf16 %v3248_v22, %v3246_v8  ;;  %v3251_v63 = vadd.f32 %v3235_v45, %v6824_v59 }
 0x836   : > { %v3236_v0 = vmul.f32 %v3220_v24, %v7055_v32  ;;  %v5462_v52 = vpop.eup %5461  ;;  %v3250_v11 = vadd.f32 %v3234_v39, %v6820_v62 }
 0x837   : > { %3276 = vmatprep.subr.bf16.mxu1 %v3260_v33  ;;  %v3261_v31 = vpack.c.bf16 %v3251_v63, %v3249_v50  ;;  %v3206_v53 = vadd.f32 1.0, %v5462_v52  ;;  %v3221_v7 = vmul.f32 0.5, %v3205_v47 }
 0x838   : > { %v3252_v34 = vadd.f32 %v3236_v0, %v6834_v54  ;;  %3277 = vmatpush1.bf16.msra.mxu1 %v3259_v2 }
 0x839   : > { %v3222_v21 = vmul.f32 0.5, %v3206_v53  ;;  %v3237_v32 = vmul.f32 %v3221_v7, %v7067_v57 }
 0x83a   : > { %v3262_v5 = vpack.c.bf16 %v3252_v34, %v3250_v11 }
 0x83b   : > { %v5464_v37 = vpop.eup %5463  ;;  %v3238_v62 = vmul.f32 %v3222_v21, %v7073_v19  ;;  %v3253_v56 = vadd.f32 %v3237_v32, %v6848_v1  ;;  %v5602_v19 = vld [vmem:[%s7512_s2 + $0xe0] sm:$0xf] }
 0x83c   : > { %v5466_v60 = vpop.eup %5465  ;;  %v3207_v15 = vadd.f32 1.0, %v5464_v37  ;;  %3278 = vmatprep.subr.bf16.mxu1 %v3262_v5  ;;  %v7714_v1 = vld [vmem:[#allocation2_spill] sm:$0xff] }
 0x83d   : > { %v3208_v23 = vadd.f32 1.0, %v5466_v60  ;;  %3279 = vmatpush1.bf16.msra.mxu1 %v3261_v31  ;;  %v3254_v40 = vadd.f32 %v3238_v62, %v6856_v44  ;;  %4410 = vst [vmem:[%s7140_s24] sm:$0x7] %v7714_v1  ;;  %v7715_v44 = vld [vmem:[#allocation3_spill] sm:$0xff] }
 0x83e   : > { %v3223_v59 = vmul.f32 0.5, %v3207_v15  ;;  %4411 = vst [vmem:[%s7140_s24 + $0x8] sm:$0x7] %v7715_v44 }
 0x83f   : > { %v3224_v49 = vmul.f32 0.5, %v3208_v23 }
 0x840   : > { %v3239_v54 = vmul.f32 %v3223_v59, %v7083_v35 }
 0x841   : > { %v3240_v41 = vmul.f32 %v3224_v49, %v7088_v10 }
 0x842   : > { %v3255_v42 = vadd.f32 %v3239_v54, %v6860_v58  ;;  %v3269_v58 = vpop.permute.xlu1 %3268 }
 0x843   : > { %v3256_v25 = vadd.f32 %v3240_v41, %v6872_v43 }
 0x844   : > { %v3263_v46 = vpack.c.bf16 %v3255_v42, %v3253_v56 }
 0x845   : > { %v3264_v57 = vpack.c.bf16 %v3256_v25, %v3254_v40 }
 0x847   : > { %3280 = vmatprep.subr.bf16.mxu1 %v3264_v57 }
 0x848   : > { %3281 = vmatpush1.bf16.msra.mxu1 %v3263_v46 }
 0x84b   : > { %4732 = vmatmul.mubr.msk.bf16.vlgmr.msra.gmra.mrb[48].mxu1 %vm1056_vm6, %v5602_v19 }
 0x84c   : > { %3746 = vmatprep.mubr.bf16.mxu1 %v7700_v28 }
 0x91e   : > { %v3308_v43 = vpop.f32.mrb[48].mxu1 }
 0x91f   : > { %v3309_v35 = vadd.f32 %v3308_v43, %v3269_v58  ;;  %v3310_v10 = vpop.f32.mrb[49].mxu1 }
 0x920   : > { %v3311_v48 = vadd.f32 %v3310_v10, %v3269_v58  ;;  %v3312_v29 = vpop.f32.mrb[50].mxu1 }
 0x921   : > { %v3315_v14 = vmul.f32 %v3309_v35, %v3309_v35  ;;  %v3313_v26 = vpop.f32.mrb[51].mxu1 }
 0x922   : > { %v3316_v16 = vmul.f32 %v3311_v48, %v3311_v48 }
 0x923   : > { %v3317_v20 = vsel %vm1362_vm7, %v3315_v14, 0.0 }
 0x924   : > { %v3318_v12 = vrot.slane %v3317_v20, 4  ;;  %v3324_v18 = vsel %vm1362_vm7, %v3316_v16, 0.0 }
 0x925   : > { %v3325_v51 = vrot.slane %v3324_v18, 4 }
 0x926   : > { %v3319_v61 = vadd.f32 %v3318_v12, %v3317_v20 }
 0x927   : > { %v3326_v3 = vadd.f32 %v3325_v51, %v3324_v18 }
 0x928   : > { %v3320_v2 = vrot.slane %v3319_v61, 2 }
 0x929   : > { %v3327_v13 = vrot.slane %v3326_v3, 2 }
 0x92a   : > { %v3321_v45 = vadd.f32 %v3320_v2, %v3319_v61  ;;  %v7716_v2 = vld [vmem:[#allocation4_spill] sm:$0xff] }
 0x92b   : > { %v3328_v8 = vadd.f32 %v3327_v13, %v3326_v3 }
 0x92c   : > { %v3322_v22 = vrot.slane %v3321_v45, 1 }
 0x92d   : > { %v3329_v24 = vrot.slane %v3328_v8, 1 }
 0x92e   : > { %v3323_v9 = vadd.f32 %v3322_v22, %v3321_v45 }
 0x92f   : > { %v3330_v39 = vadd.f32 %v3329_v24, %v3328_v8  ;;  %v7717_v8 = vld [vmem:[#allocation5_spill] sm:$0xff] }
 0x930   : > { %5467 = vrsqrt.f32 %v3323_v9  ;;  %vm3333_vm12 = vcmp.eq.f32.partialorder %v3323_v9, inf  ;;  %v3336_v0 = vand.u32 2147483648, %v3323_v9  ;;  %vm3335_vm13 = vcmp.eq.f32.partialorder %v3323_v9, 0.0 }
 0x931   : > { %5469 = vrsqrt.f32 %v3330_v39  ;;  %vm3340_vm14 = vcmp.eq.f32.partialorder %v3330_v39, inf  ;;  %v3343_v11 = vand.u32 2147483648, %v3330_v39  ;;  %vm3342_vm15 = vcmp.eq.f32.partialorder %v3330_v39, 0.0 }
 0x93a   : > { %v5468_v50 = vpop.eup %5467 }
 0x93b   : > { %v5470_v47 = vpop.eup %5469  ;;  %v3332_v33 = vmul.f32 %v5468_v50, %v3323_v9 }
 0x93c   : > { %v3339_v63 = vmul.f32 %v5470_v47, %v3330_v39  ;;  %v7719_v47 = vld [vmem:[#allocation7_spill] sm:$0xff] }
 0x93d   : > { %v3334_v52 = vsel %vm3333_vm12, %v3323_v9, %v3332_v33  ;;  %v7718_v9 = vld [vmem:[#allocation6_spill] sm:$0xff] }
 0x93e   : > { %v3337_v34 = vsel %vm3335_vm13, %v3336_v0, %v3334_v52  ;;  %v3341_v31 = vsel %vm3340_vm14, %v3330_v39, %v3339_v63 }
 0x93f   : > { %v3345_v53 = vmax.f32 %v3337_v34, 1e-12  ;;  %v3344_v7 = vsel %vm3342_vm15, %v3343_v11, %v3341_v31 }
 0x940   : > { %v3346_v37 = vmax.f32 %v3344_v7, 1e-12  ;;  %v7170_v7 = vpop.permute.xlu1 %5000 }
 0x941   : > { %5471 = vrcp.f32 %v3345_v53 }
 0x942   : > { %5473 = vrcp.f32 %v3346_v37 }
 0x94b   : > { %v5472_v5 = vpop.eup %5471 }
 0x94c   : > { %v5474_v21 = vpop.eup %5473  ;;  %v7148_v60 = vmul.f32 %v5472_v5, %v3309_v35 }
 0x94d   : > { %v7150_v15 = vmul.f32 %v5474_v21, %v3311_v48 }
 0x94e   : > { %v3371_v23 = vsel %vm1362_vm7, %v7148_v60, 0.0  ;;  %v3387_v32 = vmul.f32 %v7148_v60, %v7148_v60  ;;  %v4414_v59 = vrot.slane %v7148_v60, 5 }
 0x94f   : > { %v3372_v49 = vrot.slane %v3371_v23, 4  ;;  %v3378_v62 = vsel %vm1362_vm7, %v7150_v15, 0.0  ;;  %v3388_v54 = vmul.f32 %v7150_v15, %v7150_v15  ;;  %v4415_v41 = vrot.slane %v7150_v15, 5 }
 0x950   : > { %v3389_v56 = vsel %vm1362_vm7, %v3387_v32, 0.0  ;;  %v3379_v42 = vrot.slane %v3378_v62, 4  ;;  %4418 = vst [vmem:[%s7140_s24] sm:$0x18] %v4414_v59  ;;  %v5007_v59 = vpop.permute.xlu1 %5006 }
 0x951   : > { %v3373_v40 = vadd.f32 %v3372_v49, %v3371_v23  ;;  %v3390_v25 = vrot.slane %v3389_v56, 4  ;;  %v3396_v46 = vsel %vm1362_vm7, %v3388_v54, 0.0  ;;  %4419 = vst [vmem:[%s7140_s24 + $0x8] sm:$0x18] %v4415_v41  ;;  %v4996_v54 = vunpack.i.l.bf16 %v6943_v4 }
 0x952   : > { %v3380_v57 = vadd.f32 %v3379_v42, %v3378_v62  ;;  %v3397_v19 = vrot.slane %v3396_v46, 4  ;;  %v4997_v62 = vunpack.i.h.bf16 %v6943_v4  ;;  %v5015_v42 = vunpack.i.h.bf16 %v6945_v17 }
 0x953   : > { %v3374_v44 = vrot.slane %v3373_v40, 2  ;;  %v3391_v58 = vadd.f32 %v3390_v25, %v3389_v56  ;;  %v5003_v25 = vunpack.i.h.bf16 %v7170_v7 }
 0x954   : > { %v3381_v43 = vrot.slane %v3380_v57, 2  ;;  %v3398_v35 = vadd.f32 %v3397_v19, %v3396_v46  ;;  %v5019_v49 = vpop.permute.xlu1 %5018  ;;  %v5002_v19 = vunpack.i.l.bf16 %v7170_v7 }
 0x955   : > { %v3375_v10 = vadd.f32 %v3374_v44, %v3373_v40  ;;  %v3392_v48 = vrot.slane %v3391_v58, 2  ;;  %v5014_v40 = vunpack.i.l.bf16 %v6945_v17  ;;  %v5021_v44 = vunpack.i.h.bf16 %v5019_v49  ;;  %v7721_v17 = vld [vmem:[#allocation12_spill] sm:$0xff] }
 0x956   : > { %v3382_v29 = vadd.f32 %v3381_v43, %v3380_v57  ;;  %v3399_v14 = vrot.slane %v3398_v35, 2 }
 0x957   : > { %v3376_v26 = vrot.slane %v3375_v10, 1  ;;  %v3393_v16 = vadd.f32 %v3392_v48, %v3391_v58  ;;  %v5020_v58 = vunpack.i.l.bf16 %v5019_v49 }
 0x958   : > { %v3383_v20 = vrot.slane %v3382_v29, 1  ;;  %v3400_v12 = vadd.f32 %v3399_v14, %v3398_v35  ;;  %v5025_v48 = vpop.permute.xlu1 %5024  ;;  %v7720_v14 = vld [vmem:[#allocation8_spill] sm:$0xff] }
 0x959   : > { %v3377_v18 = vadd.f32 %v3376_v26, %v3375_v10  ;;  %v3394_v51 = vrot.slane %v3393_v16, 1  ;;  %v5009_v10 = vunpack.i.h.bf16 %v5007_v59 }
 0x95a   : > { %v3384_v61 = vadd.f32 %v3383_v20, %v3382_v29  ;;  %v3401_v3 = vrot.slane %v3400_v12, 1  ;;  %v5008_v29 = vunpack.i.l.bf16 %v5007_v59  ;;  %v5027_v20 = vunpack.i.h.bf16 %v5025_v48 }
 0x95b   : > { %v3385_v13 = vadd.f32 %v3377_v18, %v7716_v2  ;;  %v3395_v45 = vadd.f32 %v3394_v51, %v3393_v16  ;;  %v5026_v51 = vunpack.i.l.bf16 %v5025_v48 }
 0x95c   : > { %v3386_v22 = vadd.f32 %v3384_v61, %v7717_v8  ;;  %v3402_v24 = vadd.f32 %v3401_v3, %v3400_v12 }
 0x95d   : > { %v3403_v39 = vadd.f32 %v3395_v45, %v7718_v9  ;;  %v3405_v50 = vmul.f32 0.2, %v3385_v13  ;;  %v7722_v45 = vld [vmem:[#allocation9_spill] sm:$0xff] }
 0x95e   : > { %v3404_v33 = vadd.f32 %v3402_v24, %v7719_v47  ;;  %v3406_v0 = vmul.f32 0.2, %v3386_v22  ;;  %v7723_v24 = vld [vmem:[#allocation13_spill] sm:$0xff]  ;;  %v7725_v47 = vld [vmem:[#allocation11_spill] sm:$0xff] }
 0x95f   : > { %v3407_v63 = vmul.f32 0.2, %v3403_v39  ;;  %v3409_v52 = vmul.f32 %v3405_v50, %v3405_v50  ;;  %v3544_v41 = vsub.f32 %v7148_v60, %v3405_v50  ;;  %v7724_v39 = vld [vmem:[#allocation10_spill] sm:$0xff] }
 0x960   : > { %v3408_v11 = vmul.f32 0.2, %v3404_v33  ;;  %v3410_v34 = vmul.f32 %v3406_v0, %v3406_v0  ;;  %v3423_v31 = vcombine.low %v3405_v50, %v3406_v0  ;;  %v3545_v46 = vsub.f32 %v7150_v15, %v3406_v0 }
 0x961   : > { %v3411_v53 = vsub.f32 %v3407_v63, %v3409_v52 }
 0x962   : > { %v3412_v37 = vsub.f32 %v3408_v11, %v3410_v34  ;;  %v3425_v35 = vsub.f32 %v7714_v1, %v3423_v31 }
 0x963   : > { %v3413_v5 = vmax.f32 %v3411_v53, 0.0 }
 0x964   : > { %v3414_v21 = vmax.f32 %v3412_v37, 0.0 }
 0x965   : > { %v3415_v23 = vadd.f32 1e-05, %v3413_v5 }
 0x966   : > { %v3416_v32 = vadd.f32 1e-05, %v3414_v21 }
 0x967   : > { %5475 = vrsqrt.f32 %v3415_v23 }
 0x968   : > { %5477 = vrsqrt.f32 %v3416_v32 }
 0x971   : > { %v5476_v56 = vpop.eup %5475 }
 0x972   : > { %v5478_v57 = vpop.eup %5477  ;;  %v3546_v43 = vmul.f32 %v5476_v56, %v3544_v41 }
 0x973   : > { %v3428_v4 = vcombine.low %v5476_v56, %v5478_v57  ;;  %v3547_v60 = vmul.f32 %v5478_v57, %v3545_v46 }
 0x974   : > { %v3559_v26 = vrot.slane %v3546_v43, %v7720_v14  ;;  %v3579_v16 = vrot.slane %v3546_v43, %v7721_v17 }
 0x975   : > { %v3430_v12 = vmul.f32 %v3428_v4, %v3425_v35  ;;  %v3563_v15 = vrot.slane %v3547_v60, %v7720_v14  ;;  %v3583_v18 = vrot.slane %v3547_v60, %v7721_v17 }
 0x976   : > { %v3564_v61 = vmul.f32 %v5014_v40, %v3559_v26  ;;  %v3566_v3 = vmul.f32 %v5015_v42, %v3559_v26  ;;  %v3584_v2 = vmul.f32 %v5020_v58, %v3579_v16  ;;  %v3586_v1 = vmul.f32 %v5021_v44, %v3579_v16 }
 0x977   : > { %v3445_v13 = vrot.slane %v3430_v12, %v7720_v14  ;;  %v3449_v8 = vrot.slane %v3430_v12, %v7722_v45  ;;  %v3475_v22 = vrot.slane %v3430_v12, %v7721_v17  ;;  %v3479_v9 = vrot.slane %v3430_v12, %v7723_v24 }
 0x978   : > { %v3509_v50 = vrot.slane %v3430_v12, %v7724_v39  ;;  %v3513_v33 = vrot.slane %v3430_v12, %v7725_v47  ;;  %v3565_v0 = vmul.f32 %v5014_v40, %v3563_v15  ;;  %v3567_v63 = vmul.f32 %v5015_v42, %v3563_v15 }
 0x979   : > { %v3455_v52 = vrot.slane %v3445_v13, %v7720_v14  ;;  %v3459_v11 = vrot.slane %v3449_v8, %v7720_v14  ;;  %v3485_v34 = vrot.slane %v3475_v22, %v7721_v17  ;;  %v3489_v31 = vrot.slane %v3479_v9, %v7721_v17 }
 0x97a   : > { %v3519_v53 = vrot.slane %v3509_v50, %v7724_v39  ;;  %v3523_v7 = vrot.slane %v3513_v33, %v7724_v39  ;;  %v3585_v37 = vmul.f32 %v5020_v58, %v3583_v18  ;;  %v3587_v5 = vmul.f32 %v5021_v44, %v3583_v18 }
 0x97b   : > { %v3460_v21 = vmul.f32 %v4996_v54, %v3455_v52  ;;  %v3461_v23 = vmul.f32 %v4996_v54, %v3459_v11  ;;  %v3462_v32 = vmul.f32 %v4997_v62, %v3455_v52  ;;  %v3463_v59 = vmul.f32 %v4997_v62, %v3459_v11 }
 0x97c   : > { %v3490_v49 = vmul.f32 %v5002_v19, %v3485_v34  ;;  %v3491_v41 = vmul.f32 %v5002_v19, %v3489_v31  ;;  %v3492_v56 = vmul.f32 %v5003_v25, %v3485_v34  ;;  %v3493_v42 = vmul.f32 %v5003_v25, %v3489_v31 }
 0x97d   : > { %v3524_v40 = vmul.f32 %v5008_v29, %v3519_v53  ;;  %v3525_v46 = vmul.f32 %v5008_v29, %v3523_v7  ;;  %v3526_v57 = vmul.f32 %v5009_v10, %v3519_v53  ;;  %v3527_v43 = vmul.f32 %v5009_v10, %v3523_v7 }
 0x97e   : > { %v3494_v35 = vadd.f32 %v3490_v49, %v3460_v21  ;;  %v3495_v4 = vadd.f32 %v3491_v41, %v3461_v23  ;;  %v3496_v60 = vadd.f32 %v3492_v56, %v3462_v32  ;;  %v3497_v48 = vadd.f32 %v3493_v42, %v3463_v59 }
 0x97f   : > { %v3588_v14 = vadd.f32 %v3584_v2, %v3564_v61  ;;  %v3589_v26 = vadd.f32 %v3585_v37, %v3565_v0  ;;  %v3590_v58 = vadd.f32 %v3586_v1, %v3566_v3  ;;  %v3591_v44 = vadd.f32 %v3587_v5, %v3567_v63 }
 0x980   : > { %v3528_v17 = vadd.f32 %v3524_v40, %v3494_v35  ;;  %v3529_v54 = vadd.f32 %v3525_v46, %v3495_v4  ;;  %v3530_v16 = vadd.f32 %v3526_v57, %v3496_v60  ;;  %v3531_v62 = vadd.f32 %v3527_v43, %v3497_v48  ;;  %v5603_v4 = vld [vmem:[%s7512_s2 + $0xec] sm:$0xff]   ;;  %v5604_v60 = vld [vmem:[%s7512_s2 + $0xfc] sm:$0xf] }
 0x981   : > { %v4754_v48 = vcombine.low %v5604_v60, %v6979_v6 }
 0x982   : > { %v3540_v12 = vadd.f32 %v5026_v51, %v3528_v17  ;;  %v3541_v19 = vadd.f32 %v5026_v51, %v3529_v54  ;;  %v3542_v15 = vadd.f32 %v5027_v20, %v3530_v16  ;;  %v3543_v25 = vadd.f32 %v5027_v20, %v3531_v62 }
 0x984   : > { %v3592_v18 = vadd.f32 %v3588_v14, %v3540_v12  ;;  %v3593_v29 = vadd.f32 %v3589_v26, %v3541_v19  ;;  %v3594_v13 = vadd.f32 %v3590_v58, %v3542_v15  ;;  %v3595_v10 = vadd.f32 %v3591_v44, %v3543_v25  ;;  %v5605_v14 = vld [vmem:[%s7512_s2 + $0x104] sm:$0xf]  ;;  %v3655_v15 = vpop.permute.xlu1 %3654 }
 0x985   : > { %v4755_v26 = vcombine.low %v5605_v14, %v6985_v55  ;;  %v5033_v58 = vunpack.i.h.bf16 %v6947_v38 }
 0x986   : > { %v3596_v45 = vmul.f32 %v3592_v18, %v3592_v18  ;;  %v3597_v8 = vmul.f32 %v3593_v29, %v3593_v29  ;;  %v3598_v22 = vmul.f32 %v3594_v13, %v3594_v13  ;;  %v3599_v24 = vmul.f32 %v3595_v10, %v3595_v10 }
 0x988   : > { %v3600_v61 = vmul.f32 %v3596_v45, %v3592_v18  ;;  %v3601_v2 = vmul.f32 %v3597_v8, %v3593_v29  ;;  %v3602_v3 = vmul.f32 %v3598_v22, %v3594_v13  ;;  %v3603_v1 = vmul.f32 %v3599_v24, %v3595_v10  ;;  %v3660_v45 = vpop.permute.xlu1 %3659 }
 0x98a   : > { %v3604_v9 = vmul.f32 0.044715, %v3600_v61  ;;  %v3606_v39 = vmul.f32 0.044715, %v3602_v3  ;;  %v3605_v50 = vmul.f32 0.044715, %v3601_v2 }
 0x98b   : > { %v3607_v47 = vmul.f32 0.044715, %v3603_v1 }
 0x98c   : > { %v3608_v33 = vadd.f32 %v3604_v9, %v3592_v18  ;;  %v3610_v51 = vadd.f32 %v3606_v39, %v3594_v13  ;;  %v3609_v0 = vadd.f32 %v3605_v50, %v3593_v29 }
 0x98d   : > { %v3611_v20 = vadd.f32 %v3607_v47, %v3595_v10 }
 0x98e   : > { %v3612_v63 = vmul.f32 0.7978846, %v3608_v33  ;;  %v3613_v52 = vmul.f32 0.7978846, %v3609_v0  ;;  %v3614_v11 = vmul.f32 0.7978846, %v3610_v51 }
 0x98f   : > { %v3615_v34 = vmul.f32 0.7978846, %v3611_v20 }
 0x990   : > { %5479 = vtanh.f32 %v3613_v52 }
 0x991   : > { %5481 = vtanh.f32 %v3615_v34  ;;  %v3670_v34 = vpop.permute.xlu1 %3669 }
 0x992   : > { %5483 = vtanh.f32 %v3612_v63 }
 0x993   : > { %5485 = vtanh.f32 %v3614_v11 }
 0x995   : > { %v3680_v60 = vpop.permute.xlu1 %3679 }
 0x99a   : > { %v5480_v31 = vpop.eup %5479 }
 0x99b   : > { %v5482_v53 = vpop.eup %5481  ;;  %v3621_v7 = vadd.f32 1.0, %v5480_v31 }
 0x99c   : > { %v5484_v37 = vpop.eup %5483  ;;  %v3623_v5 = vadd.f32 1.0, %v5482_v53 }
 0x99d   : > { %v5486_v21 = vpop.eup %5485  ;;  %v3625_v23 = vmul.f32 0.5, %v3621_v7  ;;  %v3620_v32 = vadd.f32 1.0, %v5484_v37 }
 0x99e   : > { %v3627_v59 = vmul.f32 0.5, %v3623_v5  ;;  %v3622_v49 = vadd.f32 1.0, %v5486_v21 }
 0x99f   : > { %v3629_v41 = vmul.f32 %v3625_v23, %v3593_v29  ;;  %v3624_v56 = vmul.f32 0.5, %v3620_v32 }
 0x9a0   : > { %v3631_v42 = vmul.f32 %v3627_v59, %v3595_v10  ;;  %v3626_v40 = vmul.f32 0.5, %v3622_v49 }
 0x9a1   : > { %v3628_v46 = vmul.f32 %v3624_v56, %v3592_v18 }
 0x9a2   : > { %v3633_v57 = vpack.c.bf16 %v3631_v42, %v3629_v41  ;;  %v3630_v43 = vmul.f32 %v3626_v40, %v3594_v13 }
 0x9a4   : > { %3714 = vmatprep.subr.bf16.mxu1 %v3633_v57  ;;  %v3632_v35 = vpack.c.bf16 %v3630_v43, %v3628_v46 }
 0x9a6   : > { %3715 = vmatpush1.bf16.msra.mxu1 %v3632_v35 }
 0x9a9   : > { %4756 = vmatmul.mubr.msk.bf16.vlgmr.msra.gmra.mrb[52].mxu1 %vm652_vm5, %v5603_v4 }
 0x9aa   : > { %3756 = vmatprep.mubr.bf16.mxu1 %v7700_v28 }
 0x9b1   : > { %4757 = vmatmul.mubr.msk.bf16.gmra.mrb[56].mxu1 %vm652_vm5, %v6970_v30  ;;  %v5032_v30 = vunpack.i.l.bf16 %v6947_v38 }
 0x9b2   : > { %3766 = vmatprep.mubr.bf16.mxu1 %v7700_v28 }
 0x9b9   : > { %4758 = vmatmul.mubr.msk.bf16.gmra.mrb[60].mxu1 %vm652_vm5, %v4754_v48 }
 0x9ba   : > { %3776 = vmatprep.mubr.bf16.mxu1 %v7700_v28 }
 0x9c1   : > { %4759 = vmatmul.mubr.msk.bf16.gmra.mrb[64].mxu1 %vm652_vm5, %v4755_v26 }
 0x9c2   : > { %4383 = vmatprep.mubr.bf16.mxu1 %v7700_v28 }
 0xa7c   : > { %v3748_v44 = vpop.f32.mrb[52].mxu1 }
 0xa7d   : > { %v3749_v6 = vadd.f32 %v5032_v30, %v3748_v44  ;;  %v3750_v17 = vpop.f32.mrb[53].mxu1 }
 0xa7e   : > { %v3751_v54 = vadd.f32 %v5032_v30, %v3750_v17  ;;  %v3752_v16 = vpop.f32.mrb[54].mxu1 }
 0xa7f   : > { %v4760_v62 = vmul.f32 -1.442695, %v3749_v6  ;;  %v3753_v12 = vadd.f32 %v5033_v58, %v3752_v16  ;;  %v3754_v19 = vpop.f32.mrb[55].mxu1 }
 0xa80   : > { %v4761_v25 = vmul.f32 -1.442695, %v3751_v54  ;;  %v3755_v18 = vadd.f32 %v5033_v58, %v3754_v19 }
 0xa81   : > { %5487 = vpow2.f32 %v4760_v62  ;;  %v4762_v55 = vmul.f32 -1.442695, %v3753_v12 }
 0xa82   : > { %5489 = vpow2.f32 %v4761_v25  ;;  %v4763_v29 = vmul.f32 -1.442695, %v3755_v18 }
 0xa83   : > { %5491 = vpow2.f32 %v4762_v55 }
 0xa84   : > { %5493 = vpow2.f32 %v4763_v29  ;;  %v3758_v13 = vpop.f32.mrb[56].mxu1 }
 0xa85   : > { %v3759_v10 = vadd.f32 %v3758_v13, %v3655_v15  ;;  %v3760_v38 = vpop.f32.mrb[57].mxu1 }
 0xa86   : > { %v3761_v8 = vadd.f32 %v3760_v38, %v3655_v15  ;;  %v3762_v22 = vpop.f32.mrb[58].mxu1 }
 0xa87   : > { %v4764_v24 = vmul.f32 -1.442695, %v3759_v10  ;;  %v3763_v61 = vadd.f32 %v3762_v22, %v3660_v45  ;;  %v3764_v2 = vpop.f32.mrb[59].mxu1 }
 0xa88   : > { %v4765_v3 = vmul.f32 -1.442695, %v3761_v8  ;;  %v3765_v1 = vadd.f32 %v3764_v2, %v3660_v45  ;;  %v7726_v8 = vld [vmem:[#allocation20_spill] sm:$0xff] }
 0xa89   : > { %5495 = vpow2.f32 %v4764_v24  ;;  %v4766_v9 = vmul.f32 -1.442695, %v3763_v61  ;;  %v7727_v24 = vld [vmem:[#allocation21_spill] sm:$0xff] }
 0xa8a   : > { %5497 = vpow2.f32 %v4765_v3  ;;  %v4767_v39 = vmul.f32 -1.442695, %v3765_v1  ;;  %v7728_v1 = vld [vmem:[#allocation22_spill] sm:$0xff] }
 0xa8b   : > { %v5488_v50 = vpop.eup %5487  ;;  %5499 = vpow2.f32 %v4766_v9 }
 0xa8c   : > { %v5490_v47 = vpop.eup %5489  ;;  %v3835_v33 = vadd.f32 1.0, %v5488_v50  ;;  %5501 = vpow2.f32 %v4767_v39  ;;  %v3768_v51 = vpop.f32.mrb[60].mxu1  ;;  %v7729_v39 = vld [vmem:[#allocation23_spill] sm:$0xff] }
 0xa8d   : > { %v5492_v0 = vpop.eup %5491  ;;  %v3836_v20 = vadd.f32 1.0, %v5490_v47  ;;  %v3769_v63 = vadd.f32 %v3768_v51, %v6949_v27  ;;  %v3770_v52 = vpop.f32.mrb[61].mxu1 }
 0xa8e   : > { %v5494_v11 = vpop.eup %5493  ;;  %5503 = vrcp.f32 %v3835_v33  ;;  %v3837_v31 = vadd.f32 1.0, %v5492_v0  ;;  %v3771_v53 = vadd.f32 %v3770_v52, %v6949_v27  ;;  %v3772_v7 = vpop.f32.mrb[62].mxu1  ;;  %v7730_v33 = vld [vmem:[#allocation24_spill] sm:$0xff] }
 0xa8f   : > { %5505 = vrcp.f32 %v3836_v20  ;;  %v3838_v37 = vadd.f32 1.0, %v5494_v11  ;;  %v4768_v5 = vmul.f32 -1.442695, %v3769_v63  ;;  %v3773_v21 = vadd.f32 %v3772_v7, %v3670_v34  ;;  %v3774_v23 = vpop.f32.mrb[63].mxu1  ;;  %v7731_v20 = vld [vmem:[#allocation25_spill] sm:$0xff] }
 0xa90   : > { %5507 = vrcp.f32 %v3837_v31  ;;  %v4769_v32 = vmul.f32 -1.442695, %v3771_v53  ;;  %v3775_v59 = vadd.f32 %v3774_v23, %v3670_v34 }
 0xa91   : > { %5509 = vrcp.f32 %v3838_v37  ;;  %v4770_v49 = vmul.f32 -1.442695, %v3773_v21 }
 0xa92   : > { %5511 = vpow2.f32 %v4768_v5  ;;  %v4771_v41 = vmul.f32 -1.442695, %v3775_v59  ;;  %v7732_v59 = vld [vmem:[#allocation26_spill] sm:$0xff] }
 0xa93   : > { %v5496_v56 = vpop.eup %5495  ;;  %5513 = vpow2.f32 %v4769_v32 }
 0xa94   : > { %v5498_v42 = vpop.eup %5497  ;;  %v3839_v40 = vadd.f32 1.0, %v5496_v56  ;;  %5515 = vpow2.f32 %v4770_v49  ;;  %v3778_v46 = vpop.f32.mrb[64].mxu1 }
 0xa95   : > { %v5500_v27 = vpop.eup %5499  ;;  %v3840_v57 = vadd.f32 1.0, %v5498_v42  ;;  %5517 = vpow2.f32 %v4771_v41  ;;  %v3779_v43 = vadd.f32 %v3778_v46, %v6951_v36  ;;  %v3780_v35 = vpop.f32.mrb[65].mxu1 }
 0xa96   : > { %v5502_v4 = vpop.eup %5501  ;;  %5519 = vrcp.f32 %v3839_v40  ;;  %v3841_v48 = vadd.f32 1.0, %v5500_v27  ;;  %v3781_v14 = vadd.f32 %v3780_v35, %v6951_v36  ;;  %v3782_v26 = vpop.f32.mrb[66].mxu1  ;;  %v7733_v40 = vld [vmem:[#allocation27_spill] sm:$0xff] }
 0xa97   : > { %5521 = vrcp.f32 %v3840_v57  ;;  %v3842_v30 = vadd.f32 1.0, %v5502_v4  ;;  %v4772_v58 = vmul.f32 -1.442695, %v3779_v43  ;;  %v3783_v44 = vadd.f32 %v3782_v26, %v3680_v60  ;;  %v3784_v6 = vpop.f32.mrb[67].mxu1 }
 0xa98   : > { %v5504_v17 = vpop.eup %5503  ;;  %5523 = vrcp.f32 %v3841_v48  ;;  %v4773_v54 = vmul.f32 -1.442695, %v3781_v14  ;;  %v3785_v16 = vadd.f32 %v3784_v6, %v3680_v60 }
 0xa99   : > { %v5506_v62 = vpop.eup %5505  ;;  %5525 = vrcp.f32 %v3842_v30  ;;  %v4774_v12 = vmul.f32 -1.442695, %v3783_v44  ;;  %v7224_v22 = vmul.f32 %v5504_v17, %v7726_v8 }
 0xa9a   : > { %v5508_v19 = vpop.eup %5507  ;;  %5527 = vpow2.f32 %v4772_v58  ;;  %v4775_v15 = vmul.f32 -1.442695, %v3785_v16  ;;  %v7230_v9 = vmul.f32 %v5506_v62, %v7728_v1  ;;  %v7734_v58 = vld [vmem:[#allocation28_spill] sm:$0xff]  ;;  %v7735_v16 = vld [vmem:[#allocation29_spill] sm:$0xff] }
 0xa9b   : > { %v5510_v25 = vpop.eup %5509  ;;  %5529 = vpow2.f32 %v4773_v54  ;;  %v7227_v61 = vmul.f32 %v5508_v19, %v7727_v24  ;;  %v3927_v11 = vmul.f32 %v7224_v22, %v7224_v22 }
 0xa9c   : > { %v5512_v18 = vpop.eup %5511  ;;  %5531 = vpow2.f32 %v4774_v12  ;;  %v7233_v50 = vmul.f32 %v5510_v25, %v7729_v39  ;;  %v3928_v53 = vmul.f32 %v7230_v9, %v7230_v9  ;;  %v7736_v25 = vld [vmem:[#allocation30_spill] sm:$0xff] }
 0xa9d   : > { %v5514_v36 = vpop.eup %5513  ;;  %v3843_v55 = vadd.f32 1.0, %v5512_v18  ;;  %5533 = vpow2.f32 %v4775_v15  ;;  %v3929_v34 = vmul.f32 %v7227_v61, %v7227_v61  ;;  %v3899_v7 = vadd.f32 %v7227_v61, %v7224_v22 }
 0xa9e   : > { %v5516_v29 = vpop.eup %5515  ;;  %v3844_v13 = vadd.f32 1.0, %v5514_v36  ;;  %v3930_v37 = vmul.f32 %v7233_v50, %v7233_v50  ;;  %v3912_v23 = vadd.f32 %v7233_v50, %v7230_v9 }
 0xa9f   : > { %v5518_v10 = vpop.eup %5517  ;;  %5535 = vrcp.f32 %v3843_v55  ;;  %v3845_v38 = vadd.f32 1.0, %v5516_v29  ;;  %v3943_v57 = vadd.f32 %v3929_v34, %v3927_v11  ;;  %v7737_v29 = vld [vmem:[#allocation31_spill] sm:$0xff]  ;;  %v7739_v34 = vld [vmem:[#allocation33_spill] sm:$0xff] }
 0xaa0   : > { %v5520_v45 = vpop.eup %5519  ;;  %5537 = vrcp.f32 %v3844_v13  ;;  %v3846_v2 = vadd.f32 1.0, %v5518_v10  ;;  %v3956_v60 = vadd.f32 %v3930_v37, %v3928_v53 }
 0xaa1   : > { %v5522_v3 = vpop.eup %5521  ;;  %5539 = vrcp.f32 %v3845_v38  ;;  %v7236_v51 = vmul.f32 %v5520_v45, %v7730_v33 }
 0xaa2   : > { %v5524_v47 = vpop.eup %5523  ;;  %5541 = vrcp.f32 %v3846_v2  ;;  %v7239_v63 = vmul.f32 %v5522_v3, %v7731_v20 }
 0xaa3   : > { %v5526_v0 = vpop.eup %5525  ;;  %v3931_v32 = vmul.f32 %v7236_v51, %v7236_v51  ;;  %v7256_v49 = vmul.f32 %v5524_v47, %v7732_v59  ;;  %v3900_v43 = vadd.f32 %v3899_v7, %v7236_v51 }
 0xaa4   : > { %v5528_v52 = vpop.eup %5527  ;;  %v3932_v42 = vmul.f32 %v7239_v63, %v7239_v63  ;;  %v7261_v46 = vmul.f32 %v5526_v0, %v7733_v40  ;;  %v3913_v48 = vadd.f32 %v3912_v23, %v7239_v63  ;;  %v7738_v0 = vld [vmem:[#allocation32_spill] sm:$0xff] }
 0xaa5   : > { %v5530_v31 = vpop.eup %5529  ;;  %v3847_v5 = vadd.f32 1.0, %v5528_v52  ;;  %v3944_v26 = vadd.f32 %v3943_v57, %v3931_v32  ;;  %v3933_v30 = vmul.f32 %v7256_v49, %v7256_v49  ;;  %v3901_v19 = vadd.f32 %v3900_v43, %v7256_v49 }
 0xaa6   : > { %v5532_v21 = vpop.eup %5531  ;;  %v3848_v41 = vadd.f32 1.0, %v5530_v31  ;;  %v3957_v17 = vadd.f32 %v3956_v60, %v3932_v42  ;;  %v3934_v54 = vmul.f32 %v7261_v46, %v7261_v46  ;;  %v3914_v36 = vadd.f32 %v3913_v48, %v7261_v46 }
 0xaa7   : > { %v5534_v56 = vpop.eup %5533  ;;  %5543 = vrcp.f32 %v3847_v5  ;;  %v3849_v27 = vadd.f32 1.0, %v5532_v21  ;;  %v3945_v10 = vadd.f32 %v3944_v26, %v3933_v30  ;;  %v7740_v21 = vld [vmem:[#allocation34_spill] sm:$0xff] }
 0xaa8   : > { %5545 = vrcp.f32 %v3848_v41  ;;  %v3850_v35 = vadd.f32 1.0, %v5534_v56  ;;  %v3958_v45 = vadd.f32 %v3957_v17, %v3934_v54  ;;  %v7741_v56 = vld [vmem:[#allocation35_spill] sm:$0xff] }
 0xaa9   : > { %v5536_v4 = vpop.eup %5535  ;;  %5547 = vrcp.f32 %v3849_v27 }
 0xaaa   : > { %v5538_v14 = vpop.eup %5537  ;;  %v7268_v44 = vmul.f32 %v5536_v4, %v7734_v58  ;;  %5549 = vrcp.f32 %v3850_v35 }
 0xaab   : > { %v5540_v6 = vpop.eup %5539  ;;  %v7273_v62 = vmul.f32 %v5538_v14, %v7735_v16 }
 0xaac   : > { %v5542_v12 = vpop.eup %5541  ;;  %v3935_v15 = vmul.f32 %v7268_v44, %v7268_v44  ;;  %v7279_v18 = vmul.f32 %v5540_v6, %v7736_v25  ;;  %v3902_v38 = vadd.f32 %v3901_v19, %v7268_v44 }
 0xaad   : > { %v3936_v55 = vmul.f32 %v7273_v62, %v7273_v62  ;;  %v7285_v13 = vmul.f32 %v5542_v12, %v7737_v29  ;;  %v3915_v8 = vadd.f32 %v3914_v36, %v7273_v62 }
 0xaae   : > { %v3946_v24 = vadd.f32 %v3945_v10, %v3935_v15  ;;  %v3937_v2 = vmul.f32 %v7279_v18, %v7279_v18  ;;  %v3903_v33 = vadd.f32 %v3902_v38, %v7279_v18 }
 0xaaf   : > { %v3959_v1 = vadd.f32 %v3958_v45, %v3936_v55  ;;  %v3938_v39 = vmul.f32 %v7285_v13, %v7285_v13  ;;  %v3916_v11 = vadd.f32 %v3915_v8, %v7285_v13 }
 0xab0   : > { %v3947_v7 = vadd.f32 %v3946_v24, %v3937_v2 }
 0xab1   : > { %v5544_v3 = vpop.eup %5543  ;;  %v3960_v32 = vadd.f32 %v3959_v1, %v3938_v39 }
 0xab2   : > { %v5546_v47 = vpop.eup %5545  ;;  %v7295_v20 = vmul.f32 %v5544_v3, %v7738_v0 }
 0xab3   : > { %v5548_v52 = vpop.eup %5547  ;;  %v7299_v31 = vmul.f32 %v5546_v47, %v7739_v34 }
 0xab4   : > { %v5550_v53 = vpop.eup %5549  ;;  %v3904_v37 = vadd.f32 %v3903_v33, %v7295_v20  ;;  %v3939_v5 = vmul.f32 %v7295_v20, %v7295_v20  ;;  %v7305_v23 = vmul.f32 %v5548_v52, %v7740_v21 }
 0xab5   : > { %v3917_v59 = vadd.f32 %v3916_v11, %v7299_v31  ;;  %v3940_v41 = vmul.f32 %v7299_v31, %v7299_v31  ;;  %v7311_v42 = vmul.f32 %v5550_v53, %v7741_v56 }
 0xab6   : > { %v3948_v40 = vadd.f32 %v3947_v7, %v3939_v5  ;;  %v3905_v27 = vadd.f32 %v3904_v37, %v7305_v23  ;;  %v3941_v57 = vmul.f32 %v7305_v23, %v7305_v23 }
 0xab7   : > { %v3961_v43 = vadd.f32 %v3960_v32, %v3940_v41  ;;  %v3918_v35 = vadd.f32 %v3917_v59, %v7311_v42  ;;  %v3942_v4 = vmul.f32 %v7311_v42, %v7311_v42 }
 0xab8   : > { %v3906_v60 = vrot.slane %v3905_v27, 4  ;;  %v3949_v48 = vadd.f32 %v3948_v40, %v3941_v57 }
 0xab9   : > { %v3919_v14 = vrot.slane %v3918_v35, 4  ;;  %v3962_v26 = vadd.f32 %v3961_v43, %v3942_v4 }
 0xaba   : > { %v3907_v30 = vadd.f32 %v3906_v60, %v3905_v27  ;;  %v3950_v58 = vrot.slane %v3949_v48, 4 }
 0xabb   : > { %v3920_v6 = vadd.f32 %v3919_v14, %v3918_v35  ;;  %v3963_v17 = vrot.slane %v3962_v26, 4 }
 0xabc   : > { %v3908_v54 = vrot.slane %v3907_v30, 2  ;;  %v3951_v16 = vadd.f32 %v3950_v58, %v3949_v48 }
 0xabd   : > { %v3921_v12 = vrot.slane %v3920_v6, 2  ;;  %v3964_v19 = vadd.f32 %v3963_v17, %v3962_v26 }
 0xabe   : > { %v3909_v15 = vadd.f32 %v3908_v54, %v3907_v30  ;;  %v3952_v25 = vrot.slane %v3951_v16, 2 }
 0xabf   : > { %v3922_v36 = vadd.f32 %v3921_v12, %v3920_v6  ;;  %v3965_v55 = vrot.slane %v3964_v19, 2 }
 0xac0   : > { %v3910_v29 = vrot.slane %v3909_v15, 1  ;;  %v3953_v10 = vadd.f32 %v3952_v25, %v3951_v16 }
 0xac1   : > { %v3923_v38 = vrot.slane %v3922_v36, 1  ;;  %v3966_v45 = vadd.f32 %v3965_v55, %v3964_v19 }
 0xac2   : > { %v3911_v8 = vadd.f32 %v3910_v29, %v3909_v15  ;;  %v3954_v24 = vrot.slane %v3953_v10, 1 }
 0xac3   : > { %v3924_v2 = vadd.f32 %v3923_v38, %v3922_v36  ;;  %v3967_v3 = vrot.slane %v3966_v45, 1 }
 0xac4   : > { %v3925_v1 = vmul.f32 0.015625, %v3911_v8  ;;  %v3955_v39 = vadd.f32 %v3954_v24, %v3953_v10 }
 0xac5   : > { %v3926_v47 = vmul.f32 0.015625, %v3924_v2  ;;  %v3968_v33 = vadd.f32 %v3967_v3, %v3966_v45 }
 0xac6   : > { %v3969_v0 = vmul.f32 0.015625, %v3955_v39  ;;  %v3971_v52 = vmul.f32 %v3925_v1, %v3925_v1  ;;  %v3981_v59 = vsub.f32 %v7224_v22, %v3925_v1  ;;  %v3983_v41 = vsub.f32 %v7227_v61, %v3925_v1 }
 0xac7   : > { %v3970_v11 = vmul.f32 0.015625, %v3968_v33  ;;  %v3972_v34 = vmul.f32 %v3926_v47, %v3926_v47  ;;  %v3982_v40 = vsub.f32 %v7230_v9, %v3926_v47  ;;  %v3984_v27 = vsub.f32 %v7233_v50, %v3926_v47 }
 0xac8   : > { %v3973_v53 = vsub.f32 %v3969_v0, %v3971_v52  ;;  %v3986_v57 = vsub.f32 %v7239_v63, %v3926_v47  ;;  %v3988_v43 = vsub.f32 %v7261_v46, %v3926_v47  ;;  %v3985_v58 = vsub.f32 %v7236_v51, %v3925_v1 }
 0xac9   : > { %v3974_v7 = vsub.f32 %v3970_v11, %v3972_v34  ;;  %v3987_v6 = vsub.f32 %v7256_v49, %v3925_v1  ;;  %v3990_v54 = vsub.f32 %v7273_v62, %v3926_v47  ;;  %v3992_v16 = vsub.f32 %v7285_v13, %v3926_v47 }
 0xaca   : > { %v3975_v37 = vmax.f32 %v3973_v53, 0.0  ;;  %v3989_v29 = vsub.f32 %v7268_v44, %v3925_v1  ;;  %v3991_v10 = vsub.f32 %v7279_v18, %v3925_v1  ;;  %v3994_v38 = vsub.f32 %v7299_v31, %v3926_v47 }
 0xacb   : > { %v3976_v5 = vmax.f32 %v3974_v7, 0.0  ;;  %v3996_v45 = vsub.f32 %v7311_v42, %v3926_v47  ;;  %v3993_v0 = vsub.f32 %v7295_v20, %v3925_v1  ;;  %v3995_v52 = vsub.f32 %v7305_v23, %v3925_v1  ;;  %v5606_v47 = vld [vmem:[%s7512_s2 + $0x10c] sm:$0xff]   ;;  %v5607_v1 = vld [vmem:[%s7512_s2 + $0x114] sm:$0xff]  }
 0xacc   : > { %v3977_v21 = vadd.f32 1e-05, %v3975_v37 }
 0xacd   : > { %v3978_v32 = vadd.f32 1e-05, %v3976_v5  ;;  %v5608_v5 = vld [vmem:[%s7512_s2 + $0x11c] sm:$0xff]  }
 0xace   : > { %5551 = vrsqrt.f32 %v3977_v21  ;;  %v5609_v21 = vld [vmem:[%s7512_s2 + $0x124] sm:$0xff]  }
 0xacf   : > { %5553 = vrsqrt.f32 %v3978_v32  ;;  %v7742_v32 = vld [vmem:[#allocation16_spill] sm:$0xff] }
 0xad8   : > { %v5552_v56 = vpop.eup %5551 }
 0xad9   : > { %v5554_v35 = vpop.eup %5553  ;;  %v3997_v4 = vmul.f32 %v5552_v56, %v3981_v59  ;;  %v3999_v60 = vmul.f32 %v5552_v56, %v3983_v41  ;;  %v4001_v19 = vmul.f32 %v5552_v56, %v3985_v58  ;;  %v4003_v15 = vmul.f32 %v5552_v56, %v3987_v6 }
 0xada   : > { %v3998_v48 = vmul.f32 %v5554_v35, %v3982_v40  ;;  %v4000_v14 = vmul.f32 %v5554_v35, %v3984_v27  ;;  %v4002_v26 = vmul.f32 %v5554_v35, %v3986_v57  ;;  %v4004_v30 = vmul.f32 %v5554_v35, %v3988_v43 }
 0xadb   : > { %v4013_v12 = vpack.c.bf16 %v3999_v60, %v3997_v4  ;;  %v4006_v36 = vmul.f32 %v5554_v35, %v3990_v54  ;;  %v4008_v55 = vmul.f32 %v5554_v35, %v3992_v16  ;;  %v4015_v8 = vpack.c.bf16 %v4003_v15, %v4001_v19 }
 0xadc   : > { %v4014_v17 = vpack.c.bf16 %v4000_v14, %v3998_v48  ;;  %v4016_v25 = vpack.c.bf16 %v4004_v30, %v4002_v26  ;;  %v4005_v24 = vmul.f32 %v5552_v56, %v3989_v29  ;;  %v4007_v2 = vmul.f32 %v5552_v56, %v3991_v10  ;;  %v5041_v30 = vpop.permute.xlu1 %5040 }
 0xadd   : > { %v4018_v3 = vpack.c.bf16 %v4008_v55, %v4006_v36  ;;  %v4010_v39 = vmul.f32 %v5554_v35, %v3994_v38  ;;  %v4012_v33 = vmul.f32 %v5554_v35, %v3996_v45  ;;  %v4009_v34 = vmul.f32 %v5552_v56, %v3993_v0 }
 0xade   : > { %4101 = vmatprep.subr.bf16.mxu0 %v4014_v17  ;;  %v4017_v11 = vpack.c.bf16 %v4007_v2, %v4005_v24  ;;  %v4011_v53 = vmul.f32 %v5552_v56, %v3995_v52  ;;  %v5037_v59 = vunpack.i.l.bf16 %v7742_v32  ;;  %v5038_v56 = vunpack.i.h.bf16 %v7742_v32 }
 0xadf   : > { %4102 = vmatpush1.bf16.msra.mxu0 %v4013_v12  ;;  %v4020_v7 = vpack.c.bf16 %v4012_v33, %v4010_v39  ;;  %v5042_v17 = vunpack.i.l.bf16 %v5041_v30 }
 0xae0   : > { %4103 = vmatprep.subr.bf16.mxu0 %v4016_v25  ;;  %v4019_v37 = vpack.c.bf16 %v4011_v53, %v4009_v34  ;;  %v5043_v25 = vunpack.i.h.bf16 %v5041_v30 }
 0xae3   : > { %4104 = vmatpush1.bf16.msra.mxu0 %v4015_v8 }
 0xae4   : > { %4105 = vmatprep.subr.bf16.mxu0 %v4018_v3 }
 0xae7   : > { %4106 = vmatpush1.bf16.msra.mxu0 %v4017_v11 }
 0xae8   : > { %4107 = vmatprep.subr.bf16.mxu0 %v4020_v7 }
 0xaeb   : > { %4108 = vmatpush1.bf16.msra.mxu0 %v4019_v37 }
 0xaee   : > { %4780 = vmatmul.mubr.msk.bf16.vlgmr.msra.gmra.mrb[56].mxu0 %vm1056_vm6, %v5606_v47 }
 0xaef   : > { %4143 = vmatprep.mubr.bf16.mxu0 %v7700_v28 }
 0xaf6   : > { %4781 = vmatmul.mubr.msk.bf16.gmra.mrb[60].mxu0 %vm1056_vm6, %v5607_v1  ;;  %v7395_v1 = vpop.permute.xlu1 %5050 }
 0xaf7   : > { %4153 = vmatprep.mubr.bf16.mxu0 %v7700_v28 }
 0xafe   : > { %4782 = vmatmul.mubr.msk.bf16.gmra.mrb[64].mxu0 %vm1056_vm6, %v5608_v5 }
 0xaff   : > { %4163 = vmatprep.mubr.bf16.mxu0 %v7700_v28 }
 0xb06   : > { %4783 = vmatmul.mubr.msk.bf16.gmra.mrb[68].mxu0 %vm1056_vm6, %v5609_v21 }
 0xbc1   : > { %v4135_v41 = vpop.f32.mrb[56].mxu0 }
 0xbc2   : > { %v7356_v40 = vadd.f32 %v5037_v59, %v4135_v41  ;;  %v4137_v27 = vpop.f32.mrb[57].mxu0 }
 0xbc3   : > { %v7358_v57 = vadd.f32 %v5037_v59, %v4137_v27  ;;  %v4139_v43 = vpop.f32.mrb[58].mxu0  ;;  %v7743_v59 = vld [vmem:[#allocation17_spill] sm:$0xff] }
 0xbc4   : > { %v4174_v28 = vmul.f32 %v7356_v40, %v7356_v40  ;;  %v7362_v35 = vadd.f32 %v5038_v56, %v4139_v43  ;;  %v4141_v4 = vpop.f32.mrb[59].mxu0  ;;  %v5047_v41 = vunpack.i.l.bf16 %v7743_v59  ;;  %v5048_v43 = vunpack.i.h.bf16 %v7743_v59 }
 0xbc5   : > { %v4175_v60 = vmul.f32 %v7358_v57, %v7358_v57  ;;  %v7366_v48 = vadd.f32 %v5038_v56, %v4141_v4 }
 0xbc6   : > { %v4190_v14 = vmul.f32 %v4174_v28, %v7356_v40  ;;  %v4176_v26 = vmul.f32 %v7362_v35, %v7362_v35 }
 0xbc7   : > { %v4191_v58 = vmul.f32 %v4175_v60, %v7358_v57  ;;  %v4177_v6 = vmul.f32 %v7366_v48, %v7366_v48 }
 0xbc8   : > { %v4206_v54 = vmul.f32 0.044715, %v4190_v14  ;;  %v4192_v16 = vmul.f32 %v4176_v26, %v7362_v35  ;;  %v5053_v14 = vunpack.i.h.bf16 %v7395_v1 }
 0xbc9   : > { %v4207_v12 = vmul.f32 0.044715, %v4191_v58  ;;  %v4193_v19 = vmul.f32 %v4177_v6, %v7366_v48  ;;  %v4145_v15 = vpop.f32.mrb[60].mxu0 }
 0xbca   : > { %v4222_v36 = vadd.f32 %v4206_v54, %v7356_v40  ;;  %v4208_v55 = vmul.f32 0.044715, %v4192_v16  ;;  %v7377_v29 = vadd.f32 %v5042_v17, %v4145_v15  ;;  %v4147_v10 = vpop.f32.mrb[61].mxu0 }
 0xbcb   : > { %v4223_v38 = vadd.f32 %v4207_v12, %v7358_v57  ;;  %v4209_v45 = vmul.f32 0.044715, %v4193_v19  ;;  %v7380_v8 = vadd.f32 %v5042_v17, %v4147_v10  ;;  %v4149_v24 = vpop.f32.mrb[62].mxu0 }
 0xbcc   : > { %v4238_v2 = vmul.f32 0.7978846, %v4222_v36  ;;  %v4224_v3 = vadd.f32 %v4208_v55, %v7362_v35  ;;  %v4178_v39 = vmul.f32 %v7377_v29, %v7377_v29  ;;  %v7385_v33 = vadd.f32 %v5043_v25, %v4149_v24  ;;  %v4151_v0 = vpop.f32.mrb[63].mxu0 }
 0xbcd   : > { %v4239_v52 = vmul.f32 0.7978846, %v4223_v38  ;;  %v4225_v11 = vadd.f32 %v4209_v45, %v7366_v48  ;;  %v4179_v34 = vmul.f32 %v7380_v8, %v7380_v8  ;;  %v7390_v53 = vadd.f32 %v5043_v25, %v4151_v0 }
 0xbce   : > { %5555 = vtanh.f32 %v4238_v2  ;;  %v4240_v7 = vmul.f32 0.7978846, %v4224_v3  ;;  %v4194_v37 = vmul.f32 %v4178_v39, %v7377_v29  ;;  %v4180_v47 = vmul.f32 %v7385_v33, %v7385_v33 }
 0xbcf   : > { %5557 = vtanh.f32 %v4239_v52  ;;  %v4241_v5 = vmul.f32 0.7978846, %v4225_v11  ;;  %v4195_v21 = vmul.f32 %v4179_v34, %v7380_v8  ;;  %v4181_v32 = vmul.f32 %v7390_v53, %v7390_v53 }
 0xbd0   : > { %5559 = vtanh.f32 %v4240_v7  ;;  %v4210_v56 = vmul.f32 0.044715, %v4194_v37  ;;  %v4196_v27 = vmul.f32 %v4180_v47, %v7385_v33  ;;  %v5052_v7 = vunpack.i.l.bf16 %v7395_v1 }
 0xbd1   : > { %v4211_v28 = vmul.f32 0.044715, %v4195_v21  ;;  %v4197_v4 = vmul.f32 %v4181_v32, %v7390_v53  ;;  %v4155_v60 = vpop.f32.mrb[64].mxu0  ;;  %5561 = vtanh.f32 %v4241_v5 }
 0xbd2   : > { %v4226_v26 = vadd.f32 %v4210_v56, %v7377_v29  ;;  %v4212_v30 = vmul.f32 0.044715, %v4196_v27  ;;  %v7406_v58 = vadd.f32 %v5047_v41, %v4155_v60  ;;  %v4157_v6 = vpop.f32.mrb[65].mxu0 }
 0xbd3   : > { %v4227_v17 = vadd.f32 %v4211_v28, %v7380_v8  ;;  %v4213_v54 = vmul.f32 0.044715, %v4197_v4  ;;  %v7409_v16 = vadd.f32 %v5047_v41, %v4157_v6  ;;  %v4159_v12 = vpop.f32.mrb[66].mxu0 }
 0xbd4   : > { %v4242_v19 = vmul.f32 0.7978846, %v4226_v26  ;;  %v4228_v15 = vadd.f32 %v4212_v30, %v7385_v33  ;;  %v4182_v25 = vmul.f32 %v7406_v58, %v7406_v58  ;;  %v7414_v36 = vadd.f32 %v5048_v43, %v4159_v12  ;;  %v4161_v55 = vpop.f32.mrb[67].mxu0 }
 0xbd5   : > { %v4243_v10 = vmul.f32 0.7978846, %v4227_v17  ;;  %v4229_v38 = vadd.f32 %v4213_v54, %v7390_v53  ;;  %v4183_v45 = vmul.f32 %v7409_v16, %v7409_v16  ;;  %v7419_v24 = vadd.f32 %v5048_v43, %v4161_v55 }
 0xbd6   : > { %5563 = vtanh.f32 %v4242_v19  ;;  %v4244_v2 = vmul.f32 0.7978846, %v4228_v15  ;;  %v4198_v3 = vmul.f32 %v4182_v25, %v7406_v58  ;;  %v4184_v39 = vmul.f32 %v7414_v36, %v7414_v36 }
 0xbd7   : > { %5565 = vtanh.f32 %v4243_v10  ;;  %v4245_v0 = vmul.f32 0.7978846, %v4229_v38  ;;  %v4199_v52 = vmul.f32 %v4183_v45, %v7409_v16  ;;  %v4185_v11 = vmul.f32 %v7419_v24, %v7419_v24 }
 0xbd8   : > { %v5556_v34 = vpop.eup %5555  ;;  %5567 = vtanh.f32 %v4244_v2  ;;  %v4214_v37 = vmul.f32 0.044715, %v4198_v3  ;;  %v4200_v47 = vmul.f32 %v4184_v39, %v7414_v36 }
 0xbd9   : > { %v5558_v5 = vpop.eup %5557  ;;  %v4270_v21 = vadd.f32 1.0, %v5556_v34  ;;  %5569 = vtanh.f32 %v4245_v0  ;;  %v4215_v32 = vmul.f32 0.044715, %v4199_v52  ;;  %v4201_v59 = vmul.f32 %v4185_v11, %v7419_v24  ;;  %v4165_v41 = vpop.f32.mrb[68].mxu0 }
 0xbda   : > { %v5560_v56 = vpop.eup %5559  ;;  %v4230_v27 = vadd.f32 %v4214_v37, %v7406_v58  ;;  %v4216_v43 = vmul.f32 0.044715, %v4200_v47  ;;  %v7431_v28 = vadd.f32 %v5052_v7, %v4165_v41  ;;  %v4167_v4 = vpop.f32.mrb[69].mxu0  ;;  %v4271_v60 = vadd.f32 1.0, %v5558_v5 }
 0xbdb   : > { %v4286_v26 = vmul.f32 0.5, %v4270_v21  ;;  %v4272_v30 = vadd.f32 1.0, %v5560_v56  ;;  %v4231_v6 = vadd.f32 %v4215_v32, %v7409_v16  ;;  %v4217_v17 = vmul.f32 0.044715, %v4201_v59  ;;  %v4169_v54 = vpop.f32.mrb[70].mxu0  ;;  %v5562_v10 = vpop.eup %5561 }
 0xbdc   : > { %v4246_v12 = vmul.f32 0.7978846, %v4230_v27  ;;  %v4232_v19 = vadd.f32 %v4216_v43, %v7414_v36  ;;  %v4186_v15 = vmul.f32 %v7431_v28, %v7431_v28  ;;  %v7437_v25 = vadd.f32 %v5052_v7, %v4167_v4  ;;  %v4171_v55 = vpop.f32.mrb[71].mxu0 }
 0xbdd   : > { %v4302_v38 = vmul.f32 %v4286_v26, %v7356_v40  ;;  %v4288_v45 = vmul.f32 0.5, %v4272_v30  ;;  %v4247_v2 = vmul.f32 0.7978846, %v4231_v6  ;;  %v4233_v3 = vadd.f32 %v4217_v17, %v7419_v24 }
 0xbde   : > { %5571 = vtanh.f32 %v4246_v12  ;;  %v4248_v39 = vmul.f32 0.7978846, %v4232_v19  ;;  %v4202_v0 = vmul.f32 %v4186_v15, %v7431_v28  ;;  %v4187_v52 = vmul.f32 %v7437_v25, %v7437_v25 }
 0xbdf   : > { %v4304_v11 = vmul.f32 %v4288_v45, %v7362_v35  ;;  %5573 = vtanh.f32 %v4247_v2  ;;  %v4249_v34 = vmul.f32 0.7978846, %v4233_v3  ;;  %v7447_v7 = vadd.f32 %v5053_v14, %v4169_v54 }
 0xbe0   : > { %v5564_v40 = vpop.eup %5563  ;;  %5575 = vtanh.f32 %v4248_v39  ;;  %v4218_v37 = vmul.f32 0.044715, %v4202_v0  ;;  %v4203_v47 = vmul.f32 %v4187_v52, %v7437_v25  ;;  %v7452_v5 = vadd.f32 %v5053_v14, %v4171_v55 }
 0xbe1   : > { %v5566_v21 = vpop.eup %5565  ;;  %v4274_v32 = vadd.f32 1.0, %v5564_v40  ;;  %5577 = vtanh.f32 %v4249_v34  ;;  %v4188_v35 = vmul.f32 %v7447_v7, %v7447_v7  ;;  %v4273_v59 = vadd.f32 1.0, %v5562_v10 }
 0xbe2   : > { %v5568_v41 = vpop.eup %5567  ;;  %v4234_v56 = vadd.f32 %v4218_v37, %v7431_v28  ;;  %v4219_v27 = vmul.f32 0.044715, %v4203_v47  ;;  %v4189_v43 = vmul.f32 %v7452_v5, %v7452_v5  ;;  %v4287_v4 = vmul.f32 0.5, %v4271_v60 }
 0xbe3   : > { %v5570_v26 = vpop.eup %5569  ;;  %v4290_v30 = vmul.f32 0.5, %v4274_v32  ;;  %v4276_v1 = vadd.f32 1.0, %v5568_v41  ;;  %v4204_v14 = vmul.f32 %v4188_v35, %v7447_v7  ;;  %v4289_v6 = vmul.f32 0.5, %v4273_v59 }
 0xbe4   : > { %v4250_v17 = vmul.f32 0.7978846, %v4234_v56  ;;  %v4235_v54 = vadd.f32 %v4219_v27, %v7437_v25  ;;  %v4205_v12 = vmul.f32 %v4189_v43, %v7452_v5  ;;  %v4303_v19 = vmul.f32 %v4287_v4, %v7358_v57 }
 0xbe5   : > { %v4306_v15 = vmul.f32 %v4290_v30, %v7377_v29  ;;  %v4292_v55 = vmul.f32 0.5, %v4276_v1  ;;  %v4220_v10 = vmul.f32 0.044715, %v4204_v14  ;;  %v4305_v45 = vmul.f32 %v4289_v6, %v7366_v48 }
 0xbe6   : > { %5579 = vtanh.f32 %v4250_v17  ;;  %v4251_v60 = vmul.f32 0.7978846, %v4235_v54  ;;  %v4221_v2 = vmul.f32 0.044715, %v4205_v12  ;;  %v4319_v3 = vadd.f32 %v4303_v19, %v7230_v9 }
 0xbe7   : > { %v4308_v39 = vmul.f32 %v4292_v55, %v7385_v33  ;;  %v4236_v0 = vadd.f32 %v4220_v10, %v7447_v7  ;;  %v4321_v52 = vadd.f32 %v4305_v45, %v7233_v50  ;;  %v4318_v34 = vadd.f32 %v4302_v38, %v7224_v22 }
 0xbe8   : > { %v5572_v57 = vpop.eup %5571  ;;  %5581 = vtanh.f32 %v4251_v60  ;;  %v4237_v29 = vadd.f32 %v4221_v2, %v7452_v5  ;;  %v4320_v40 = vadd.f32 %v4304_v11, %v7227_v61  ;;  %v4275_v48 = vadd.f32 1.0, %v5566_v21 }
 0xbe9   : > { %v5574_v37 = vpop.eup %5573  ;;  %v4278_v47 = vadd.f32 1.0, %v5572_v57  ;;  %v4252_v32 = vmul.f32 0.7978846, %v4236_v0  ;;  %v4335_v35 = vpack.c.bf16 %v4321_v52, %v4319_v3  ;;  %v4277_v9 = vadd.f32 1.0, %v5570_v26 }
 0xbea   : > { %v5576_v59 = vpop.eup %5575  ;;  %v4253_v33 = vmul.f32 0.7978846, %v4237_v29  ;;  %v4334_v41 = vpack.c.bf16 %v4320_v40, %v4318_v34  ;;  %v4291_v56 = vmul.f32 0.5, %v4275_v48  ;;  %v4322_v50 = vadd.f32 %v4306_v15, %v7236_v51 }
 0xbeb   : > { %v5578_v27 = vpop.eup %5577  ;;  %v4294_v22 = vmul.f32 0.5, %v4278_v47  ;;  %v4280_v38 = vadd.f32 1.0, %v5576_v59  ;;  %5583 = vtanh.f32 %v4252_v32  ;;  %4351 = vmatprep.subr.bf16.mxu1 %v4335_v35  ;;  %v4293_v43 = vmul.f32 0.5, %v4277_v9 }
 0xbec   : > { %5585 = vtanh.f32 %v4253_v33  ;;  %4352 = vmatpush1.bf16.msra.mxu1 %v4334_v41  ;;  %v4307_v61 = vmul.f32 %v4291_v56, %v7380_v8  ;;  %v4324_v11 = vadd.f32 %v4308_v39, %v7256_v49  ;;  %v4279_v21 = vadd.f32 1.0, %v5574_v37 }
 0xbed   : > { %v4310_v4 = vmul.f32 %v4294_v22, %v7406_v58  ;;  %v4296_v26 = vmul.f32 0.5, %v4280_v38  ;;  %v4309_v30 = vmul.f32 %v4293_v43, %v7390_v53  ;;  %v4281_v1 = vadd.f32 1.0, %v5578_v27 }
 0xbee   : > { %v4336_v51 = vpack.c.bf16 %v4324_v11, %v4322_v50  ;;  %v4295_v14 = vmul.f32 0.5, %v4279_v21  ;;  %v4323_v17 = vadd.f32 %v4307_v61, %v7239_v63 }
 0xbef   : > { %v4312_v6 = vmul.f32 %v4296_v26, %v7414_v36  ;;  %v4325_v54 = vadd.f32 %v4309_v30, %v7261_v46  ;;  %v4297_v12 = vmul.f32 0.5, %v4281_v1  ;;  %v4326_v49 = vadd.f32 %v4310_v4, %v7268_v44 }
 0xbf0   : > { %v5580_v19 = vpop.eup %5579  ;;  %v4311_v8 = vmul.f32 %v4295_v14, %v7409_v16 }
 0xbf1   : > { %v4282_v15 = vadd.f32 1.0, %v5580_v19  ;;  %v4337_v58 = vpack.c.bf16 %v4325_v54, %v4323_v17  ;;  %v4313_v55 = vmul.f32 %v4297_v12, %v7419_v24  ;;  %v4328_v53 = vadd.f32 %v4312_v6, %v7279_v18 }
 0xbf2   : > { %v5582_v10 = vpop.eup %5581  ;;  %v4327_v36 = vadd.f32 %v4311_v8, %v7273_v62 }
 0xbf3   : > { %4353 = vmatprep.subr.bf16.mxu1 %v4337_v58  ;;  %v4329_v63 = vadd.f32 %v4313_v55, %v7285_v13  ;;  %v4338_v45 = vpack.c.bf16 %v4328_v53, %v4326_v49  ;;  %v4283_v46 = vadd.f32 1.0, %v5582_v10  ;;  %v4298_v60 = vmul.f32 0.5, %v4282_v15 }
 0xbf4   : > { %4354 = vmatpush1.bf16.msra.mxu1 %v4336_v51 }
 0xbf5   : > { %v5584_v2 = vpop.eup %5583  ;;  %v4339_v16 = vpack.c.bf16 %v4329_v63, %v4327_v36  ;;  %v4299_v3 = vmul.f32 0.5, %v4283_v46  ;;  %v4314_v24 = vmul.f32 %v4298_v60, %v7431_v28 }
 0xbf6   : > { %v5586_v44 = vpop.eup %5585  ;;  %v4284_v39 = vadd.f32 1.0, %v5584_v2 }
 0xbf7   : > { %4355 = vmatprep.subr.bf16.mxu1 %v4339_v16  ;;  %v4285_v0 = vadd.f32 1.0, %v5586_v44  ;;  %v4315_v62 = vmul.f32 %v4299_v3, %v7437_v25  ;;  %v4330_v57 = vadd.f32 %v4314_v24, %v7295_v20  ;;  %v5610_v25 = vld [vmem:[%s7512_s2 + $0x12c] sm:$0xf] }
 0xbf8   : > { %v4300_v18 = vmul.f32 0.5, %v4284_v39  ;;  %4356 = vmatpush1.bf16.msra.mxu1 %v4338_v45 }
 0xbf9   : > { %v4301_v52 = vmul.f32 0.5, %v4285_v0  ;;  %v4331_v40 = vadd.f32 %v4315_v62, %v7299_v31 }
 0xbfa   : > { %v4316_v13 = vmul.f32 %v4300_v18, %v7447_v7  ;;  %v7744_v7 = vld [vmem:[#allocation18_spill] sm:$0xff] }
 0xbfb   : > { %v4317_v34 = vmul.f32 %v4301_v52, %v7452_v5  ;;  %v5058_v20 = vunpack.i.h.bf16 %v7744_v7 }
 0xbfc   : > { %v4332_v29 = vadd.f32 %v4316_v13, %v7305_v23 }
 0xbfd   : > { %v4333_v48 = vadd.f32 %v4317_v34, %v7311_v42 }
 0xbfe   : > { %v4340_v37 = vpack.c.bf16 %v4332_v29, %v4330_v57 }
 0xbff   : > { %v4341_v28 = vpack.c.bf16 %v4333_v48, %v4331_v40 }
 0xc01   : > { %4357 = vmatprep.subr.bf16.mxu1 %v4341_v28 }
 0xc02   : > { %4358 = vmatpush1.bf16.msra.mxu1 %v4340_v37 }
 0xc05   : > { %4784 = vmatmul.mubr.msk.bf16.vlgmr.msra.gmra.mrb[68].mxu1 %vm1056_vm6, %v5610_v25 }
 0xcd8   : > { %v4385_v5 = vpop.f32.mrb[68].mxu1 }
 0xcd9   : > { %v4386_v23 = vadd.f32 %v5058_v20, %v4385_v5  ;;  %v4387_v47 = vpop.f32.mrb[69].mxu1 }
 0xcda   : > { %v4388_v31 = vadd.f32 %v5058_v20, %v4387_v47  ;;  %v4389_v32 = vpop.f32.mrb[70].mxu1 }
 0xcdb   : > { %v4422_v42 = vrot.slane %v4386_v23, 3  ;;  %v4390_v35 = vpop.f32.mrb[71].mxu1 }
 0xcdc   : > { %v4423_v9 = vrot.slane %v4388_v31, 3 }
 0xcdd   : > { %4426 = vst [vmem:[%s7140_s24] sm:$0x60] %v4422_v42 }
 0xcde   : > { %4427 = vst [vmem:[%s7140_s24 + $0x8] sm:$0x60] %v4423_v9 }
 0xcdf PF: > { %s15_s17 = sadd.s32 1, %s5633_s17   ;;  %s7745_s15 = smov %s5629_s16 }
 0xce0   : > { %p12_p5 = scmp.ge.s32.totalorder %s15_s17, 4   ;;  %s7746_s16 = smov %s7748_s18 }
 0xce2   :  { %14 = sbr.rel (!%p12_p5) target bundleno = 2 (0x2), region = 80 }

</bundles_post_ra>
